<compile_context>
chip_gen: v7x
topology: tpu7x:2x2x1
jax: 0.10.0
libtpu: 0.0.40
codegen_flags: <defaults>
</compile_context>

<pallas_src>
import functools

import jax
import jax.numpy as jnp
from jax import lax
from jax.experimental import pallas as pl
from jax.experimental.pallas import tpu as pltpu

SIGMA_BOOST = 2.0   # constant from the sparse-hyper library (sparse.transform_sigmas)
EPSILON = 1e-7


@functools.lru_cache(maxsize=None)
def _vmem_budget_bytes():
    """Per-generation scoped-VMEM budget (~75% of physical VMEM; review: no hard-coded 64MiB)."""
    try:
        cap = int(pltpu.get_tpu_info().vmem_capacity_bytes)
    except Exception:
        cap = 64 * 1024 * 1024          # conservative fallback (= v7x physical VMEM)
    return max((cap * 3) // 4, 32 * 1024 * 1024)


def _round_up(x, m):
    return ((x + m - 1) // m) * m


def _tile_dim(dim, target, align):
    """Return (tile, padded_dim).

    Largest aligned divisor of `dim` that is <= target; if none exists the caller zero-pads the
    dimension to a multiple of the aligned target (keeps stores lane-dense, keeps any single
    block bounded — perf-review hardening of the old _pick_tile full-dim fallback)."""
    if dim <= target:
        return dim, dim                       # single full-extent block (always legal)
    t0 = max((target // align) * align, align)
    for cand in range(t0, align - 1, -align):
        if dim % cand == 0:
            return cand, dim
    return t0, _round_up(dim, t0)


# ----------------------------------------------------------------------------
# Pallas kernel 1: tiled dense linear layer  y = x @ W (+ b)
# ----------------------------------------------------------------------------
def _linear_kernel(x_ref, w_ref, o_ref, acc_ref):
    @pl.when(pl.program_id(2) == 0)
    def _():
        acc_ref[...] = jnp.zeros_like(acc_ref)

    acc_ref[...] += jnp.dot(x_ref[...], w_ref[...], preferred_element_type=jnp.float32)

    @pl.when(pl.program_id(2) == pl.num_programs(2) - 1)
    def _():
        o_ref[...] = acc_ref[...].astype(o_ref.dtype)


def _linear_bias_kernel(x_ref, w_ref, b_ref, o_ref, acc_ref):
    @pl.when(pl.program_id(2) == 0)
    def _():
        acc_ref[...] = jnp.zeros_like(acc_ref)

    acc_ref[...] += jnp.dot(x_ref[...], w_ref[...], preferred_element_type=jnp.float32)

    @pl.when(pl.program_id(2) == pl.num_programs(2) - 1)
    def _():
        o_ref[...] = (acc_ref[...] + b_ref[...]).astype(o_ref.dtype)


def linear_pallas(x, w, b=None, *, out_dtype=jnp.float32):
    """x: (M, K), w: (K, N), b: (N,) or None -> (M, N).  bf16 MXU inputs, f32 accumulation."""
    M, K = x.shape
    K2, N = w.shape
    assert K == K2
    tm, Mp = _tile_dim(M, 512, 16)     # larger M tiles (perf review): amortize per-step cost
    tn, Np = _tile_dim(N, 256, 128)    # lane dim -> multiple of 128 (or full)
    tk, Kp = _tile_dim(K, 512, 128)

    xb = x.astype(jnp.bfloat16)
    wb = w.astype(jnp.bfloat16)
    if (Mp, Kp) != (M, K):
        xb = jnp.pad(xb, ((0, Mp - M), (0, Kp - K)))
    if (Kp, Np) != (K, N):
        wb = jnp.pad(wb, ((0, Kp - K), (0, Np - N)))

    in_specs = [
        pl.BlockSpec((tm, tk), lambda i, j, kk: (i, kk)),
        pl.BlockSpec((tk, tn), lambda i, j, kk: (kk, j)),
    ]
    operands = [xb, wb]
    kernel = _linear_kernel
    if b is not None:
        bias = b.astype(jnp.float32)
        if Np != N:
            bias = jnp.pad(bias, (0, Np - N))
        in_specs.append(pl.BlockSpec((1, tn), lambda i, j, kk: (0, j)))
        operands.append(bias.reshape(1, Np))
        kernel = _linear_bias_kernel

    cost = pl.CostEstimate(
        flops=2 * Mp * Np * Kp,
        transcendentals=0,
        bytes_accessed=2 * (Mp * Kp + Kp * Np) + 4 * Mp * Np,
    )
    out = pl.pallas_call(
        kernel,
        out_shape=jax.ShapeDtypeStruct((Mp, Np), out_dtype),
        grid_spec=pltpu.PrefetchScalarGridSpec(
            num_scalar_prefetch=0,
            grid=(Mp // tm, Np // tn, Kp // tk),
            in_specs=in_specs,
            out_specs=pl.BlockSpec((tm, tn), lambda i, j, kk: (i, j)),
            scratch_shapes=[pltpu.VMEM((tm, tn), jnp.float32)],
        ),
        compiler_params=pltpu.CompilerParams(
            dimension_semantics=("parallel", "parallel", "arbitrary"),
            vmem_limit_bytes=_vmem_budget_bytes(),
        ),
        cost_estimate=cost,
    )(*operands)
    if (Mp, Np) != (M, N):
        out = out[:M, :N]
    return out


# ----------------------------------------------------------------------------
# Pallas kernel 2: sparse attention core (one (batch, query-tile) block per grid step)
# ----------------------------------------------------------------------------
def _sparse_attn_kernel(idx_ref, w_ref, q_ref, k_ref, v_ref, o_ref,
                        s_sc, p_sc, m_sc, l_sc, o_acc, *, heads, head_dim, vs):
    h, e = heads, head_dim
    tq = q_ref.shape[1]
    t = k_ref.shape[1]

    tpos = lax.broadcasted_iota(jnp.int32, (tq, t), 1)

    for hi in range(h):
        sl = slice(hi * e, (hi + 1) * e)
        q_h = q_ref[0, :, sl]            # (tq, e) bf16, pre-scaled by 1/e**0.25
        k_h = k_ref[0, :, sl]            # (t,  e) bf16, pre-scaled by 1/e**0.25

        # Dense per-head scores ONCE per tile (MXU): replaces O(vs) one-hot gather matmuls.
        s_sc[...] = lax.dot_general(q_h, k_h, (((1,), (1,)), ((), ())),
                                    preferred_element_type=jnp.float32)     # (tq, t)
        p_sc[...] = jnp.zeros_like(p_sc)
        m_sc[...] = jnp.full_like(m_sc, -1e30)
        l_sc[...] = jnp.zeros_like(l_sc)

        # Stream the vs sampled connections with an online softmax over the samples.
        # Per sample (VPU/XLU only): gather the sampled score from s_sc with a (tq,t) one-hot
        # mask + lane reduce, then scatter the sample probability into p_sc.  Masked samples
        # (proposal weight 0) get logit exactly 0, matching the PyTorch reference.
        for vi in range(vs):
            col = idx_ref[0, :, vi:vi + 1]                        # (tq, 1) int32
            wv = w_ref[0, :, vi:vi + 1]                           # (tq, 1) f32 proposal weight
            onehot = col == tpos                                  # (tq, t) bool
            g = jnp.sum(jnp.where(onehot, s_sc[...], 0.0),
                        axis=1, keepdims=True)                    # (tq, 1) gathered q.k
            logit = wv * g
            m_new = jnp.maximum(m_sc[...], logit)
            alpha = jnp.exp(m_sc[...] - m_new)
            p = jnp.exp(logit - m_new)
            l_sc[...] = alpha * l_sc[...] + p
            p_sc[...] = alpha * p_sc[...] + jnp.where(onehot, p, 0.0)
            m_sc[...] = m_new

        v_h = v_ref[0, :, sl]                                     # (t, e) bf16
        out_h = jnp.dot(p_sc[...].astype(jnp.bfloat16), v_h,
                        preferred_element_type=jnp.float32)       # single P @ V_h per head
        # exact (non-approx) normalization: epilogue-only, negligible cost
        o_acc[:, sl] = out_h / l_sc[...]

    # single lane-dense output store (perf review: avoid per-head masked vst)
    o_ref[0, :, :] = o_acc[...].astype(o_ref.dtype)


def sparse_attention_pallas(q, k, v, idx, weights, *, heads):
    """q,k,v: (b,t,h*e) bf16 (q/k pre-scaled); idx: (b,t,vs) int; weights: (b,t,vs) f32."""
    b, t, he = q.shape
    e = he // heads
    vs = idx.shape[2]

    # Query-tile size: keep the two (tq, t) f32 scratches (scores + scatter) within ~8 MiB so
    # the kernel fits comfortably inside the v7x 64 MiB VMEM as well.
    tq_target = min(256, max(8, (8 * 1024 * 1024) // (8 * max(t, 1))))
    tq, tp = _tile_dim(t, tq_target, 8)
    if tp != t:
        pad = tp - t
        q = jnp.pad(q, ((0, 0), (0, pad), (0, 0)))
        idx = jnp.pad(idx, ((0, 0), (0, pad), (0, 0)))
        weights = jnp.pad(weights, ((0, 0), (0, pad), (0, 0)))
    nq = tp // tq

    cost = pl.CostEstimate(
        flops=4 * b * tp * t * he,                    # Q.K^T + P.V per head per query tile
        transcendentals=2 * b * tp * vs * heads,
        bytes_accessed=8 * b * tp * vs + 2 * b * tp * he + 4 * b * t * he + 4 * b * tp * he,
    )
    kernel = functools.partial(_sparse_attn_kernel, heads=heads, head_dim=e, vs=vs)

    # v7x note: grid is (b, nq) fully parallel; b*nq >= 2 keeps both TensorCores busy (demo b=2).
    # TODO(synk): for very large t*h*e, give the full-seq K/V specs pipeline_mode=pl.Buffered(1)
    # (their block index only changes at batch boundaries) or add a key-tile grid axis; at these
    # sizes the default double-buffered residency already fits the per-generation VMEM budget.
    out = pl.pallas_call(
        kernel,
        out_shape=jax.ShapeDtypeStruct((b, tp, he), jnp.float32),
        grid_spec=pltpu.PrefetchScalarGridSpec(
            num_scalar_prefetch=0,
            grid=(b, nq),
            in_specs=[
                pl.BlockSpec((1, tq, vs), lambda bi, qi: (bi, qi, 0)),   # sampled indices
                pl.BlockSpec((1, tq, vs), lambda bi, qi: (bi, qi, 0)),   # proposal weights
                pl.BlockSpec((1, tq, he), lambda bi, qi: (bi, qi, 0)),   # q tile (lane-dense)
                pl.BlockSpec((1, t, he), lambda bi, qi: (bi, 0, 0)),     # k (full seq)
                pl.BlockSpec((1, t, he), lambda bi, qi: (bi, 0, 0)),     # v (full seq)
            ],
            out_specs=pl.BlockSpec((1, tq, he), lambda bi, qi: (bi, qi, 0)),
            scratch_shapes=[
                pltpu.VMEM((tq, t), jnp.float32),     # s_sc : dense per-head scores
                pltpu.VMEM((tq, t), jnp.float32),     # p_sc : scattered probabilities
                pltpu.VMEM((tq, 1), jnp.float32),     # m_sc : running max
                pltpu.VMEM((tq, 1), jnp.float32),     # l_sc : running normalizer
                pltpu.VMEM((tq, he), jnp.float32),    # o_acc: per-tile output accumulator
            ],
        ),
        compiler_params=pltpu.CompilerParams(
            dimension_semantics=("parallel", "parallel"),
            vmem_limit_bytes=_vmem_budget_bytes(),
        ),
        cost_estimate=cost,
    )(idx.astype(jnp.int32), weights, q, k, v)
    if tp != t:
        out = out[:, :t, :]
    return out


# ----------------------------------------------------------------------------
# Glue (plain JAX): hyper-network transforms, index sampling, densities, dedup
# ----------------------------------------------------------------------------
def hyper(x, params, *, k, mmult, min_sigma, sigma_scale):
    b, t, e = x.shape
    coords = jnp.broadcast_to(
        (jnp.arange(t, dtype=jnp.float32) / t)[None, :, None], (b, t, 1))
    inp = jnp.concatenate([x, coords], axis=2).reshape(b * t, e + 1)
    # toparams hyper-MLP left to XLA: K=e+1 / N=2k are tiny & unaligned, Pallas (8,128) padding
    # and per-call overhead would dominate.
    h1 = jax.nn.relu(inp @ params["tp_w1"] + params["tp_b1"])
    p = (h1 @ params["tp_w2"] + params["tp_b2"]).reshape(b, t, 2 * k)

    means_raw = p[:, :, :k][..., None]            # (b, t, k, 1)
    sigmas_raw = p[:, :, k:]                      # (b, t, k)

    diags = jnp.arange(t, dtype=jnp.float32)[None, :, None, None]
    means = diags - mmult * jax.nn.softplus(means_raw)
    means = jnp.clip(means, 0.0, float(t - 1))    # sparse.transform_means(method='clamp')
    # sparse.transform_sigmas: softplus(sigma + SIGMA_BOOST) * range + min_sigma
    # TODO(synk): constants mirror the external sparse-hyper library (approximation).
    sigmas = (jax.nn.softplus(sigmas_raw + SIGMA_BOOST) * float(t) + min_sigma)[..., None]
    sigmas = sigmas * sigma_scale
    return means, sigmas                          # (b,t,k,1), (b,t,k,1)


def ngenerate(means, gadditional, radditional, rng_size, region, key):
    """sparse.ngenerate equivalent: (b,t,k,1) means -> (b,t,vs) int indices."""
    # TODO(synk): the original library's torch RNG stream cannot be reproduced; sampling
    # semantics (floor/ceil neighbours + global uniform + shifted local window) are kept.
    b, t, k, _ = means.shape
    m = means[..., 0]                                             # (b, t, k)
    fm = jnp.floor(m)
    neighbors = jnp.stack([fm, fm + 1.0], axis=-1)                # (b, t, k, 2)
    kg, kr = jax.random.split(key)
    g = jnp.floor(jax.random.uniform(kg, (b, t, k, gadditional)) * rng_size)
    lower = jnp.clip(jnp.round(m) - region / 2.0, 0.0, float(rng_size - region))[..., None]
    r = jnp.floor(lower + jax.random.uniform(kr, (b, t, k, radditional)) * region)
    ints = jnp.concatenate([neighbors, g, r], axis=-1)            # (b, t, k, 2+ga+ra)
    ints = jnp.clip(ints, 0.0, float(rng_size - 1))
    return ints.reshape(b, t, k * (2 + gadditional + radditional)).astype(jnp.int32)


def densities(pts, means, sigmas):
    """sparse.densities: exp(-0.5 * ((p - mu)/sigma)^2); pts (b,t,vs) -> (b,t,vs,k)."""
    d = pts[:, :, :, None] - means[..., 0][:, :, None, :]
    inv_var = 1.0 / (EPSILON + sigmas[..., 0][:, :, None, :] ** 2)
    return jnp.exp(-0.5 * d * d * inv_var)


def nduplicates_mask(idx):
    """util.nduplicates: True where an index repeats an earlier entry along the vs dim."""
    vs = idx.shape[-1]
    eq = idx[:, :, :, None] == idx[:, :, None, :]                 # (b,t,vs,vs)
    earlier = jnp.tril(jnp.ones((vs, vs), dtype=bool), k=-1)      # earlier[v, u] = (u < v)
    return jnp.any(eq & earlier[None, None], axis=-1)             # (b,t,vs)


# ----------------------------------------------------------------------------
# Full forward pass
# ----------------------------------------------------------------------------
def ash1d_forward(x, params, key, *, heads, k, gadditional, radditional, region,
                  min_sigma=0.05, sigma_scale=0.1, mmult=1.0, clamp=True):
    b, t, e = x.shape
    h = heads
    if clamp:
        mmult = mmult * 3.0

    # hyper network -> means / sigmas of the k Gaussians per output position
    means, sigmas = hyper(x, params, k=k, mmult=mmult,
                          min_sigma=min_sigma, sigma_scale=sigma_scale)

    # sample integer key positions (b, t, vs), clipped to [0, t-1]
    idx = ngenerate(means, gadditional, radditional, t, region, key)

    # proposal weights
    props = densities(idx.astype(jnp.float32), means, sigmas)     # (b,t,vs,k)
    props = jnp.where(nduplicates_mask(idx)[..., None], 0.0, props)
    pos = jnp.arange(t, dtype=jnp.int32)[None, :, None]
    props = jnp.where((idx > pos)[..., None], 0.0, props)         # causal mask
    # epsilon guard: the reference divides by the raw sum and can NaN on a fully-masked row
    props = props / jnp.maximum(jnp.sum(props, axis=2, keepdims=True), EPSILON)
    weights = jnp.sum(props, axis=3)                              # mvalues == 1 -> (b,t,vs)

    # q / k / v projections (tiled Pallas matmuls).  The 1/e**0.25 attention scale and bf16
    # casts are folded into the weights once in prepare_params (perf review), and queries are
    # emitted directly in bf16 so the attention kernel reads half the bytes.
    x2 = x.reshape(b * t, e).astype(jnp.bfloat16)
    queries = linear_pallas(x2, params["wq"], out_dtype=jnp.bfloat16).reshape(b, t, h * e)
    keys = linear_pallas(x2, params["wk"], out_dtype=jnp.bfloat16).reshape(b, t, h * e)
    values = linear_pallas(x2, params["wv"], out_dtype=jnp.bfloat16).reshape(b, t, h * e)

    # sparse attention core (Pallas) — stays in (b, t, h*e) layout, no HBM head transposes
    out = sparse_attention_pallas(queries, keys, values, idx, weights, heads=h)

    # unify heads (already contiguous as (b*t, h*e))
    out = linear_pallas(out.reshape(b * t, h * e), params["wu"], params["bu"]).reshape(b, t, e)
    return out


def init_params(key, emb, heads, k):
    hidden = emb * 4
    ks = jax.random.split(key, 8)

    def w(kk, shape, fan_in):
        return jax.random.normal(kk, shape, jnp.float32) / jnp.sqrt(float(fan_in))

    return {
        "wk": w(ks[0], (emb, emb * heads), emb),
        "wq": w(ks[1], (emb, emb * heads), emb),
        "wv": w(ks[2], (emb, emb * heads), emb),
        "wu": w(ks[3], (heads * emb, emb), heads * emb),
        "bu": jnp.zeros((emb,), jnp.float32),
        "tp_w1": w(ks[4], (emb + 1, hidden), emb + 1),
        "tp_b1": jnp.zeros((hidden,), jnp.float32),
        "tp_w2": w(ks[5], (hidden, 2 * k), hidden),
        "tp_b2": jnp.zeros((2 * k,), jnp.float32),
    }


def prepare_params(params, emb):
    """Fold the 1/e**0.25 attention scale into wq/wk and pre-cast MXU weights to bf16 once,
    outside the per-forward path (perf review: no per-forward weight re-scale / re-cast)."""
    scale = 1.0 / (float(emb) ** 0.25)
    p = dict(params)
    p["wq"] = (params["wq"] * scale).astype(jnp.bfloat16)
    p["wk"] = (params["wk"] * scale).astype(jnp.bfloat16)
    p["wv"] = params["wv"].astype(jnp.bfloat16)
    p["wu"] = params["wu"].astype(jnp.bfloat16)
    return p


if __name__ == "__main__":
    b, t, emb = 2, 16, 16
    heads, k = 2, 2
    gadditional, radditional, region = 2, 2, 4

    root = jax.random.PRNGKey(0)
    kp, kx, ks = jax.random.split(root, 3)
    params = prepare_params(init_params(kp, emb, heads, k), emb)
    x = jax.random.normal(kx, (b, t, emb), jnp.float32)

    fwd = jax.jit(functools.partial(
        ash1d_forward, heads=heads, k=k, gadditional=gadditional,
        radditional=radditional, region=region))
    out = jax.block_until_ready(fwd(x, params, ks))
    assert out.shape == (b, t, emb)
    assert not bool(jnp.any(jnp.isnan(out)))
    print("KERNEL_OK")
</pallas_src>

<mosaic_0001>
module attributes {stable_mosaic.version = 11 : i64} {
  func.func @_linear_kernel(%arg0: i32, %arg1: i32, %arg2: i32, %arg3: memref<32x16xbf16, #tpu.memory_space<vmem>>, %arg4: memref<16x32xbf16, #tpu.memory_space<vmem>>, %arg5: memref<32x32xbf16, #tpu.memory_space<vmem>>, %arg6: memref<32x32xf32, #tpu.memory_space<vmem>>) attributes {dimension_semantics = [#tpu.dimension_semantics<parallel>, #tpu.dimension_semantics<parallel>, #tpu.dimension_semantics<arbitrary>], iteration_bounds = array<i64: 1, 1, 1>, scalar_prefetch = 0 : i64, scratch_operands = 1 : i64, tpu.core_type = #tpu.core_type<tc>, window_params = [{transform_indices = @transform_0, window_bounds = array<i64: 32, 16>}, {transform_indices = @transform_1, window_bounds = array<i64: 16, 32>}, {transform_indices = @transform_2, window_bounds = array<i64: 32, 32>}]} {
    %c0_i32 = arith.constant 0 : i32
    %0 = arith.cmpi eq, %arg2, %c0_i32 : i32
    %1 = arith.extui %0 : i1 to i32
    %c0_i32_0 = arith.constant 0 : i32
    %2 = arith.cmpi ne, %1, %c0_i32_0 : i32
    scf.if %2 {
      %cst_10 = arith.constant 0.000000e+00 : f32
      %12 = vector.broadcast %cst_10 : f32 to vector<32x32xf32>
      %c0_11 = arith.constant 0 : index
      %c0_12 = arith.constant 0 : index
      %13 = vector.load %arg6[%c0_11, %c0_12] : memref<32x32xf32, #tpu.memory_space<vmem>>, vector<32x32xf32>
      tpu.vector_store %arg6[%c0_11, %c0_12], %12 {strides = array<i32>} : memref<32x32xf32, #tpu.memory_space<vmem>>, vector<32x32xf32>,
    } else {
    }
    %c0 = arith.constant 0 : index
    %c0_1 = arith.constant 0 : index
    %3 = vector.load %arg6[%c0, %c0_1] : memref<32x32xf32, #tpu.memory_space<vmem>>, vector<32x32xf32>
    %c0_2 = arith.constant 0 : index
    %c0_3 = arith.constant 0 : index
    %4 = vector.load %arg3[%c0_2, %c0_3] : memref<32x16xbf16, #tpu.memory_space<vmem>>, vector<32x16xbf16>
    %c0_4 = arith.constant 0 : index
    %c0_5 = arith.constant 0 : index
    %5 = vector.load %arg4[%c0_4, %c0_5] : memref<16x32xbf16, #tpu.memory_space<vmem>>, vector<16x32xbf16>
    %cst = arith.constant dense<0.000000e+00> : vector<32x32xf32>
    %6 = tpu.matmul %4, %5, %cst {dimension_numbers = #tpu.dot_dimension_numbers<[1], [0], [0], [1], [0, 0, 1, 1], [], []>} : vector<32x16xbf16>, vector<16x32xbf16>, vector<32x32xf32> -> vector<32x32xf32>
    %7 = arith.addf %3, %6 : vector<32x32xf32>
    %c0_6 = arith.constant 0 : index
    %c0_7 = arith.constant 0 : index
    %8 = vector.load %arg6[%c0_6, %c0_7] : memref<32x32xf32, #tpu.memory_space<vmem>>, vector<32x32xf32>
    tpu.vector_store %arg6[%c0_6, %c0_7], %7 {strides = array<i32>} : memref<32x32xf32, #tpu.memory_space<vmem>>, vector<32x32xf32>,
    %c0_i32_8 = arith.constant 0 : i32
    %9 = arith.cmpi eq, %arg2, %c0_i32_8 : i32
    %10 = arith.extui %9 : i1 to i32
    %c0_i32_9 = arith.constant 0 : i32
    %11 = arith.cmpi ne, %10, %c0_i32_9 : i32
    scf.if %11 {
      %c0_10 = arith.constant 0 : index
      %c0_11 = arith.constant 0 : index
      %12 = vector.load %arg6[%c0_10, %c0_11] : memref<32x32xf32, #tpu.memory_space<vmem>>, vector<32x32xf32>
      %13 = arith.truncf %12 : vector<32x32xf32> to vector<32x32xbf16>
      %c0_12 = arith.constant 0 : index
      %c0_13 = arith.constant 0 : index
      %14 = vector.load %arg5[%c0_12, %c0_13] : memref<32x32xbf16, #tpu.memory_space<vmem>>, vector<32x32xbf16>
      tpu.vector_store %arg5[%c0_12, %c0_13], %13 {strides = array<i32>} : memref<32x32xbf16, #tpu.memory_space<vmem>>, vector<32x32xbf16>,
    } else {
    }
    return
  }
  func.func @transform_0(%arg0: i32, %arg1: i32, %arg2: i32) -> (i32, i32) {
    %c0_i32 = arith.constant 0 : i32
    return %arg0, %arg2 : i32, i32
  }
  func.func @transform_1(%arg0: i32, %arg1: i32, %arg2: i32) -> (i32, i32) {
    %c0_i32 = arith.constant 0 : i32
    return %arg2, %arg1 : i32, i32
  }
  func.func @transform_2(%arg0: i32, %arg1: i32, %arg2: i32) -> (i32, i32) {
    %c0_i32 = arith.constant 0 : i32
    return %arg0, %arg1 : i32, i32
  }
}

module attributes {stable_mosaic.version = 11 : i64} {
  func.func @_sparse_attn_kernel(%arg0: i32, %arg1: i32, %arg2: memref<1x16x12xi32, #tpu.memory_space<vmem>>, %arg3: memref<1x16x12xf32, #tpu.memory_space<vmem>>, %arg4: memref<1x16x32xbf16, #tpu.memory_space<vmem>>, %arg5: memref<1x16x32xbf16, #tpu.memory_space<vmem>>, %arg6: memref<1x16x32xbf16, #tpu.memory_space<vmem>>, %arg7: memref<1x16x32xf32, #tpu.memory_space<vmem>>, %arg8: memref<16x16xf32, #tpu.memory_space<vmem>>, %arg9: memref<16x16xf32, #tpu.memory_space<vmem>>, %arg10: memref<16x1xf32, #tpu.memory_space<vmem>>, %arg11: memref<16x1xf32, #tpu.memory_space<vmem>>, %arg12: memref<16x32xf32, #tpu.memory_space<vmem>>) attributes {dimension_semantics = [#tpu.dimension_semantics<parallel>, #tpu.dimension_semantics<parallel>], iteration_bounds = array<i64: 2, 1>, scalar_prefetch = 0 : i64, scratch_operands = 5 : i64, tpu.core_type = #tpu.core_type<tc>, window_params = [{transform_indices = @transform_0, window_bounds = array<i64: 1, 16, 12>}, {transform_indices = @transform_1, window_bounds = array<i64: 1, 16, 12>}, {transform_indices = @transform_2, window_bounds = array<i64: 1, 16, 32>}, {transform_indices = @transform_3, window_bounds = array<i64: 1, 16, 32>}, {transform_indices = @transform_4, window_bounds = array<i64: 1, 16, 32>}, {transform_indices = @transform_5, window_bounds = array<i64: 1, 16, 32>}]} {
    %0 = tpu.iota {dimensions = array<i32: 1>} : vector<16x16xi32>
    %c0 = arith.constant 0 : index
    %c0_0 = arith.constant 0 : index
    %c0_1 = arith.constant 0 : index
    %1 = vector.load %arg4[%c0, %c0_0, %c0_1] : memref<1x16x32xbf16, #tpu.memory_space<vmem>>, vector<1x16x16xbf16>
    %2 = vector.shape_cast %1 : vector<1x16x16xbf16> to vector<16x16xbf16>
    %c0_2 = arith.constant 0 : index
    %c0_3 = arith.constant 0 : index
    %c0_4 = arith.constant 0 : index
    %3 = vector.load %arg5[%c0_2, %c0_3, %c0_4] : memref<1x16x32xbf16, #tpu.memory_space<vmem>>, vector<1x16x16xbf16>
    %4 = vector.shape_cast %3 : vector<1x16x16xbf16> to vector<16x16xbf16>
    %cst = arith.constant dense<0.000000e+00> : vector<16x16xf32>
    %5 = tpu.matmul %2, %4, %cst {dimension_numbers = #tpu.dot_dimension_numbers<[1], [1], [0], [0], [0, 0, 1, 0], [], []>} : vector<16x16xbf16>, vector<16x16xbf16>, vector<16x16xf32> -> vector<16x16xf32>
    %c0_5 = arith.constant 0 : index
    %c0_6 = arith.constant 0 : index
    %6 = vector.load %arg8[%c0_5, %c0_6] : memref<16x16xf32, #tpu.memory_space<vmem>>, vector<16x16xf32>
    tpu.vector_store %arg8[%c0_5, %c0_6], %5 {strides = array<i32>} : memref<16x16xf32, #tpu.memory_space<vmem>>, vector<16x16xf32>,
    %cst_7 = arith.constant 0.000000e+00 : f32
    %7 = vector.broadcast %cst_7 : f32 to vector<16x16xf32>
    %c0_8 = arith.constant 0 : index
    %c0_9 = arith.constant 0 : index
    %8 = vector.load %arg9[%c0_8, %c0_9] : memref<16x16xf32, #tpu.memory_space<vmem>>, vector<16x16xf32>
    tpu.vector_store %arg9[%c0_8, %c0_9], %7 {strides = array<i32>} : memref<16x16xf32, #tpu.memory_space<vmem>>, vector<16x16xf32>,
    %cst_10 = arith.constant -1.000000e+30 : f32
    %9 = vector.broadcast %cst_10 : f32 to vector<16x1xf32>
    %c0_11 = arith.constant 0 : index
    %c0_12 = arith.constant 0 : index
    %10 = vector.load %arg10[%c0_11, %c0_12] : memref<16x1xf32, #tpu.memory_space<vmem>>, vector<16x1xf32>
    tpu.vector_store %arg10[%c0_11, %c0_12], %9 {strides = array<i32>} : memref<16x1xf32, #tpu.memory_space<vmem>>, vector<16x1xf32>,
    %cst_13 = arith.constant 0.000000e+00 : f32
    %11 = vector.broadcast %cst_13 : f32 to vector<16x1xf32>
    %c0_14 = arith.constant 0 : index
    %c0_15 = arith.constant 0 : index
    %12 = vector.load %arg11[%c0_14, %c0_15] : memref<16x1xf32, #tpu.memory_space<vmem>>, vector<16x1xf32>
    tpu.vector_store %arg11[%c0_14, %c0_15], %11 {strides = array<i32>} : memref<16x1xf32, #tpu.memory_space<vmem>>, vector<16x1xf32>,
    %c0_16 = arith.constant 0 : index
    %c0_17 = arith.constant 0 : index
    %c0_18 = arith.constant 0 : index
    %13 = vector.load %arg2[%c0_16, %c0_17, %c0_18] : memref<1x16x12xi32, #tpu.memory_space<vmem>>, vector<1x16x1xi32>
    %14 = vector.shape_cast %13 : vector<1x16x1xi32> to vector<16x1xi32>
    %c0_19 = arith.constant 0 : index
    %c0_20 = arith.constant 0 : index
    %c0_21 = arith.constant 0 : index
    %15 = vector.load %arg3[%c0_19, %c0_20, %c0_21] : memref<1x16x12xf32, #tpu.memory_space<vmem>>, vector<1x16x1xf32>
    %16 = vector.shape_cast %15 : vector<1x16x1xf32> to vector<16x1xf32>
    %17 = vector.broadcast %14 : vector<16x1xi32> to vector<16x16xi32>
    %18 = arith.cmpi eq, %17, %0 : vector<16x16xi32>
    %c0_22 = arith.constant 0 : index
    %c0_23 = arith.constant 0 : index
    %19 = vector.load %arg8[%c0_22, %c0_23] : memref<16x16xf32, #tpu.memory_space<vmem>>, vector<16x16xf32>
    %cst_24 = arith.constant 0.000000e+00 : f32
    %20 = vector.broadcast %cst_24 : f32 to vector<16x16xf32>
    %21 = arith.select %18, %19, %20 : vector<16x16xi1>, vector<16x16xf32>
    %cst_25 = arith.constant dense<0.000000e+00> : vector<16xf32>
    %22 = vector.multi_reduction <add>, %21, %cst_25 [1] : vector<16x16xf32> to vector<16xf32>
    %23 = vector.shape_cast %22 : vector<16xf32> to vector<16x1xf32>
    %24 = arith.mulf %16, %23 : vector<16x1xf32>
    %c0_26 = arith.constant 0 : index
    %c0_27 = arith.constant 0 : index
    %25 = vector.load %arg10[%c0_26, %c0_27] : memref<16x1xf32, #tpu.memory_space<vmem>>, vector<16x1xf32>
    %26 = arith.maximumf %25, %24 : vector<16x1xf32>
    %c0_28 = arith.constant 0 : index
    %c0_29 = arith.constant 0 : index
    %27 = vector.load %arg10[%c0_28, %c0_29] : memref<16x1xf32, #tpu.memory_space<vmem>>, vector<16x1xf32>
    %28 = arith.subf %27, %26 : vector<16x1xf32>
    %29 = math.exp %28 : vector<16x1xf32>
    %30 = arith.subf %24, %26 : vector<16x1xf32>
    %31 = math.exp %30 : vector<16x1xf32>
    %c0_30 = arith.constant 0 : index
    %c0_31 = arith.constant 0 : index
    %32 = vector.load %arg11[%c0_30, %c0_31] : memref<16x1xf32, #tpu.memory_space<vmem>>, vector<16x1xf32>
    %33 = arith.mulf %29, %32 : vector<16x1xf32>
    %34 = arith.addf %33, %31 : vector<16x1xf32>
    %c0_32 = arith.constant 0 : index
    %c0_33 = arith.constant 0 : index
    %35 = vector.load %arg11[%c0_32, %c0_33] : memref<16x1xf32, #tpu.memory_space<vmem>>, vector<16x1xf32>
    tpu.vector_store %arg11[%c0_32, %c0_33], %34 {strides = array<i32>} : memref<16x1xf32, #tpu.memory_space<vmem>>, vector<16x1xf32>,
    %c0_34 = arith.constant 0 : index
    %c0_35 = arith.constant 0 : index
    %36 = vector.load %arg9[%c0_34, %c0_35] : memref<16x16xf32, #tpu.memory_space<vmem>>, vector<16x16xf32>
    %37 = vector.broadcast %29 : vector<16x1xf32> to vector<16x16xf32>
    %38 = arith.mulf %37, %36 : vector<16x16xf32>
    %cst_36 = arith.constant 0.000000e+00 : f32
    %39 = vector.shape_cast %31 : vector<16x1xf32> to vector<16x1xf32>
    %40 = vector.broadcast %39 : vector<16x1xf32> to vector<16x16xf32>
    %41 = vector.broadcast %cst_36 : f32 to vector<16x16xf32>
    %42 = arith.select %18, %40, %41 : vector<16x16xi1>, vector<16x16xf32>
    %43 = arith.addf %38, %42 : vector<16x16xf32>
    %c0_37 = arith.constant 0 : index
    %c0_38 = arith.constant 0 : index
    %44 = vector.load %arg9[%c0_37, %c0_38] : memref<16x16xf32, #tpu.memory_space<vmem>>, vector<16x16xf32>
    tpu.vector_store %arg9[%c0_37, %c0_38], %43 {strides = array<i32>} : memref<16x16xf32, #tpu.memory_space<vmem>>, vector<16x16xf32>,
    %c0_39 = arith.constant 0 : index
    %c0_40 = arith.constant 0 : index
    %45 = vector.load %arg10[%c0_39, %c0_40] : memref<16x1xf32, #tpu.memory_space<vmem>>, vector<16x1xf32>
    tpu.vector_store %arg10[%c0_39, %c0_40], %26 {strides = array<i32>} : memref<16x1xf32, #tpu.memory_space<vmem>>, vector<16x1xf32>,
    %c0_41 = arith.constant 0 : index
    %c0_42 = arith.constant 0 : index
    %c1 = arith.constant 1 : index
    %46 = vector.load %arg2[%c0_41, %c0_42, %c1] : memref<1x16x12xi32, #tpu.memory_space<vmem>>, vector<1x16x1xi32>
    %47 = vector.shape_cast %46 : vector<1x16x1xi32> to vector<16x1xi32>
    %c0_43 = arith.constant 0 : index
    %c0_44 = arith.constant 0 : index
    %c1_45 = arith.constant 1 : index
    %48 = vector.load %arg3[%c0_43, %c0_44, %c1_45] : memref<1x16x12xf32, #tpu.memory_space<vmem>>, vector<1x16x1xf32>
    %49 = vector.shape_cast %48 : vector<1x16x1xf32> to vector<16x1xf32>
    %50 = vector.broadcast %47 : vector<16x1xi32> to vector<16x16xi32>
    %51 = arith.cmpi eq, %50, %0 : vector<16x16xi32>
    %c0_46 = arith.constant 0 : index
    %c0_47 = arith.constant 0 : index
    %52 = vector.load %arg8[%c0_46, %c0_47] : memref<16x16xf32, #tpu.memory_space<vmem>>, vector<16x16xf32>
    %cst_48 = arith.constant 0.000000e+00 : f32
    %53 = vector.broadcast %cst_48 : f32 to vector<16x16xf32>
    %54 = arith.select %51, %52, %53 : vector<16x16xi1>, vector<16x16xf32>
    %cst_49 = arith.constant dense<0.000000e+00> : vector<16xf32>
    %55 = vector.multi_reduction <add>, %54, %cst_49 [1] : vector<16x16xf32> to vector<16xf32>
    %56 = vector.shape_cast %55 : vector<16xf32> to vector<16x1xf32>
    %57 = arith.mulf %49, %56 : vector<16x1xf32>
    %c0_50 = arith.constant 0 : index
    %c0_51 = arith.constant 0 : index
    %58 = vector.load %arg10[%c0_50, %c0_51] : memref<16x1xf32, #tpu.memory_space<vmem>>, vector<16x1xf32>
    %59 = arith.maximumf %58, %57 : vector<16x1xf32>
    %c0_52 = arith.constant 0 : index
    %c0_53 = arith.constant 0 : index
    %60 = vector.load %arg10[%c0_52, %c0_53] : memref<16x1xf32, #tpu.memory_space<vmem>>, vector<16x1xf32>
    %61 = arith.subf %60, %59 : vector<16x1xf32>
    %62 = math.exp %61 : vector<16x1xf32>
    %63 = arith.subf %57, %59 : vector<16x1xf32>
    %64 = math.exp %63 : vector<16x1xf32>
    %c0_54 = arith.constant 0 : index
    %c0_55 = arith.constant 0 : index
    %65 = vector.load %arg11[%c0_54, %c0_55] : memref<16x1xf32, #tpu.memory_space<vmem>>, vector<16x1xf32>
    %66 = arith.mulf %62, %65 : vector<16x1xf32>
    %67 = arith.addf %66, %64 : vector<16x1xf32>
    %c0_56 = arith.constant 0 : index
    %c0_57 = arith.constant 0 : index
    %68 = vector.load %arg11[%c0_56, %c0_57] : memref<16x1xf32, #tpu.memory_space<vmem>>, vector<16x1xf32>
    tpu.vector_store %arg11[%c0_56, %c0_57], %67 {strides = array<i32>} : memref<16x1xf32, #tpu.memory_space<vmem>>, vector<16x1xf32>,
    %c0_58 = arith.constant 0 : index
    %c0_59 = arith.constant 0 : index
    %69 = vector.load %arg9[%c0_58, %c0_59] : memref<16x16xf32, #tpu.memory_space<vmem>>, vector<16x16xf32>
    %70 = vector.broadcast %62 : vector<16x1xf32> to vector<16x16xf32>
    %71 = arith.mulf %70, %69 : vector<16x16xf32>
    %cst_60 = arith.constant 0.000000e+00 : f32
    %72 = vector.shape_cast %64 : vector<16x1xf32> to vector<16x1xf32>
    %73 = vector.broadcast %72 : vector<16x1xf32> to vector<16x16xf32>
    %74 = vector.broadcast %cst_60 : f32 to vector<16x16xf32>
    %75 = arith.select %51, %73, %74 : vector<16x16xi1>, vector<16x16xf32>
    %76 = arith.addf %71, %75 : vector<16x16xf32>
    %c0_61 = arith.constant 0 : index
    %c0_62 = arith.constant 0 : index
    %77 = vector.load %arg9[%c0_61, %c0_62] : memref<16x16xf32, #tpu.memory_space<vmem>>, vector<16x16xf32>
    tpu.vector_store %arg9[%c0_61, %c0_62], %76 {strides = array<i32>} : memref<16x16xf32, #tpu.memory_space<vmem>>, vector<16x16xf32>,
    %c0_63 = arith.constant 0 : index
    %c0_64 = arith.constant 0 : index
    %78 = vector.load %arg10[%c0_63, %c0_64] : memref<16x1xf32, #tpu.memory_space<vmem>>, vector<16x1xf32>
    tpu.vector_store %arg10[%c0_63, %c0_64], %59 {strides = array<i32>} : memref<16x1xf32, #tpu.memory_space<vmem>>, vector<16x1xf32>,
    %c0_65 = arith.constant 0 : index
    %c0_66 = arith.constant 0 : index
    %c2 = arith.constant 2 : index
    %79 = vector.load %arg2[%c0_65, %c0_66, %c2] : memref<1x16x12xi32, #tpu.memory_space<vmem>>, vector<1x16x1xi32>
    %80 = vector.shape_cast %79 : vector<1x16x1xi32> to vector<16x1xi32>
    %c0_67 = arith.constant 0 : index
    %c0_68 = arith.constant 0 : index
    %c2_69 = arith.constant 2 : index
    %81 = vector.load %arg3[%c0_67, %c0_68, %c2_69] : memref<1x16x12xf32, #tpu.memory_space<vmem>>, vector<1x16x1xf32>
    %82 = vector.shape_cast %81 : vector<1x16x1xf32> to vector<16x1xf32>
    %83 = vector.broadcast %80 : vector<16x1xi32> to vector<16x16xi32>
    %84 = arith.cmpi eq, %83, %0 : vector<16x16xi32>
    %c0_70 = arith.constant 0 : index
    %c0_71 = arith.constant 0 : index
    %85 = vector.load %arg8[%c0_70, %c0_71] : memref<16x16xf32, #tpu.memory_space<vmem>>, vector<16x16xf32>
    %cst_72 = arith.constant 0.000000e+00 : f32
    %86 = vector.broadcast %cst_72 : f32 to vector<16x16xf32>
    %87 = arith.select %84, %85, %86 : vector<16x16xi1>, vector<16x16xf32>
    %cst_73 = arith.constant dense<0.000000e+00> : vector<16xf32>
    %88 = vector.multi_reduction <add>, %87, %cst_73 [1] : vector<16x16xf32> to vector<16xf32>
    %89 = vector.shape_cast %88 : vector<16xf32> to vector<16x1xf32>
    %90 = arith.mulf %82, %89 : vector<16x1xf32>
    %c0_74 = arith.constant 0 : index
    %c0_75 = arith.constant 0 : index
    %91 = vector.load %arg10[%c0_74, %c0_75] : memref<16x1xf32, #tpu.memory_space<vmem>>, vector<16x1xf32>
    %92 = arith.maximumf %91, %90 : vector<16x1xf32>
    %c0_76 = arith.constant 0 : index
    %c0_77 = arith.constant 0 : index
    %93 = vector.load %arg10[%c0_76, %c0_77] : memref<16x1xf32, #tpu.memory_space<vmem>>, vector<16x1xf32>
    %94 = arith.subf %93, %92 : vector<16x1xf32>
    %95 = math.exp %94 : vector<16x1xf32>
    %96 = arith.subf %90, %92 : vector<16x1xf32>
    %97 = math.exp %96 : vector<16x1xf32>
    %c0_78 = arith.constant 0 : index
    %c0_79 = arith.constant 0 : index
    %98 = vector.load %arg11[%c0_78, %c0_79] : memref<16x1xf32, #tpu.memory_space<vmem>>, vector<16x1xf32>
    %99 = arith.mulf %95, %98 : vector<16x1xf32>
    %100 = arith.addf %99, %97 : vector<16x1xf32>
    %c0_80 = arith.constant 0 : index
    %c0_81 = arith.constant 0 : index
    %101 = vector.load %arg11[%c0_80, %c0_81] : memref<16x1xf32, #tpu.memory_space<vmem>>, vector<16x1xf32>
    tpu.vector_store %arg11[%c0_80, %c0_81], %100 {strides = array<i32>} : memref<16x1xf32, #tpu.memory_space<vmem>>, vector<16x1xf32>,
    %c0_82 = arith.constant 0 : index
    %c0_83 = arith.constant 0 : index
    %102 = vector.load %arg9[%c0_82, %c0_83] : memref<16x16xf32, #tpu.memory_space<vmem>>, vector<16x16xf32>
    %103 = vector.broadcast %95 : vector<16x1xf32> to vector<16x16xf32>
    %104 = arith.mulf %103, %102 : vector<16x16xf32>
    %cst_84 = arith.constant 0.000000e+00 : f32
    %105 = vector.shape_cast %97 : vector<16x1xf32> to vector<16x1xf32>
    %106 = vector.broadcast %105 : vector<16x1xf32> to vector<16x16xf32>
    %107 = vector.broadcast %cst_84 : f32 to vector<16x16xf32>
    %108 = arith.select %84, %106, %107 : vector<16x16xi1>, vector<16x16xf32>
    %109 = arith.addf %104, %108 : vector<16x16xf32>
    %c0_85 = arith.constant 0 : index
    %c0_86 = arith.constant 0 : index
    %110 = vector.load %arg9[%c0_85, %c0_86] : memref<16x16xf32, #tpu.memory_space<vmem>>, vector<16x16xf32>
    tpu.vector_store %arg9[%c0_85, %c0_86], %109 {strides = array<i32>} : memref<16x16xf32, #tpu.memory_space<vmem>>, vector<16x16xf32>,
    %c0_87 = arith.constant 0 : index
    %c0_88 = arith.constant 0 : index
    %111 = vector.load %arg10[%c0_87, %c0_88] : memref<16x1xf32, #tpu.memory_space<vmem>>, vector<16x1xf32>
    tpu.vector_store %arg10[%c0_87, %c0_88], %92 {strides = array<i32>} : memref<16x1xf32, #tpu.memory_space<vmem>>, vector<16x1xf32>,
    %c0_89 = arith.constant 0 : index
    %c0_90 = arith.constant 0 : index
    %c3 = arith.constant 3 : index
    %112 = vector.load %arg2[%c0_89, %c0_90, %c3] : memref<1x16x12xi32, #tpu.memory_space<vmem>>, vector<1x16x1xi32>
    %113 = vector.shape_cast %112 : vector<1x16x1xi32> to vector<16x1xi32>
    %c0_91 = arith.constant 0 : index
    %c0_92 = arith.constant 0 : index
    %c3_93 = arith.constant 3 : index
    %114 = vector.load %arg3[%c0_91, %c0_92, %c3_93] : memref<1x16x12xf32, #tpu.memory_space<vmem>>, vector<1x16x1xf32>
    %115 = vector.shape_cast %114 : vector<1x16x1xf32> to vector<16x1xf32>
    %116 = vector.broadcast %113 : vector<16x1xi32> to vector<16x16xi32>
    %117 = arith.cmpi eq, %116, %0 : vector<16x16xi32>
    %c0_94 = arith.constant 0 : index
    %c0_95 = arith.constant 0 : index
    %118 = vector.load %arg8[%c0_94, %c0_95] : memref<16x16xf32, #tpu.memory_space<vmem>>, vector<16x16xf32>
    %cst_96 = arith.constant 0.000000e+00 : f32
    %119 = vector.broadcast %cst_96 : f32 to vector<16x16xf32>
    %120 = arith.select %117, %118, %119 : vector<16x16xi1>, vector<16x16xf32>
    %cst_97 = arith.constant dense<0.000000e+00> : vector<16xf32>
    %121 = vector.multi_reduction <add>, %120, %cst_97 [1] : vector<16x16xf32> to vector<16xf32>
    %122 = vector.shape_cast %121 : vector<16xf32> to vector<16x1xf32>
    %123 = arith.mulf %115, %122 : vector<16x1xf32>
    %c0_98 = arith.constant 0 : index
    %c0_99 = arith.constant 0 : index
    %124 = vector.load %arg10[%c0_98, %c0_99] : memref<16x1xf32, #tpu.memory_space<vmem>>, vector<16x1xf32>
    %125 = arith.maximumf %124, %123 : vector<16x1xf32>
    %c0_100 = arith.constant 0 : index
    %c0_101 = arith.constant 0 : index
    %126 = vector.load %arg10[%c0_100, %c0_101] : memref<16x1xf32, #tpu.memory_space<vmem>>, vector<16x1xf32>
    %127 = arith.subf %126, %125 : vector<16x1xf32>
    %128 = math.exp %127 : vector<16x1xf32>
    %129 = arith.subf %123, %125 : vector<16x1xf32>
    %130 = math.exp %129 : vector<16x1xf32>
    %c0_102 = arith.constant 0 : index
    %c0_103 = arith.constant 0 : index
    %131 = vector.load %arg11[%c0_102, %c0_103] : memref<16x1xf32, #tpu.memory_space<vmem>>, vector<16x1xf32>
    %132 = arith.mulf %128, %131 : vector<16x1xf32>
    %133 = arith.addf %132, %130 : vector<16x1xf32>
    %c0_104 = arith.constant 0 : index
    %c0_105 = arith.constant 0 : index
    %134 = vector.load %arg11[%c0_104, %c0_105] : memref<16x1xf32, #tpu.memory_space<vmem>>, vector<16x1xf32>
    tpu.vector_store %arg11[%c0_104, %c0_105], %133 {strides = array<i32>} : memref<16x1xf32, #tpu.memory_space<vmem>>, vector<16x1xf32>,
    %c0_106 = arith.constant 0 : index
    %c0_107 = arith.constant 0 : index
    %135 = vector.load %arg9[%c0_106, %c0_107] : memref<16x16xf32, #tpu.memory_space<vmem>>, vector<16x16xf32>
    %136 = vector.broadcast %128 : vector<16x1xf32> to vector<16x16xf32>
    %137 = arith.mulf %136, %135 : vector<16x16xf32>
    %cst_108 = arith.constant 0.000000e+00 : f32
    %138 = vector.shape_cast %130 : vector<16x1xf32> to vector<16x1xf32>
    %139 = vector.broadcast %138 : vector<16x1xf32> to vector<16x16xf32>
    %140 = vector.broadcast %cst_108 : f32 to vector<16x16xf32>
    %141 = arith.select %117, %139, %140 : vector<16x16xi1>, vector<16x16xf32>
    %142 = arith.addf %137, %141 : vector<16x16xf32>
    %c0_109 = arith.constant 0 : index
    %c0_110 = arith.constant 0 : index
    %143 = vector.load %arg9[%c0_109, %c0_110] : memref<16x16xf32, #tpu.memory_space<vmem>>, vector<16x16xf32>
    tpu.vector_store %arg9[%c0_109, %c0_110], %142 {strides = array<i32>} : memref<16x16xf32, #tpu.memory_space<vmem>>, vector<16x16xf32>,
    %c0_111 = arith.constant 0 : index
    %c0_112 = arith.constant 0 : index
    %144 = vector.load %arg10[%c0_111, %c0_112] : memref<16x1xf32, #tpu.memory_space<vmem>>, vector<16x1xf32>
    tpu.vector_store %arg10[%c0_111, %c0_112], %125 {strides = array<i32>} : memref<16x1xf32, #tpu.memory_space<vmem>>, vector<16x1xf32>,
    %c0_113 = arith.constant 0 : index
    %c0_114 = arith.constant 0 : index
    %c4 = arith.constant 4 : index
    %145 = vector.load %arg2[%c0_113, %c0_114, %c4] : memref<1x16x12xi32, #tpu.memory_space<vmem>>, vector<1x16x1xi32>
    %146 = vector.shape_cast %145 : vector<1x16x1xi32> to vector<16x1xi32>
    %c0_115 = arith.constant 0 : index
    %c0_116 = arith.constant 0 : index
    %c4_117 = arith.constant 4 : index
    %147 = vector.load %arg3[%c0_115, %c0_116, %c4_117] : memref<1x16x12xf32, #tpu.memory_space<vmem>>, vector<1x16x1xf32>
    %148 = vector.shape_cast %147 : vector<1x16x1xf32> to vector<16x1xf32>
    %149 = vector.broadcast %146 : vector<16x1xi32> to vector<16x16xi32>
    %150 = arith.cmpi eq, %149, %0 : vector<16x16xi32>
    %c0_118 = arith.constant 0 : index
    %c0_119 = arith.constant 0 : index
    %151 = vector.load %arg8[%c0_118, %c0_119] : memref<16x16xf32, #tpu.memory_space<vmem>>, vector<16x16xf32>
    %cst_120 = arith.constant 0.000000e+00 : f32
    %152 = vector.broadcast %cst_120 : f32 to vector<16x16xf32>
    %153 = arith.select %150, %151, %152 : vector<16x16xi1>, vector<16x16xf32>
    %cst_121 = arith.constant dense<0.000000e+00> : vector<16xf32>
    %154 = vector.multi_reduction <add>, %153, %cst_121 [1] : vector<16x16xf32> to vector<16xf32>
    %155 = vector.shape_cast %154 : vector<16xf32> to vector<16x1xf32>
    %156 = arith.mulf %148, %155 : vector<16x1xf32>
    %c0_122 = arith.constant 0 : index
    %c0_123 = arith.constant 0 : index
    %157 = vector.load %arg10[%c0_122, %c0_123] : memref<16x1xf32, #tpu.memory_space<vmem>>, vector<16x1xf32>
    %158 = arith.maximumf %157, %156 : vector<16x1xf32>
    %c0_124 = arith.constant 0 : index
    %c0_125 = arith.constant 0 : index
    %159 = vector.load %arg10[%c0_124, %c0_125] : memref<16x1xf32, #tpu.memory_space<vmem>>, vector<16x1xf32>
    %160 = arith.subf %159, %158 : vector<16x1xf32>
    %161 = math.exp %160 : vector<16x1xf32>
    %162 = arith.subf %156, %158 : vector<16x1xf32>
    %163 = math.exp %162 : vector<16x1xf32>
    %c0_126 = arith.constant 0 : index
    %c0_127 = arith.constant 0 : index
    %164 = vector.load %arg11[%c0_126, %c0_127] : memref<16x1xf32, #tpu.memory_space<vmem>>, vector<16x1xf32>
    %165 = arith.mulf %161, %164 : vector<16x1xf32>
    %166 = arith.addf %165, %163 : vector<16x1xf32>
    %c0_128 = arith.constant 0 : index
    %c0_129 = arith.constant 0 : index
    %167 = vector.load %arg11[%c0_128, %c0_129] : memref<16x1xf32, #tpu.memory_space<vmem>>, vector<16x1xf32>
    tpu.vector_store %arg11[%c0_128, %c0_129], %166 {strides = array<i32>} : memref<16x1xf32, #tpu.memory_space<vmem>>, vector<16x1xf32>,
    %c0_130 = arith.constant 0 : index
    %c0_131 = arith.constant 0 : index
    %168 = vector.load %arg9[%c0_130, %c0_131] : memref<16x16xf32, #tpu.memory_space<vmem>>, vector<16x16xf32>
    %169 = vector.broadcast %161 : vector<16x1xf32> to vector<16x16xf32>
    %170 = arith.mulf %169, %168 : vector<16x16xf32>
    %cst_132 = arith.constant 0.000000e+00 : f32
    %171 = vector.shape_cast %163 : vector<16x1xf32> to vector<16x1xf32>
    %172 = vector.broadcast %171 : vector<16x1xf32> to vector<16x16xf32>
    %173 = vector.broadcast %cst_132 : f32 to vector<16x16xf32>
    %174 = arith.select %150, %172, %173 : vector<16x16xi1>, vector<16x16xf32>
    %175 = arith.addf %170, %174 : vector<16x16xf32>
    %c0_133 = arith.constant 0 : index
    %c0_134 = arith.constant 0 : index
    %176 = vector.load %arg9[%c0_133, %c0_134] : memref<16x16xf32, #tpu.memory_space<vmem>>, vector<16x16xf32>
    tpu.vector_store %arg9[%c0_133, %c0_134], %175 {strides = array<i32>} : memref<16x16xf32, #tpu.memory_space<vmem>>, vector<16x16xf32>,
    %c0_135 = arith.constant 0 : index
    %c0_136 = arith.constant 0 : index
    %177 = vector.load %arg10[%c0_135, %c0_136] : memref<16x1xf32, #tpu.memory_space<vmem>>, vector<16x1xf32>
    tpu.vector_store %arg10[%c0_135, %c0_136], %158 {strides = array<i32>} : memref<16x1xf32, #tpu.memory_space<vmem>>, vector<16x1xf32>,
    %c0_137 = arith.constant 0 : index
    %c0_138 = arith.constant 0 : index
    %c5 = arith.constant 5 : index
    %178 = vector.load %arg2[%c0_137, %c0_138, %c5] : memref<1x16x12xi32, #tpu.memory_space<vmem>>, vector<1x16x1xi32>
    %179 = vector.shape_cast %178 : vector<1x16x1xi32> to vector<16x1xi32>
    %c0_139 = arith.constant 0 : index
    %c0_140 = arith.constant 0 : index
    %c5_141 = arith.constant 5 : index
    %180 = vector.load %arg3[%c0_139, %c0_140, %c5_141] : memref<1x16x12xf32, #tpu.memory_space<vmem>>, vector<1x16x1xf32>
    %181 = vector.shape_cast %180 : vector<1x16x1xf32> to vector<16x1xf32>
    %182 = vector.broadcast %179 : vector<16x1xi32> to vector<16x16xi32>
    %183 = arith.cmpi eq, %182, %0 : vector<16x16xi32>
    %c0_142 = arith.constant 0 : index
    %c0_143 = arith.constant 0 : index
    %184 = vector.load %arg8[%c0_142, %c0_143] : memref<16x16xf32, #tpu.memory_space<vmem>>, vector<16x16xf32>
    %cst_144 = arith.constant 0.000000e+00 : f32
    %185 = vector.broadcast %cst_144 : f32 to vector<16x16xf32>
    %186 = arith.select %183, %184, %185 : vector<16x16xi1>, vector<16x16xf32>
    %cst_145 = arith.constant dense<0.000000e+00> : vector<16xf32>
    %187 = vector.multi_reduction <add>, %186, %cst_145 [1] : vector<16x16xf32> to vector<16xf32>
    %188 = vector.shape_cast %187 : vector<16xf32> to vector<16x1xf32>
    %189 = arith.mulf %181, %188 : vector<16x1xf32>
    %c0_146 = arith.constant 0 : index
    %c0_147 = arith.constant 0 : index
    %190 = vector.load %arg10[%c0_146, %c0_147] : memref<16x1xf32, #tpu.memory_space<vmem>>, vector<16x1xf32>
    %191 = arith.maximumf %190, %189 : vector<16x1xf32>
    %c0_148 = arith.constant 0 : index
    %c0_149 = arith.constant 0 : index
    %192 = vector.load %arg10[%c0_148, %c0_149] : memref<16x1xf32, #tpu.memory_space<vmem>>, vector<16x1xf32>
    %193 = arith.subf %192, %191 : vector<16x1xf32>
    %194 = math.exp %193 : vector<16x1xf32>
    %195 = arith.subf %189, %191 : vector<16x1xf32>
    %196 = math.exp %195 : vector<16x1xf32>
    %c0_150 = arith.constant 0 : index
    %c0_151 = arith.constant 0 : index
    %197 = vector.load %arg11[%c0_150, %c0_151] : memref<16x1xf32, #tpu.memory_space<vmem>>, vector<16x1xf32>
    %198 = arith.mulf %194, %197 : vector<16x1xf32>
    %199 = arith.addf %198, %196 : vector<16x1xf32>
    %c0_152 = arith.constant 0 : index
    %c0_153 = arith.constant 0 : index
    %200 = vector.load %arg11[%c0_152, %c0_153] : memref<16x1xf32, #tpu.memory_space<vmem>>, vector<16x1xf32>
    tpu.vector_store %arg11[%c0_152, %c0_153], %199 {strides = array<i32>} : memref<16x1xf32, #tpu.memory_space<vmem>>, vector<16x1xf32>,
    %c0_154 = arith.constant 0 : index
    %c0_155 = arith.constant 0 : index
    %201 = vector.load %arg9[%c0_154, %c0_155] : memref<16x16xf32, #tpu.memory_space<vmem>>, vector<16x16xf32>
    %202 = vector.broadcast %194 : vector<16x1xf32> to vector<16x16xf32>
    %203 = arith.mulf %202, %201 : vector<16x16xf32>
    %cst_156 = arith.constant 0.000000e+00 : f32
    %204 = vector.shape_cast %196 : vector<16x1xf32> to vector<16x1xf32>
    %205 = vector.broadcast %204 : vector<16x1xf32> to vector<16x16xf32>
    %206 = vector.broadcast %cst_156 : f32 to vector<16x16xf32>
    %207 = arith.select %183, %205, %206 : vector<16x16xi1>, vector<16x16xf32>
    %208 = arith.addf %203, %207 : vector<16x16xf32>
    %c0_157 = arith.constant 0 : index
    %c0_158 = arith.constant 0 : index
    %209 = vector.load %arg9[%c0_157, %c0_158] : memref<16x16xf32, #tpu.memory_space<vmem>>, vector<16x16xf32>
    tpu.vector_store %arg9[%c0_157, %c0_158], %208 {strides = array<i32>} : memref<16x16xf32, #tpu.memory_space<vmem>>, vector<16x16xf32>,
    %c0_159 = arith.constant 0 : index
    %c0_160 = arith.constant 0 : index
    %210 = vector.load %arg10[%c0_159, %c0_160] : memref<16x1xf32, #tpu.memory_space<vmem>>, vector<16x1xf32>
    tpu.vector_store %arg10[%c0_159, %c0_160], %191 {strides = array<i32>} : memref<16x1xf32, #tpu.memory_space<vmem>>, vector<16x1xf32>,
    %c0_161 = arith.constant 0 : index
    %c0_162 = arith.constant 0 : index
    %c6 = arith.constant 6 : index
    %211 = vector.load %arg2[%c0_161, %c0_162, %c6] : memref<1x16x12xi32, #tpu.memory_space<vmem>>, vector<1x16x1xi32>
    %212 = vector.shape_cast %211 : vector<1x16x1xi32> to vector<16x1xi32>
    %c0_163 = arith.constant 0 : index
    %c0_164 = arith.constant 0 : index
    %c6_165 = arith.constant 6 : index
    %213 = vector.load %arg3[%c0_163, %c0_164, %c6_165] : memref<1x16x12xf32, #tpu.memory_space<vmem>>, vector<1x16x1xf32>
    %214 = vector.shape_cast %213 : vector<1x16x1xf32> to vector<16x1xf32>
    %215 = vector.broadcast %212 : vector<16x1xi32> to vector<16x16xi32>
    %216 = arith.cmpi eq, %215, %0 : vector<16x16xi32>
    %c0_166 = arith.constant 0 : index
    %c0_167 = arith.constant 0 : index
    %217 = vector.load %arg8[%c0_166, %c0_167] : memref<16x16xf32, #tpu.memory_space<vmem>>, vector<16x16xf32>
    %cst_168 = arith.constant 0.000000e+00 : f32
    %218 = vector.broadcast %cst_168 : f32 to vector<16x16xf32>
    %219 = arith.select %216, %217, %218 : vector<16x16xi1>, vector<16x16xf32>
    %cst_169 = arith.constant dense<0.000000e+00> : vector<16xf32>
    %220 = vector.multi_reduction <add>, %219, %cst_169 [1] : vector<16x16xf32> to vector<16xf32>
    %221 = vector.shape_cast %220 : vector<16xf32> to vector<16x1xf32>
    %222 = arith.mulf %214, %221 : vector<16x1xf32>
    %c0_170 = arith.constant 0 : index
    %c0_171 = arith.constant 0 : index
    %223 = vector.load %arg10[%c0_170, %c0_171] : memref<16x1xf32, #tpu.memory_space<vmem>>, vector<16x1xf32>
    %224 = arith.maximumf %223, %222 : vector<16x1xf32>
    %c0_172 = arith.constant 0 : index
    %c0_173 = arith.constant 0 : index
    %225 = vector.load %arg10[%c0_172, %c0_173] : memref<16x1xf32, #tpu.memory_space<vmem>>, vector<16x1xf32>
    %226 = arith.subf %225, %224 : vector<16x1xf32>
    %227 = math.exp %226 : vector<16x1xf32>
    %228 = arith.subf %222, %224 : vector<16x1xf32>
    %229 = math.exp %228 : vector<16x1xf32>
    %c0_174 = arith.constant 0 : index
    %c0_175 = arith.constant 0 : index
    %230 = vector.load %arg11[%c0_174, %c0_175] : memref<16x1xf32, #tpu.memory_space<vmem>>, vector<16x1xf32>
    %231 = arith.mulf %227, %230 : vector<16x1xf32>
    %232 = arith.addf %231, %229 : vector<16x1xf32>
    %c0_176 = arith.constant 0 : index
    %c0_177 = arith.constant 0 : index
    %233 = vector.load %arg11[%c0_176, %c0_177] : memref<16x1xf32, #tpu.memory_space<vmem>>, vector<16x1xf32>
    tpu.vector_store %arg11[%c0_176, %c0_177], %232 {strides = array<i32>} : memref<16x1xf32, #tpu.memory_space<vmem>>, vector<16x1xf32>,
    %c0_178 = arith.constant 0 : index
    %c0_179 = arith.constant 0 : index
    %234 = vector.load %arg9[%c0_178, %c0_179] : memref<16x16xf32, #tpu.memory_space<vmem>>, vector<16x16xf32>
    %235 = vector.broadcast %227 : vector<16x1xf32> to vector<16x16xf32>
    %236 = arith.mulf %235, %234 : vector<16x16xf32>
    %cst_180 = arith.constant 0.000000e+00 : f32
    %237 = vector.shape_cast %229 : vector<16x1xf32> to vector<16x1xf32>
    %238 = vector.broadcast %237 : vector<16x1xf32> to vector<16x16xf32>
    %239 = vector.broadcast %cst_180 : f32 to vector<16x16xf32>
    %240 = arith.select %216, %238, %239 : vector<16x16xi1>, vector<16x16xf32>
    %241 = arith.addf %236, %240 : vector<16x16xf32>
    %c0_181 = arith.constant 0 : index
    %c0_182 = arith.constant 0 : index
    %242 = vector.load %arg9[%c0_181, %c0_182] : memref<16x16xf32, #tpu.memory_space<vmem>>, vector<16x16xf32>
    tpu.vector_store %arg9[%c0_181, %c0_182], %241 {strides = array<i32>} : memref<16x16xf32, #tpu.memory_space<vmem>>, vector<16x16xf32>,
    %c0_183 = arith.constant 0 : index
    %c0_184 = arith.constant 0 : index
    %243 = vector.load %arg10[%c0_183, %c0_184] : memref<16x1xf32, #tpu.memory_space<vmem>>, vector<16x1xf32>
    tpu.vector_store %arg10[%c0_183, %c0_184], %224 {strides = array<i32>} : memref<16x1xf32, #tpu.memory_space<vmem>>, vector<16x1xf32>,
    %c0_185 = arith.constant 0 : index
    %c0_186 = arith.constant 0 : index
    %c7 = arith.constant 7 : index
    %244 = vector.load %arg2[%c0_185, %c0_186, %c7] : memref<1x16x12xi32, #tpu.memory_space<vmem>>, vector<1x16x1xi32>
    %245 = vector.shape_cast %244 : vector<1x16x1xi32> to vector<16x1xi32>
    %c0_187 = arith.constant 0 : index
    %c0_188 = arith.constant 0 : index
    %c7_189 = arith.constant 7 : index
    %246 = vector.load %arg3[%c0_187, %c0_188, %c7_189] : memref<1x16x12xf32, #tpu.memory_space<vmem>>, vector<1x16x1xf32>
    %247 = vector.shape_cast %246 : vector<1x16x1xf32> to vector<16x1xf32>
    %248 = vector.broadcast %245 : vector<16x1xi32> to vector<16x16xi32>
    %249 = arith.cmpi eq, %248, %0 : vector<16x16xi32>
    %c0_190 = arith.constant 0 : index
    %c0_191 = arith.constant 0 : index
    %250 = vector.load %arg8[%c0_190, %c0_191] : memref<16x16xf32, #tpu.memory_space<vmem>>, vector<16x16xf32>
    %cst_192 = arith.constant 0.000000e+00 : f32
    %251 = vector.broadcast %cst_192 : f32 to vector<16x16xf32>
    %252 = arith.select %249, %250, %251 : vector<16x16xi1>, vector<16x16xf32>
    %cst_193 = arith.constant dense<0.000000e+00> : vector<16xf32>
    %253 = vector.multi_reduction <add>, %252, %cst_193 [1] : vector<16x16xf32> to vector<16xf32>
    %254 = vector.shape_cast %253 : vector<16xf32> to vector<16x1xf32>
    %255 = arith.mulf %247, %254 : vector<16x1xf32>
    %c0_194 = arith.constant 0 : index
    %c0_195 = arith.constant 0 : index
    %256 = vector.load %arg10[%c0_194, %c0_195] : memref<16x1xf32, #tpu.memory_space<vmem>>, vector<16x1xf32>
    %257 = arith.maximumf %256, %255 : vector<16x1xf32>
    %c0_196 = arith.constant 0 : index
    %c0_197 = arith.constant 0 : index
    %258 = vector.load %arg10[%c0_196, %c0_197] : memref<16x1xf32, #tpu.memory_space<vmem>>, vector<16x1xf32>
    %259 = arith.subf %258, %257 : vector<16x1xf32>
    %260 = math.exp %259 : vector<16x1xf32>
    %261 = arith.subf %255, %257 : vector<16x1xf32>
    %262 = math.exp %261 : vector<16x1xf32>
    %c0_198 = arith.constant 0 : index
    %c0_199 = arith.constant 0 : index
    %263 = vector.load %arg11[%c0_198, %c0_199] : memref<16x1xf32, #tpu.memory_space<vmem>>, vector<16x1xf32>
    %264 = arith.mulf %260, %263 : vector<16x1xf32>
    %265 = arith.addf %264, %262 : vector<16x1xf32>
    %c0_200 = arith.constant 0 : index
    %c0_201 = arith.constant 0 : index
    %266 = vector.load %arg11[%c0_200, %c0_201] : memref<16x1xf32, #tpu.memory_space<vmem>>, vector<16x1xf32>
    tpu.vector_store %arg11[%c0_200, %c0_201], %265 {strides = array<i32>} : memref<16x1xf32, #tpu.memory_space<vmem>>, vector<16x1xf32>,
    %c0_202 = arith.constant 0 : index
    %c0_203 = arith.constant 0 : index
    %267 = vector.load %arg9[%c0_202, %c0_203] : memref<16x16xf32, #tpu.memory_space<vmem>>, vector<16x16xf32>
    %268 = vector.broadcast %260 : vector<16x1xf32> to vector<16x16xf32>
    %269 = arith.mulf %268, %267 : vector<16x16xf32>
    %cst_204 = arith.constant 0.000000e+00 : f32
    %270 = vector.shape_cast %262 : vector<16x1xf32> to vector<16x1xf32>
    %271 = vector.broadcast %270 : vector<16x1xf32> to vector<16x16xf32>
    %272 = vector.broadcast %cst_204 : f32 to vector<16x16xf32>
    %273 = arith.select %249, %271, %272 : vector<16x16xi1>, vector<16x16xf32>
    %274 = arith.addf %269, %273 : vector<16x16xf32>
    %c0_205 = arith.constant 0 : index
    %c0_206 = arith.constant 0 : index
    %275 = vector.load %arg9[%c0_205, %c0_206] : memref<16x16xf32, #tpu.memory_space<vmem>>, vector<16x16xf32>
    tpu.vector_store %arg9[%c0_205, %c0_206], %274 {strides = array<i32>} : memref<16x16xf32, #tpu.memory_space<vmem>>, vector<16x16xf32>,
    %c0_207 = arith.constant 0 : index
    %c0_208 = arith.constant 0 : index
    %276 = vector.load %arg10[%c0_207, %c0_208] : memref<16x1xf32, #tpu.memory_space<vmem>>, vector<16x1xf32>
    tpu.vector_store %arg10[%c0_207, %c0_208], %257 {strides = array<i32>} : memref<16x1xf32, #tpu.memory_space<vmem>>, vector<16x1xf32>,
    %c0_209 = arith.constant 0 : index
    %c0_210 = arith.constant 0 : index
    %c8 = arith.constant 8 : index
    %277 = vector.load %arg2[%c0_209, %c0_210, %c8] : memref<1x16x12xi32, #tpu.memory_space<vmem>>, vector<1x16x1xi32>
    %278 = vector.shape_cast %277 : vector<1x16x1xi32> to vector<16x1xi32>
    %c0_211 = arith.constant 0 : index
    %c0_212 = arith.constant 0 : index
    %c8_213 = arith.constant 8 : index
    %279 = vector.load %arg3[%c0_211, %c0_212, %c8_213] : memref<1x16x12xf32, #tpu.memory_space<vmem>>, vector<1x16x1xf32>
    %280 = vector.shape_cast %279 : vector<1x16x1xf32> to vector<16x1xf32>
    %281 = vector.broadcast %278 : vector<16x1xi32> to vector<16x16xi32>
    %282 = arith.cmpi eq, %281, %0 : vector<16x16xi32>
    %c0_214 = arith.constant 0 : index
    %c0_215 = arith.constant 0 : index
    %283 = vector.load %arg8[%c0_214, %c0_215] : memref<16x16xf32, #tpu.memory_space<vmem>>, vector<16x16xf32>
    %cst_216 = arith.constant 0.000000e+00 : f32
    %284 = vector.broadcast %cst_216 : f32 to vector<16x16xf32>
    %285 = arith.select %282, %283, %284 : vector<16x16xi1>, vector<16x16xf32>
    %cst_217 = arith.constant dense<0.000000e+00> : vector<16xf32>
    %286 = vector.multi_reduction <add>, %285, %cst_217 [1] : vector<16x16xf32> to vector<16xf32>
    %287 = vector.shape_cast %286 : vector<16xf32> to vector<16x1xf32>
    %288 = arith.mulf %280, %287 : vector<16x1xf32>
    %c0_218 = arith.constant 0 : index
    %c0_219 = arith.constant 0 : index
    %289 = vector.load %arg10[%c0_218, %c0_219] : memref<16x1xf32, #tpu.memory_space<vmem>>, vector<16x1xf32>
    %290 = arith.maximumf %289, %288 : vector<16x1xf32>
    %c0_220 = arith.constant 0 : index
    %c0_221 = arith.constant 0 : index
    %291 = vector.load %arg10[%c0_220, %c0_221] : memref<16x1xf32, #tpu.memory_space<vmem>>, vector<16x1xf32>
    %292 = arith.subf %291, %290 : vector<16x1xf32>
    %293 = math.exp %292 : vector<16x1xf32>
    %294 = arith.subf %288, %290 : vector<16x1xf32>
    %295 = math.exp %294 : vector<16x1xf32>
    %c0_222 = arith.constant 0 : index
    %c0_223 = arith.constant 0 : index
    %296 = vector.load %arg11[%c0_222, %c0_223] : memref<16x1xf32, #tpu.memory_space<vmem>>, vector<16x1xf32>
    %297 = arith.mulf %293, %296 : vector<16x1xf32>
    %298 = arith.addf %297, %295 : vector<16x1xf32>
    %c0_224 = arith.constant 0 : index
    %c0_225 = arith.constant 0 : index
    %299 = vector.load %arg11[%c0_224, %c0_225] : memref<16x1xf32, #tpu.memory_space<vmem>>, vector<16x1xf32>
    tpu.vector_store %arg11[%c0_224, %c0_225], %298 {strides = array<i32>} : memref<16x1xf32, #tpu.memory_space<vmem>>, vector<16x1xf32>,
    %c0_226 = arith.constant 0 : index
    %c0_227 = arith.constant 0 : index
    %300 = vector.load %arg9[%c0_226, %c0_227] : memref<16x16xf32, #tpu.memory_space<vmem>>, vector<16x16xf32>
    %301 = vector.broadcast %293 : vector<16x1xf32> to vector<16x16xf32>
    %302 = arith.mulf %301, %300 : vector<16x16xf32>
    %cst_228 = arith.constant 0.000000e+00 : f32
    %303 = vector.shape_cast %295 : vector<16x1xf32> to vector<16x1xf32>
    %304 = vector.broadcast %303 : vector<16x1xf32> to vector<16x16xf32>
    %305 = vector.broadcast %cst_228 : f32 to vector<16x16xf32>
    %306 = arith.select %282, %304, %305 : vector<16x16xi1>, vector<16x16xf32>
    %307 = arith.addf %302, %306 : vector<16x16xf32>
    %c0_229 = arith.constant 0 : index
    %c0_230 = arith.constant 0 : index
    %308 = vector.load %arg9[%c0_229, %c0_230] : memref<16x16xf32, #tpu.memory_space<vmem>>, vector<16x16xf32>
    tpu.vector_store %arg9[%c0_229, %c0_230], %307 {strides = array<i32>} : memref<16x16xf32, #tpu.memory_space<vmem>>, vector<16x16xf32>,
    %c0_231 = arith.constant 0 : index
    %c0_232 = arith.constant 0 : index
    %309 = vector.load %arg10[%c0_231, %c0_232] : memref<16x1xf32, #tpu.memory_space<vmem>>, vector<16x1xf32>
    tpu.vector_store %arg10[%c0_231, %c0_232], %290 {strides = array<i32>} : memref<16x1xf32, #tpu.memory_space<vmem>>, vector<16x1xf32>,
    %c0_233 = arith.constant 0 : index
    %c0_234 = arith.constant 0 : index
    %c9 = arith.constant 9 : index
    %310 = vector.load %arg2[%c0_233, %c0_234, %c9] : memref<1x16x12xi32, #tpu.memory_space<vmem>>, vector<1x16x1xi32>
    %311 = vector.shape_cast %310 : vector<1x16x1xi32> to vector<16x1xi32>
    %c0_235 = arith.constant 0 : index
    %c0_236 = arith.constant 0 : index
    %c9_237 = arith.constant 9 : index
    %312 = vector.load %arg3[%c0_235, %c0_236, %c9_237] : memref<1x16x12xf32, #tpu.memory_space<vmem>>, vector<1x16x1xf32>
    %313 = vector.shape_cast %312 : vector<1x16x1xf32> to vector<16x1xf32>
    %314 = vector.broadcast %311 : vector<16x1xi32> to vector<16x16xi32>
    %315 = arith.cmpi eq, %314, %0 : vector<16x16xi32>
    %c0_238 = arith.constant 0 : index
    %c0_239 = arith.constant 0 : index
    %316 = vector.load %arg8[%c0_238, %c0_239] : memref<16x16xf32, #tpu.memory_space<vmem>>, vector<16x16xf32>
    %cst_240 = arith.constant 0.000000e+00 : f32
    %317 = vector.broadcast %cst_240 : f32 to vector<16x16xf32>
    %318 = arith.select %315, %316, %317 : vector<16x16xi1>, vector<16x16xf32>
    %cst_241 = arith.constant dense<0.000000e+00> : vector<16xf32>
    %319 = vector.multi_reduction <add>, %318, %cst_241 [1] : vector<16x16xf32> to vector<16xf32>
    %320 = vector.shape_cast %319 : vector<16xf32> to vector<16x1xf32>
    %321 = arith.mulf %313, %320 : vector<16x1xf32>
    %c0_242 = arith.constant 0 : index
    %c0_243 = arith.constant 0 : index
    %322 = vector.load %arg10[%c0_242, %c0_243] : memref<16x1xf32, #tpu.memory_space<vmem>>, vector<16x1xf32>
    %323 = arith.maximumf %322, %321 : vector<16x1xf32>
    %c0_244 = arith.constant 0 : index
    %c0_245 = arith.constant 0 : index
    %324 = vector.load %arg10[%c0_244, %c0_245] : memref<16x1xf32, #tpu.memory_space<vmem>>, vector<16x1xf32>
    %325 = arith.subf %324, %323 : vector<16x1xf32>
    %326 = math.exp %325 : vector<16x1xf32>
    %327 = arith.subf %321, %323 : vector<16x1xf32>
    %328 = math.exp %327 : vector<16x1xf32>
    %c0_246 = arith.constant 0 : index
    %c0_247 = arith.constant 0 : index
    %329 = vector.load %arg11[%c0_246, %c0_247] : memref<16x1xf32, #tpu.memory_space<vmem>>, vector<16x1xf32>
    %330 = arith.mulf %326, %329 : vector<16x1xf32>
    %331 = arith.addf %330, %328 : vector<16x1xf32>
    %c0_248 = arith.constant 0 : index
    %c0_249 = arith.constant 0 : index
    %332 = vector.load %arg11[%c0_248, %c0_249] : memref<16x1xf32, #tpu.memory_space<vmem>>, vector<16x1xf32>
    tpu.vector_store %arg11[%c0_248, %c0_249], %331 {strides = array<i32>} : memref<16x1xf32, #tpu.memory_space<vmem>>, vector<16x1xf32>,
    %c0_250 = arith.constant 0 : index
    %c0_251 = arith.constant 0 : index
    %333 = vector.load %arg9[%c0_250, %c0_251] : memref<16x16xf32, #tpu.memory_space<vmem>>, vector<16x16xf32>
    %334 = vector.broadcast %326 : vector<16x1xf32> to vector<16x16xf32>
    %335 = arith.mulf %334, %333 : vector<16x16xf32>
    %cst_252 = arith.constant 0.000000e+00 : f32
    %336 = vector.shape_cast %328 : vector<16x1xf32> to vector<16x1xf32>
    %337 = vector.broadcast %336 : vector<16x1xf32> to vector<16x16xf32>
    %338 = vector.broadcast %cst_252 : f32 to vector<16x16xf32>
    %339 = arith.select %315, %337, %338 : vector<16x16xi1>, vector<16x16xf32>
    %340 = arith.addf %335, %339 : vector<16x16xf32>
    %c0_253 = arith.constant 0 : index
    %c0_254 = arith.constant 0 : index
    %341 = vector.load %arg9[%c0_253, %c0_254] : memref<16x16xf32, #tpu.memory_space<vmem>>, vector<16x16xf32>
    tpu.vector_store %arg9[%c0_253, %c0_254], %340 {strides = array<i32>} : memref<16x16xf32, #tpu.memory_space<vmem>>, vector<16x16xf32>,
    %c0_255 = arith.constant 0 : index
    %c0_256 = arith.constant 0 : index
    %342 = vector.load %arg10[%c0_255, %c0_256] : memref<16x1xf32, #tpu.memory_space<vmem>>, vector<16x1xf32>
    tpu.vector_store %arg10[%c0_255, %c0_256], %323 {strides = array<i32>} : memref<16x1xf32, #tpu.memory_space<vmem>>, vector<16x1xf32>,
    %c0_257 = arith.constant 0 : index
    %c0_258 = arith.constant 0 : index
    %c10 = arith.constant 10 : index
    %343 = vector.load %arg2[%c0_257, %c0_258, %c10] : memref<1x16x12xi32, #tpu.memory_space<vmem>>, vector<1x16x1xi32>
    %344 = vector.shape_cast %343 : vector<1x16x1xi32> to vector<16x1xi32>
    %c0_259 = arith.constant 0 : index
    %c0_260 = arith.constant 0 : index
    %c10_261 = arith.constant 10 : index
    %345 = vector.load %arg3[%c0_259, %c0_260, %c10_261] : memref<1x16x12xf32, #tpu.memory_space<vmem>>, vector<1x16x1xf32>
    %346 = vector.shape_cast %345 : vector<1x16x1xf32> to vector<16x1xf32>
    %347 = vector.broadcast %344 : vector<16x1xi32> to vector<16x16xi32>
    %348 = arith.cmpi eq, %347, %0 : vector<16x16xi32>
    %c0_262 = arith.constant 0 : index
    %c0_263 = arith.constant 0 : index
    %349 = vector.load %arg8[%c0_262, %c0_263] : memref<16x16xf32, #tpu.memory_space<vmem>>, vector<16x16xf32>
    %cst_264 = arith.constant 0.000000e+00 : f32
    %350 = vector.broadcast %cst_264 : f32 to vector<16x16xf32>
    %351 = arith.select %348, %349, %350 : vector<16x16xi1>, vector<16x16xf32>
    %cst_265 = arith.constant dense<0.000000e+00> : vector<16xf32>
    %352 = vector.multi_reduction <add>, %351, %cst_265 [1] : vector<16x16xf32> to vector<16xf32>
    %353 = vector.shape_cast %352 : vector<16xf32> to vector<16x1xf32>
    %354 = arith.mulf %346, %353 : vector<16x1xf32>
    %c0_266 = arith.constant 0 : index
    %c0_267 = arith.constant 0 : index
    %355 = vector.load %arg10[%c0_266, %c0_267] : memref<16x1xf32, #tpu.memory_space<vmem>>, vector<16x1xf32>
    %356 = arith.maximumf %355, %354 : vector<16x1xf32>
    %c0_268 = arith.constant 0 : index
    %c0_269 = arith.constant 0 : index
    %357 = vector.load %arg10[%c0_268, %c0_269] : memref<16x1xf32, #tpu.memory_space<vmem>>, vector<16x1xf32>
    %358 = arith.subf %357, %356 : vector<16x1xf32>
    %359 = math.exp %358 : vector<16x1xf32>
    %360 = arith.subf %354, %356 : vector<16x1xf32>
    %361 = math.exp %360 : vector<16x1xf32>
    %c0_270 = arith.constant 0 : index
    %c0_271 = arith.constant 0 : index
    %362 = vector.load %arg11[%c0_270, %c0_271] : memref<16x1xf32, #tpu.memory_space<vmem>>, vector<16x1xf32>
    %363 = arith.mulf %359, %362 : vector<16x1xf32>
    %364 = arith.addf %363, %361 : vector<16x1xf32>
    %c0_272 = arith.constant 0 : index
    %c0_273 = arith.constant 0 : index
    %365 = vector.load %arg11[%c0_272, %c0_273] : memref<16x1xf32, #tpu.memory_space<vmem>>, vector<16x1xf32>
    tpu.vector_store %arg11[%c0_272, %c0_273], %364 {strides = array<i32>} : memref<16x1xf32, #tpu.memory_space<vmem>>, vector<16x1xf32>,
    %c0_274 = arith.constant 0 : index
    %c0_275 = arith.constant 0 : index
    %366 = vector.load %arg9[%c0_274, %c0_275] : memref<16x16xf32, #tpu.memory_space<vmem>>, vector<16x16xf32>
    %367 = vector.broadcast %359 : vector<16x1xf32> to vector<16x16xf32>
    %368 = arith.mulf %367, %366 : vector<16x16xf32>
    %cst_276 = arith.constant 0.000000e+00 : f32
    %369 = vector.shape_cast %361 : vector<16x1xf32> to vector<16x1xf32>
    %370 = vector.broadcast %369 : vector<16x1xf32> to vector<16x16xf32>
    %371 = vector.broadcast %cst_276 : f32 to vector<16x16xf32>
    %372 = arith.select %348, %370, %371 : vector<16x16xi1>, vector<16x16xf32>
    %373 = arith.addf %368, %372 : vector<16x16xf32>
    %c0_277 = arith.constant 0 : index
    %c0_278 = arith.constant 0 : index
    %374 = vector.load %arg9[%c0_277, %c0_278] : memref<16x16xf32, #tpu.memory_space<vmem>>, vector<16x16xf32>
    tpu.vector_store %arg9[%c0_277, %c0_278], %373 {strides = array<i32>} : memref<16x16xf32, #tpu.memory_space<vmem>>, vector<16x16xf32>,
    %c0_279 = arith.constant 0 : index
    %c0_280 = arith.constant 0 : index
    %375 = vector.load %arg10[%c0_279, %c0_280] : memref<16x1xf32, #tpu.memory_space<vmem>>, vector<16x1xf32>
    tpu.vector_store %arg10[%c0_279, %c0_280], %356 {strides = array<i32>} : memref<16x1xf32, #tpu.memory_space<vmem>>, vector<16x1xf32>,
    %c0_281 = arith.constant 0 : index
    %c0_282 = arith.constant 0 : index
    %c11 = arith.constant 11 : index
    %376 = vector.load %arg2[%c0_281, %c0_282, %c11] : memref<1x16x12xi32, #tpu.memory_space<vmem>>, vector<1x16x1xi32>
    %377 = vector.shape_cast %376 : vector<1x16x1xi32> to vector<16x1xi32>
    %c0_283 = arith.constant 0 : index
    %c0_284 = arith.constant 0 : index
    %c11_285 = arith.constant 11 : index
    %378 = vector.load %arg3[%c0_283, %c0_284, %c11_285] : memref<1x16x12xf32, #tpu.memory_space<vmem>>, vector<1x16x1xf32>
    %379 = vector.shape_cast %378 : vector<1x16x1xf32> to vector<16x1xf32>
    %380 = vector.broadcast %377 : vector<16x1xi32> to vector<16x16xi32>
    %381 = arith.cmpi eq, %380, %0 : vector<16x16xi32>
    %c0_286 = arith.constant 0 : index
    %c0_287 = arith.constant 0 : index
    %382 = vector.load %arg8[%c0_286, %c0_287] : memref<16x16xf32, #tpu.memory_space<vmem>>, vector<16x16xf32>
    %cst_288 = arith.constant 0.000000e+00 : f32
    %383 = vector.broadcast %cst_288 : f32 to vector<16x16xf32>
    %384 = arith.select %381, %382, %383 : vector<16x16xi1>, vector<16x16xf32>
    %cst_289 = arith.constant dense<0.000000e+00> : vector<16xf32>
    %385 = vector.multi_reduction <add>, %384, %cst_289 [1] : vector<16x16xf32> to vector<16xf32>
    %386 = vector.shape_cast %385 : vector<16xf32> to vector<16x1xf32>
    %387 = arith.mulf %379, %386 : vector<16x1xf32>
    %c0_290 = arith.constant 0 : index
    %c0_291 = arith.constant 0 : index
    %388 = vector.load %arg10[%c0_290, %c0_291] : memref<16x1xf32, #tpu.memory_space<vmem>>, vector<16x1xf32>
    %389 = arith.maximumf %388, %387 : vector<16x1xf32>
    %c0_292 = arith.constant 0 : index
    %c0_293 = arith.constant 0 : index
    %390 = vector.load %arg10[%c0_292, %c0_293] : memref<16x1xf32, #tpu.memory_space<vmem>>, vector<16x1xf32>
    %391 = arith.subf %390, %389 : vector<16x1xf32>
    %392 = math.exp %391 : vector<16x1xf32>
    %393 = arith.subf %387, %389 : vector<16x1xf32>
    %394 = math.exp %393 : vector<16x1xf32>
    %c0_294 = arith.constant 0 : index
    %c0_295 = arith.constant 0 : index
    %395 = vector.load %arg11[%c0_294, %c0_295] : memref<16x1xf32, #tpu.memory_space<vmem>>, vector<16x1xf32>
    %396 = arith.mulf %392, %395 : vector<16x1xf32>
    %397 = arith.addf %396, %394 : vector<16x1xf32>
    %c0_296 = arith.constant 0 : index
    %c0_297 = arith.constant 0 : index
    %398 = vector.load %arg11[%c0_296, %c0_297] : memref<16x1xf32, #tpu.memory_space<vmem>>, vector<16x1xf32>
    tpu.vector_store %arg11[%c0_296, %c0_297], %397 {strides = array<i32>} : memref<16x1xf32, #tpu.memory_space<vmem>>, vector<16x1xf32>,
    %c0_298 = arith.constant 0 : index
    %c0_299 = arith.constant 0 : index
    %399 = vector.load %arg9[%c0_298, %c0_299] : memref<16x16xf32, #tpu.memory_space<vmem>>, vector<16x16xf32>
    %400 = vector.broadcast %392 : vector<16x1xf32> to vector<16x16xf32>
    %401 = arith.mulf %400, %399 : vector<16x16xf32>
    %cst_300 = arith.constant 0.000000e+00 : f32
    %402 = vector.shape_cast %394 : vector<16x1xf32> to vector<16x1xf32>
    %403 = vector.broadcast %402 : vector<16x1xf32> to vector<16x16xf32>
    %404 = vector.broadcast %cst_300 : f32 to vector<16x16xf32>
    %405 = arith.select %381, %403, %404 : vector<16x16xi1>, vector<16x16xf32>
    %406 = arith.addf %401, %405 : vector<16x16xf32>
    %c0_301 = arith.constant 0 : index
    %c0_302 = arith.constant 0 : index
    %407 = vector.load %arg9[%c0_301, %c0_302] : memref<16x16xf32, #tpu.memory_space<vmem>>, vector<16x16xf32>
    tpu.vector_store %arg9[%c0_301, %c0_302], %406 {strides = array<i32>} : memref<16x16xf32, #tpu.memory_space<vmem>>, vector<16x16xf32>,
    %c0_303 = arith.constant 0 : index
    %c0_304 = arith.constant 0 : index
    %408 = vector.load %arg10[%c0_303, %c0_304] : memref<16x1xf32, #tpu.memory_space<vmem>>, vector<16x1xf32>
    tpu.vector_store %arg10[%c0_303, %c0_304], %389 {strides = array<i32>} : memref<16x1xf32, #tpu.memory_space<vmem>>, vector<16x1xf32>,
    %c0_305 = arith.constant 0 : index
    %c0_306 = arith.constant 0 : index
    %c0_307 = arith.constant 0 : index
    %409 = vector.load %arg6[%c0_305, %c0_306, %c0_307] : memref<1x16x32xbf16, #tpu.memory_space<vmem>>, vector<1x16x16xbf16>
    %410 = vector.shape_cast %409 : vector<1x16x16xbf16> to vector<16x16xbf16>
    %c0_308 = arith.constant 0 : index
    %c0_309 = arith.constant 0 : index
    %411 = vector.load %arg9[%c0_308, %c0_309] : memref<16x16xf32, #tpu.memory_space<vmem>>, vector<16x16xf32>
    %412 = arith.truncf %411 : vector<16x16xf32> to vector<16x16xbf16>
    %cst_310 = arith.constant dense<0.000000e+00> : vector<16x16xf32>
    %413 = tpu.matmul %412, %410, %cst_310 {dimension_numbers = #tpu.dot_dimension_numbers<[1], [0], [0], [1], [0, 0, 1, 1], [], []>} : vector<16x16xbf16>, vector<16x16xbf16>, vector<16x16xf32> -> vector<16x16xf32>
    %c0_311 = arith.constant 0 : index
    %c0_312 = arith.constant 0 : index
    %414 = vector.load %arg11[%c0_311, %c0_312] : memref<16x1xf32, #tpu.memory_space<vmem>>, vector<16x1xf32>
    %415 = vector.broadcast %414 : vector<16x1xf32> to vector<16x16xf32>
    %416 = arith.divf %413, %415 : vector<16x16xf32>
    %c0_313 = arith.constant 0 : index
    %c0_314 = arith.constant 0 : index
    %417 = vector.load %arg12[%c0_313, %c0_314] : memref<16x32xf32, #tpu.memory_space<vmem>>, vector<16x16xf32>
    tpu.vector_store %arg12[%c0_313, %c0_314], %416 {strides = array<i32>} : memref<16x32xf32, #tpu.memory_space<vmem>>, vector<16x16xf32>,
    %c0_315 = arith.constant 0 : index
    %c0_316 = arith.constant 0 : index
    %c16 = arith.constant 16 : index
    %418 = vector.load %arg4[%c0_315, %c0_316, %c16] : memref<1x16x32xbf16, #tpu.memory_space<vmem>>, vector<1x16x16xbf16>
    %419 = vector.shape_cast %418 : vector<1x16x16xbf16> to vector<16x16xbf16>
    %c0_317 = arith.constant 0 : index
    %c0_318 = arith.constant 0 : index
    %c16_319 = arith.constant 16 : index
    %420 = vector.load %arg5[%c0_317, %c0_318, %c16_319] : memref<1x16x32xbf16, #tpu.memory_space<vmem>>, vector<1x16x16xbf16>
    %421 = vector.shape_cast %420 : vector<1x16x16xbf16> to vector<16x16xbf16>
    %cst_320 = arith.constant dense<0.000000e+00> : vector<16x16xf32>
    %422 = tpu.matmul %419, %421, %cst_320 {dimension_numbers = #tpu.dot_dimension_numbers<[1], [1], [0], [0], [0, 0, 1, 0], [], []>} : vector<16x16xbf16>, vector<16x16xbf16>, vector<16x16xf32> -> vector<16x16xf32>
    %c0_321 = arith.constant 0 : index
    %c0_322 = arith.constant 0 : index
    %423 = vector.load %arg8[%c0_321, %c0_322] : memref<16x16xf32, #tpu.memory_space<vmem>>, vector<16x16xf32>
    tpu.vector_store %arg8[%c0_321, %c0_322], %422 {strides = array<i32>} : memref<16x16xf32, #tpu.memory_space<vmem>>, vector<16x16xf32>,
    %cst_323 = arith.constant 0.000000e+00 : f32
    %424 = vector.broadcast %cst_323 : f32 to vector<16x16xf32>
    %c0_324 = arith.constant 0 : index
    %c0_325 = arith.constant 0 : index
    %425 = vector.load %arg9[%c0_324, %c0_325] : memref<16x16xf32, #tpu.memory_space<vmem>>, vector<16x16xf32>
    tpu.vector_store %arg9[%c0_324, %c0_325], %424 {strides = array<i32>} : memref<16x16xf32, #tpu.memory_space<vmem>>, vector<16x16xf32>,
    %cst_326 = arith.constant -1.000000e+30 : f32
    %426 = vector.broadcast %cst_326 : f32 to vector<16x1xf32>
    %c0_327 = arith.constant 0 : index
    %c0_328 = arith.constant 0 : index
    %427 = vector.load %arg10[%c0_327, %c0_328] : memref<16x1xf32, #tpu.memory_space<vmem>>, vector<16x1xf32>
    tpu.vector_store %arg10[%c0_327, %c0_328], %426 {strides = array<i32>} : memref<16x1xf32, #tpu.memory_space<vmem>>, vector<16x1xf32>,
    %cst_329 = arith.constant 0.000000e+00 : f32
    %428 = vector.broadcast %cst_329 : f32 to vector<16x1xf32>
    %c0_330 = arith.constant 0 : index
    %c0_331 = arith.constant 0 : index
    %429 = vector.load %arg11[%c0_330, %c0_331] : memref<16x1xf32, #tpu.memory_space<vmem>>, vector<16x1xf32>
    tpu.vector_store %arg11[%c0_330, %c0_331], %428 {strides = array<i32>} : memref<16x1xf32, #tpu.memory_space<vmem>>, vector<16x1xf32>,
    %c0_332 = arith.constant 0 : index
    %c0_333 = arith.constant 0 : index
    %c0_334 = arith.constant 0 : index
    %430 = vector.load %arg2[%c0_332, %c0_333, %c0_334] : memref<1x16x12xi32, #tpu.memory_space<vmem>>, vector<1x16x1xi32>
    %431 = vector.shape_cast %430 : vector<1x16x1xi32> to vector<16x1xi32>
    %c0_335 = arith.constant 0 : index
    %c0_336 = arith.constant 0 : index
    %c0_337 = arith.constant 0 : index
    %432 = vector.load %arg3[%c0_335, %c0_336, %c0_337] : memref<1x16x12xf32, #tpu.memory_space<vmem>>, vector<1x16x1xf32>
    %433 = vector.shape_cast %432 : vector<1x16x1xf32> to vector<16x1xf32>
    %434 = vector.broadcast %431 : vector<16x1xi32> to vector<16x16xi32>
    %435 = arith.cmpi eq, %434, %0 : vector<16x16xi32>
    %c0_338 = arith.constant 0 : index
    %c0_339 = arith.constant 0 : index
    %436 = vector.load %arg8[%c0_338, %c0_339] : memref<16x16xf32, #tpu.memory_space<vmem>>, vector<16x16xf32>
    %cst_340 = arith.constant 0.000000e+00 : f32
    %437 = vector.broadcast %cst_340 : f32 to vector<16x16xf32>
    %438 = arith.select %435, %436, %437 : vector<16x16xi1>, vector<16x16xf32>
    %cst_341 = arith.constant dense<0.000000e+00> : vector<16xf32>
    %439 = vector.multi_reduction <add>, %438, %cst_341 [1] : vector<16x16xf32> to vector<16xf32>
    %440 = vector.shape_cast %439 : vector<16xf32> to vector<16x1xf32>
    %441 = arith.mulf %433, %440 : vector<16x1xf32>
    %c0_342 = arith.constant 0 : index
    %c0_343 = arith.constant 0 : index
    %442 = vector.load %arg10[%c0_342, %c0_343] : memref<16x1xf32, #tpu.memory_space<vmem>>, vector<16x1xf32>
    %443 = arith.maximumf %442, %441 : vector<16x1xf32>
    %c0_344 = arith.constant 0 : index
    %c0_345 = arith.constant 0 : index
    %444 = vector.load %arg10[%c0_344, %c0_345] : memref<16x1xf32, #tpu.memory_space<vmem>>, vector<16x1xf32>
    %445 = arith.subf %444, %443 : vector<16x1xf32>
    %446 = math.exp %445 : vector<16x1xf32>
    %447 = arith.subf %441, %443 : vector<16x1xf32>
    %448 = math.exp %447 : vector<16x1xf32>
    %c0_346 = arith.constant 0 : index
    %c0_347 = arith.constant 0 : index
    %449 = vector.load %arg11[%c0_346, %c0_347] : memref<16x1xf32, #tpu.memory_space<vmem>>, vector<16x1xf32>
    %450 = arith.mulf %446, %449 : vector<16x1xf32>
    %451 = arith.addf %450, %448 : vector<16x1xf32>
    %c0_348 = arith.constant 0 : index
    %c0_349 = arith.constant 0 : index
    %452 = vector.load %arg11[%c0_348, %c0_349] : memref<16x1xf32, #tpu.memory_space<vmem>>, vector<16x1xf32>
    tpu.vector_store %arg11[%c0_348, %c0_349], %451 {strides = array<i32>} : memref<16x1xf32, #tpu.memory_space<vmem>>, vector<16x1xf32>,
    %c0_350 = arith.constant 0 : index
    %c0_351 = arith.constant 0 : index
    %453 = vector.load %arg9[%c0_350, %c0_351] : memref<16x16xf32, #tpu.memory_space<vmem>>, vector<16x16xf32>
    %454 = vector.broadcast %446 : vector<16x1xf32> to vector<16x16xf32>
    %455 = arith.mulf %454, %453 : vector<16x16xf32>
    %cst_352 = arith.constant 0.000000e+00 : f32
    %456 = vector.shape_cast %448 : vector<16x1xf32> to vector<16x1xf32>
    %457 = vector.broadcast %456 : vector<16x1xf32> to vector<16x16xf32>
    %458 = vector.broadcast %cst_352 : f32 to vector<16x16xf32>
    %459 = arith.select %435, %457, %458 : vector<16x16xi1>, vector<16x16xf32>
    %460 = arith.addf %455, %459 : vector<16x16xf32>
    %c0_353 = arith.constant 0 : index
    %c0_354 = arith.constant 0 : index
    %461 = vector.load %arg9[%c0_353, %c0_354] : memref<16x16xf32, #tpu.memory_space<vmem>>, vector<16x16xf32>
    tpu.vector_store %arg9[%c0_353, %c0_354], %460 {strides = array<i32>} : memref<16x16xf32, #tpu.memory_space<vmem>>, vector<16x16xf32>,
    %c0_355 = arith.constant 0 : index
    %c0_356 = arith.constant 0 : index
    %462 = vector.load %arg10[%c0_355, %c0_356] : memref<16x1xf32, #tpu.memory_space<vmem>>, vector<16x1xf32>
    tpu.vector_store %arg10[%c0_355, %c0_356], %443 {strides = array<i32>} : memref<16x1xf32, #tpu.memory_space<vmem>>, vector<16x1xf32>,
    %c0_357 = arith.constant 0 : index
    %c0_358 = arith.constant 0 : index
    %c1_359 = arith.constant 1 : index
    %463 = vector.load %arg2[%c0_357, %c0_358, %c1_359] : memref<1x16x12xi32, #tpu.memory_space<vmem>>, vector<1x16x1xi32>
    %464 = vector.shape_cast %463 : vector<1x16x1xi32> to vector<16x1xi32>
    %c0_360 = arith.constant 0 : index
    %c0_361 = arith.constant 0 : index
    %c1_362 = arith.constant 1 : index
    %465 = vector.load %arg3[%c0_360, %c0_361, %c1_362] : memref<1x16x12xf32, #tpu.memory_space<vmem>>, vector<1x16x1xf32>
    %466 = vector.shape_cast %465 : vector<1x16x1xf32> to vector<16x1xf32>
    %467 = vector.broadcast %464 : vector<16x1xi32> to vector<16x16xi32>
    %468 = arith.cmpi eq, %467, %0 : vector<16x16xi32>
    %c0_363 = arith.constant 0 : index
    %c0_364 = arith.constant 0 : index
    %469 = vector.load %arg8[%c0_363, %c0_364] : memref<16x16xf32, #tpu.memory_space<vmem>>, vector<16x16xf32>
    %cst_365 = arith.constant 0.000000e+00 : f32
    %470 = vector.broadcast %cst_365 : f32 to vector<16x16xf32>
    %471 = arith.select %468, %469, %470 : vector<16x16xi1>, vector<16x16xf32>
    %cst_366 = arith.constant dense<0.000000e+00> : vector<16xf32>
    %472 = vector.multi_reduction <add>, %471, %cst_366 [1] : vector<16x16xf32> to vector<16xf32>
    %473 = vector.shape_cast %472 : vector<16xf32> to vector<16x1xf32>
    %474 = arith.mulf %466, %473 : vector<16x1xf32>
    %c0_367 = arith.constant 0 : index
    %c0_368 = arith.constant 0 : index
    %475 = vector.load %arg10[%c0_367, %c0_368] : memref<16x1xf32, #tpu.memory_space<vmem>>, vector<16x1xf32>
    %476 = arith.maximumf %475, %474 : vector<16x1xf32>
    %c0_369 = arith.constant 0 : index
    %c0_370 = arith.constant 0 : index
    %477 = vector.load %arg10[%c0_369, %c0_370] : memref<16x1xf32, #tpu.memory_space<vmem>>, vector<16x1xf32>
    %478 = arith.subf %477, %476 : vector<16x1xf32>
    %479 = math.exp %478 : vector<16x1xf32>
    %480 = arith.subf %474, %476 : vector<16x1xf32>
    %481 = math.exp %480 : vector<16x1xf32>
    %c0_371 = arith.constant 0 : index
    %c0_372 = arith.constant 0 : index
    %482 = vector.load %arg11[%c0_371, %c0_372] : memref<16x1xf32, #tpu.memory_space<vmem>>, vector<16x1xf32>
    %483 = arith.mulf %479, %482 : vector<16x1xf32>
    %484 = arith.addf %483, %481 : vector<16x1xf32>
    %c0_373 = arith.constant 0 : index
    %c0_374 = arith.constant 0 : index
    %485 = vector.load %arg11[%c0_373, %c0_374] : memref<16x1xf32, #tpu.memory_space<vmem>>, vector<16x1xf32>
    tpu.vector_store %arg11[%c0_373, %c0_374], %484 {strides = array<i32>} : memref<16x1xf32, #tpu.memory_space<vmem>>, vector<16x1xf32>,
    %c0_375 = arith.constant 0 : index
    %c0_376 = arith.constant 0 : index
    %486 = vector.load %arg9[%c0_375, %c0_376] : memref<16x16xf32, #tpu.memory_space<vmem>>, vector<16x16xf32>
    %487 = vector.broadcast %479 : vector<16x1xf32> to vector<16x16xf32>
    %488 = arith.mulf %487, %486 : vector<16x16xf32>
    %cst_377 = arith.constant 0.000000e+00 : f32
    %489 = vector.shape_cast %481 : vector<16x1xf32> to vector<16x1xf32>
    %490 = vector.broadcast %489 : vector<16x1xf32> to vector<16x16xf32>
    %491 = vector.broadcast %cst_377 : f32 to vector<16x16xf32>
    %492 = arith.select %468, %490, %491 : vector<16x16xi1>, vector<16x16xf32>
    %493 = arith.addf %488, %492 : vector<16x16xf32>
    %c0_378 = arith.constant 0 : index
    %c0_379 = arith.constant 0 : index
    %494 = vector.load %arg9[%c0_378, %c0_379] : memref<16x16xf32, #tpu.memory_space<vmem>>, vector<16x16xf32>
    tpu.vector_store %arg9[%c0_378, %c0_379], %493 {strides = array<i32>} : memref<16x16xf32, #tpu.memory_space<vmem>>, vector<16x16xf32>,
    %c0_380 = arith.constant 0 : index
    %c0_381 = arith.constant 0 : index
    %495 = vector.load %arg10[%c0_380, %c0_381] : memref<16x1xf32, #tpu.memory_space<vmem>>, vector<16x1xf32>
    tpu.vector_store %arg10[%c0_380, %c0_381], %476 {strides = array<i32>} : memref<16x1xf32, #tpu.memory_space<vmem>>, vector<16x1xf32>,
    %c0_382 = arith.constant 0 : index
    %c0_383 = arith.constant 0 : index
    %c2_384 = arith.constant 2 : index
    %496 = vector.load %arg2[%c0_382, %c0_383, %c2_384] : memref<1x16x12xi32, #tpu.memory_space<vmem>>, vector<1x16x1xi32>
    %497 = vector.shape_cast %496 : vector<1x16x1xi32> to vector<16x1xi32>
    %c0_385 = arith.constant 0 : index
    %c0_386 = arith.constant 0 : index
    %c2_387 = arith.constant 2 : index
    %498 = vector.load %arg3[%c0_385, %c0_386, %c2_387] : memref<1x16x12xf32, #tpu.memory_space<vmem>>, vector<1x16x1xf32>
    %499 = vector.shape_cast %498 : vector<1x16x1xf32> to vector<16x1xf32>
    %500 = vector.broadcast %497 : vector<16x1xi32> to vector<16x16xi32>
    %501 = arith.cmpi eq, %500, %0 : vector<16x16xi32>
    %c0_388 = arith.constant 0 : index
    %c0_389 = arith.constant 0 : index
    %502 = vector.load %arg8[%c0_388, %c0_389] : memref<16x16xf32, #tpu.memory_space<vmem>>, vector<16x16xf32>
    %cst_390 = arith.constant 0.000000e+00 : f32
    %503 = vector.broadcast %cst_390 : f32 to vector<16x16xf32>
    %504 = arith.select %501, %502, %503 : vector<16x16xi1>, vector<16x16xf32>
    %cst_391 = arith.constant dense<0.000000e+00> : vector<16xf32>
    %505 = vector.multi_reduction <add>, %504, %cst_391 [1] : vector<16x16xf32> to vector<16xf32>
    %506 = vector.shape_cast %505 : vector<16xf32> to vector<16x1xf32>
    %507 = arith.mulf %499, %506 : vector<16x1xf32>
    %c0_392 = arith.constant 0 : index
    %c0_393 = arith.constant 0 : index
    %508 = vector.load %arg10[%c0_392, %c0_393] : memref<16x1xf32, #tpu.memory_space<vmem>>, vector<16x1xf32>
    %509 = arith.maximumf %508, %507 : vector<16x1xf32>
    %c0_394 = arith.constant 0 : index
    %c0_395 = arith.constant 0 : index
    %510 = vector.load %arg10[%c0_394, %c0_395] : memref<16x1xf32, #tpu.memory_space<vmem>>, vector<16x1xf32>
    %511 = arith.subf %510, %509 : vector<16x1xf32>
    %512 = math.exp %511 : vector<16x1xf32>
    %513 = arith.subf %507, %509 : vector<16x1xf32>
    %514 = math.exp %513 : vector<16x1xf32>
    %c0_396 = arith.constant 0 : index
    %c0_397 = arith.constant 0 : index
    %515 = vector.load %arg11[%c0_396, %c0_397] : memref<16x1xf32, #tpu.memory_space<vmem>>, vector<16x1xf32>
    %516 = arith.mulf %512, %515 : vector<16x1xf32>
    %517 = arith.addf %516, %514 : vector<16x1xf32>
    %c0_398 = arith.constant 0 : index
    %c0_399 = arith.constant 0 : index
    %518 = vector.load %arg11[%c0_398, %c0_399] : memref<16x1xf32, #tpu.memory_space<vmem>>, vector<16x1xf32>
    tpu.vector_store %arg11[%c0_398, %c0_399], %517 {strides = array<i32>} : memref<16x1xf32, #tpu.memory_space<vmem>>, vector<16x1xf32>,
    %c0_400 = arith.constant 0 : index
    %c0_401 = arith.constant 0 : index
    %519 = vector.load %arg9[%c0_400, %c0_401] : memref<16x16xf32, #tpu.memory_space<vmem>>, vector<16x16xf32>
    %520 = vector.broadcast %512 : vector<16x1xf32> to vector<16x16xf32>
    %521 = arith.mulf %520, %519 : vector<16x16xf32>
    %cst_402 = arith.constant 0.000000e+00 : f32
    %522 = vector.shape_cast %514 : vector<16x1xf32> to vector<16x1xf32>
    %523 = vector.broadcast %522 : vector<16x1xf32> to vector<16x16xf32>
    %524 = vector.broadcast %cst_402 : f32 to vector<16x16xf32>
    %525 = arith.select %501, %523, %524 : vector<16x16xi1>, vector<16x16xf32>
    %526 = arith.addf %521, %525 : vector<16x16xf32>
    %c0_403 = arith.constant 0 : index
    %c0_404 = arith.constant 0 : index
    %527 = vector.load %arg9[%c0_403, %c0_404] : memref<16x16xf32, #tpu.memory_space<vmem>>, vector<16x16xf32>
    tpu.vector_store %arg9[%c0_403, %c0_404], %526 {strides = array<i32>} : memref<16x16xf32, #tpu.memory_space<vmem>>, vector<16x16xf32>,
    %c0_405 = arith.constant 0 : index
    %c0_406 = arith.constant 0 : index
    %528 = vector.load %arg10[%c0_405, %c0_406] : memref<16x1xf32, #tpu.memory_space<vmem>>, vector<16x1xf32>
    tpu.vector_store %arg10[%c0_405, %c0_406], %509 {strides = array<i32>} : memref<16x1xf32, #tpu.memory_space<vmem>>, vector<16x1xf32>,
    %c0_407 = arith.constant 0 : index
    %c0_408 = arith.constant 0 : index
    %c3_409 = arith.constant 3 : index
    %529 = vector.load %arg2[%c0_407, %c0_408, %c3_409] : memref<1x16x12xi32, #tpu.memory_space<vmem>>, vector<1x16x1xi32>
    %530 = vector.shape_cast %529 : vector<1x16x1xi32> to vector<16x1xi32>
    %c0_410 = arith.constant 0 : index
    %c0_411 = arith.constant 0 : index
    %c3_412 = arith.constant 3 : index
    %531 = vector.load %arg3[%c0_410, %c0_411, %c3_412] : memref<1x16x12xf32, #tpu.memory_space<vmem>>, vector<1x16x1xf32>
    %532 = vector.shape_cast %531 : vector<1x16x1xf32> to vector<16x1xf32>
    %533 = vector.broadcast %530 : vector<16x1xi32> to vector<16x16xi32>
    %534 = arith.cmpi eq, %533, %0 : vector<16x16xi32>
    %c0_413 = arith.constant 0 : index
    %c0_414 = arith.constant 0 : index
    %535 = vector.load %arg8[%c0_413, %c0_414] : memref<16x16xf32, #tpu.memory_space<vmem>>, vector<16x16xf32>
    %cst_415 = arith.constant 0.000000e+00 : f32
    %536 = vector.broadcast %cst_415 : f32 to vector<16x16xf32>
    %537 = arith.select %534, %535, %536 : vector<16x16xi1>, vector<16x16xf32>
    %cst_416 = arith.constant dense<0.000000e+00> : vector<16xf32>
    %538 = vector.multi_reduction <add>, %537, %cst_416 [1] : vector<16x16xf32> to vector<16xf32>
    %539 = vector.shape_cast %538 : vector<16xf32> to vector<16x1xf32>
    %540 = arith.mulf %532, %539 : vector<16x1xf32>
    %c0_417 = arith.constant 0 : index
    %c0_418 = arith.constant 0 : index
    %541 = vector.load %arg10[%c0_417, %c0_418] : memref<16x1xf32, #tpu.memory_space<vmem>>, vector<16x1xf32>
    %542 = arith.maximumf %541, %540 : vector<16x1xf32>
    %c0_419 = arith.constant 0 : index
    %c0_420 = arith.constant 0 : index
    %543 = vector.load %arg10[%c0_419, %c0_420] : memref<16x1xf32, #tpu.memory_space<vmem>>, vector<16x1xf32>
    %544 = arith.subf %543, %542 : vector<16x1xf32>
    %545 = math.exp %544 : vector<16x1xf32>
    %546 = arith.subf %540, %542 : vector<16x1xf32>
    %547 = math.exp %546 : vector<16x1xf32>
    %c0_421 = arith.constant 0 : index
    %c0_422 = arith.constant 0 : index
    %548 = vector.load %arg11[%c0_421, %c0_422] : memref<16x1xf32, #tpu.memory_space<vmem>>, vector<16x1xf32>
    %549 = arith.mulf %545, %548 : vector<16x1xf32>
    %550 = arith.addf %549, %547 : vector<16x1xf32>
    %c0_423 = arith.constant 0 : index
    %c0_424 = arith.constant 0 : index
    %551 = vector.load %arg11[%c0_423, %c0_424] : memref<16x1xf32, #tpu.memory_space<vmem>>, vector<16x1xf32>
    tpu.vector_store %arg11[%c0_423, %c0_424], %550 {strides = array<i32>} : memref<16x1xf32, #tpu.memory_space<vmem>>, vector<16x1xf32>,
    %c0_425 = arith.constant 0 : index
    %c0_426 = arith.constant 0 : index
    %552 = vector.load %arg9[%c0_425, %c0_426] : memref<16x16xf32, #tpu.memory_space<vmem>>, vector<16x16xf32>
    %553 = vector.broadcast %545 : vector<16x1xf32> to vector<16x16xf32>
    %554 = arith.mulf %553, %552 : vector<16x16xf32>
    %cst_427 = arith.constant 0.000000e+00 : f32
    %555 = vector.shape_cast %547 : vector<16x1xf32> to vector<16x1xf32>
    %556 = vector.broadcast %555 : vector<16x1xf32> to vector<16x16xf32>
    %557 = vector.broadcast %cst_427 : f32 to vector<16x16xf32>
    %558 = arith.select %534, %556, %557 : vector<16x16xi1>, vector<16x16xf32>
    %559 = arith.addf %554, %558 : vector<16x16xf32>
    %c0_428 = arith.constant 0 : index
    %c0_429 = arith.constant 0 : index
    %560 = vector.load %arg9[%c0_428, %c0_429] : memref<16x16xf32, #tpu.memory_space<vmem>>, vector<16x16xf32>
    tpu.vector_store %arg9[%c0_428, %c0_429], %559 {strides = array<i32>} : memref<16x16xf32, #tpu.memory_space<vmem>>, vector<16x16xf32>,
    %c0_430 = arith.constant 0 : index
    %c0_431 = arith.constant 0 : index
    %561 = vector.load %arg10[%c0_430, %c0_431] : memref<16x1xf32, #tpu.memory_space<vmem>>, vector<16x1xf32>
    tpu.vector_store %arg10[%c0_430, %c0_431], %542 {strides = array<i32>} : memref<16x1xf32, #tpu.memory_space<vmem>>, vector<16x1xf32>,
    %c0_432 = arith.constant 0 : index
    %c0_433 = arith.constant 0 : index
    %c4_434 = arith.constant 4 : index
    %562 = vector.load %arg2[%c0_432, %c0_433, %c4_434] : memref<1x16x12xi32, #tpu.memory_space<vmem>>, vector<1x16x1xi32>
    %563 = vector.shape_cast %562 : vector<1x16x1xi32> to vector<16x1xi32>
    %c0_435 = arith.constant 0 : index
    %c0_436 = arith.constant 0 : index
    %c4_437 = arith.constant 4 : index
    %564 = vector.load %arg3[%c0_435, %c0_436, %c4_437] : memref<1x16x12xf32, #tpu.memory_space<vmem>>, vector<1x16x1xf32>
    %565 = vector.shape_cast %564 : vector<1x16x1xf32> to vector<16x1xf32>
    %566 = vector.broadcast %563 : vector<16x1xi32> to vector<16x16xi32>
    %567 = arith.cmpi eq, %566, %0 : vector<16x16xi32>
    %c0_438 = arith.constant 0 : index
    %c0_439 = arith.constant 0 : index
    %568 = vector.load %arg8[%c0_438, %c0_439] : memref<16x16xf32, #tpu.memory_space<vmem>>, vector<16x16xf32>
    %cst_440 = arith.constant 0.000000e+00 : f32
    %569 = vector.broadcast %cst_440 : f32 to vector<16x16xf32>
    %570 = arith.select %567, %568, %569 : vector<16x16xi1>, vector<16x16xf32>
    %cst_441 = arith.constant dense<0.000000e+00> : vector<16xf32>
    %571 = vector.multi_reduction <add>, %570, %cst_441 [1] : vector<16x16xf32> to vector<16xf32>
    %572 = vector.shape_cast %571 : vector<16xf32> to vector<16x1xf32>
    %573 = arith.mulf %565, %572 : vector<16x1xf32>
    %c0_442 = arith.constant 0 : index
    %c0_443 = arith.constant 0 : index
    %574 = vector.load %arg10[%c0_442, %c0_443] : memref<16x1xf32, #tpu.memory_space<vmem>>, vector<16x1xf32>
    %575 = arith.maximumf %574, %573 : vector<16x1xf32>
    %c0_444 = arith.constant 0 : index
    %c0_445 = arith.constant 0 : index
    %576 = vector.load %arg10[%c0_444, %c0_445] : memref<16x1xf32, #tpu.memory_space<vmem>>, vector<16x1xf32>
    %577 = arith.subf %576, %575 : vector<16x1xf32>
    %578 = math.exp %577 : vector<16x1xf32>
    %579 = arith.subf %573, %575 : vector<16x1xf32>
    %580 = math.exp %579 : vector<16x1xf32>
    %c0_446 = arith.constant 0 : index
    %c0_447 = arith.constant 0 : index
    %581 = vector.load %arg11[%c0_446, %c0_447] : memref<16x1xf32, #tpu.memory_space<vmem>>, vector<16x1xf32>
    %582 = arith.mulf %578, %581 : vector<16x1xf32>
    %583 = arith.addf %582, %580 : vector<16x1xf32>
    %c0_448 = arith.constant 0 : index
    %c0_449 = arith.constant 0 : index
    %584 = vector.load %arg11[%c0_448, %c0_449] : memref<16x1xf32, #tpu.memory_space<vmem>>, vector<16x1xf32>
    tpu.vector_store %arg11[%c0_448, %c0_449], %583 {strides = array<i32>} : memref<16x1xf32, #tpu.memory_space<vmem>>, vector<16x1xf32>,
    %c0_450 = arith.constant 0 : index
    %c0_451 = arith.constant 0 : index
    %585 = vector.load %arg9[%c0_450, %c0_451] : memref<16x16xf32, #tpu.memory_space<vmem>>, vector<16x16xf32>
    %586 = vector.broadcast %578 : vector<16x1xf32> to vector<16x16xf32>
    %587 = arith.mulf %586, %585 : vector<16x16xf32>
    %cst_452 = arith.constant 0.000000e+00 : f32
    %588 = vector.shape_cast %580 : vector<16x1xf32> to vector<16x1xf32>
    %589 = vector.broadcast %588 : vector<16x1xf32> to vector<16x16xf32>
    %590 = vector.broadcast %cst_452 : f32 to vector<16x16xf32>
    %591 = arith.select %567, %589, %590 : vector<16x16xi1>, vector<16x16xf32>
    %592 = arith.addf %587, %591 : vector<16x16xf32>
    %c0_453 = arith.constant 0 : index
    %c0_454 = arith.constant 0 : index
    %593 = vector.load %arg9[%c0_453, %c0_454] : memref<16x16xf32, #tpu.memory_space<vmem>>, vector<16x16xf32>
    tpu.vector_store %arg9[%c0_453, %c0_454], %592 {strides = array<i32>} : memref<16x16xf32, #tpu.memory_space<vmem>>, vector<16x16xf32>,
    %c0_455 = arith.constant 0 : index
    %c0_456 = arith.constant 0 : index
    %594 = vector.load %arg10[%c0_455, %c0_456] : memref<16x1xf32, #tpu.memory_space<vmem>>, vector<16x1xf32>
    tpu.vector_store %arg10[%c0_455, %c0_456], %575 {strides = array<i32>} : memref<16x1xf32, #tpu.memory_space<vmem>>, vector<16x1xf32>,
    %c0_457 = arith.constant 0 : index
    %c0_458 = arith.constant 0 : index
    %c5_459 = arith.constant 5 : index
    %595 = vector.load %arg2[%c0_457, %c0_458, %c5_459] : memref<1x16x12xi32, #tpu.memory_space<vmem>>, vector<1x16x1xi32>
    %596 = vector.shape_cast %595 : vector<1x16x1xi32> to vector<16x1xi32>
    %c0_460 = arith.constant 0 : index
    %c0_461 = arith.constant 0 : index
    %c5_462 = arith.constant 5 : index
    %597 = vector.load %arg3[%c0_460, %c0_461, %c5_462] : memref<1x16x12xf32, #tpu.memory_space<vmem>>, vector<1x16x1xf32>
    %598 = vector.shape_cast %597 : vector<1x16x1xf32> to vector<16x1xf32>
    %599 = vector.broadcast %596 : vector<16x1xi32> to vector<16x16xi32>
    %600 = arith.cmpi eq, %599, %0 : vector<16x16xi32>
    %c0_463 = arith.constant 0 : index
    %c0_464 = arith.constant 0 : index
    %601 = vector.load %arg8[%c0_463, %c0_464] : memref<16x16xf32, #tpu.memory_space<vmem>>, vector<16x16xf32>
    %cst_465 = arith.constant 0.000000e+00 : f32
    %602 = vector.broadcast %cst_465 : f32 to vector<16x16xf32>
    %603 = arith.select %600, %601, %602 : vector<16x16xi1>, vector<16x16xf32>
    %cst_466 = arith.constant dense<0.000000e+00> : vector<16xf32>
    %604 = vector.multi_reduction <add>, %603, %cst_466 [1] : vector<16x16xf32> to vector<16xf32>
    %605 = vector.shape_cast %604 : vector<16xf32> to vector<16x1xf32>
    %606 = arith.mulf %598, %605 : vector<16x1xf32>
    %c0_467 = arith.constant 0 : index
    %c0_468 = arith.constant 0 : index
    %607 = vector.load %arg10[%c0_467, %c0_468] : memref<16x1xf32, #tpu.memory_space<vmem>>, vector<16x1xf32>
    %608 = arith.maximumf %607, %606 : vector<16x1xf32>
    %c0_469 = arith.constant 0 : index
    %c0_470 = arith.constant 0 : index
    %609 = vector.load %arg10[%c0_469, %c0_470] : memref<16x1xf32, #tpu.memory_space<vmem>>, vector<16x1xf32>
    %610 = arith.subf %609, %608 : vector<16x1xf32>
    %611 = math.exp %610 : vector<16x1xf32>
    %612 = arith.subf %606, %608 : vector<16x1xf32>
    %613 = math.exp %612 : vector<16x1xf32>
    %c0_471 = arith.constant 0 : index
    %c0_472 = arith.constant 0 : index
    %614 = vector.load %arg11[%c0_471, %c0_472] : memref<16x1xf32, #tpu.memory_space<vmem>>, vector<16x1xf32>
    %615 = arith.mulf %611, %614 : vector<16x1xf32>
    %616 = arith.addf %615, %613 : vector<16x1xf32>
    %c0_473 = arith.constant 0 : index
    %c0_474 = arith.constant 0 : index
    %617 = vector.load %arg11[%c0_473, %c0_474] : memref<16x1xf32, #tpu.memory_space<vmem>>, vector<16x1xf32>
    tpu.vector_store %arg11[%c0_473, %c0_474], %616 {strides = array<i32>} : memref<16x1xf32, #tpu.memory_space<vmem>>, vector<16x1xf32>,
    %c0_475 = arith.constant 0 : index
    %c0_476 = arith.constant 0 : index
    %618 = vector.load %arg9[%c0_475, %c0_476] : memref<16x16xf32, #tpu.memory_space<vmem>>, vector<16x16xf32>
    %619 = vector.broadcast %611 : vector<16x1xf32> to vector<16x16xf32>
    %620 = arith.mulf %619, %618 : vector<16x16xf32>
    %cst_477 = arith.constant 0.000000e+00 : f32
    %621 = vector.shape_cast %613 : vector<16x1xf32> to vector<16x1xf32>
    %622 = vector.broadcast %621 : vector<16x1xf32> to vector<16x16xf32>
    %623 = vector.broadcast %cst_477 : f32 to vector<16x16xf32>
    %624 = arith.select %600, %622, %623 : vector<16x16xi1>, vector<16x16xf32>
    %625 = arith.addf %620, %624 : vector<16x16xf32>
    %c0_478 = arith.constant 0 : index
    %c0_479 = arith.constant 0 : index
    %626 = vector.load %arg9[%c0_478, %c0_479] : memref<16x16xf32, #tpu.memory_space<vmem>>, vector<16x16xf32>
    tpu.vector_store %arg9[%c0_478, %c0_479], %625 {strides = array<i32>} : memref<16x16xf32, #tpu.memory_space<vmem>>, vector<16x16xf32>,
    %c0_480 = arith.constant 0 : index
    %c0_481 = arith.constant 0 : index
    %627 = vector.load %arg10[%c0_480, %c0_481] : memref<16x1xf32, #tpu.memory_space<vmem>>, vector<16x1xf32>
    tpu.vector_store %arg10[%c0_480, %c0_481], %608 {strides = array<i32>} : memref<16x1xf32, #tpu.memory_space<vmem>>, vector<16x1xf32>,
    %c0_482 = arith.constant 0 : index
    %c0_483 = arith.constant 0 : index
    %c6_484 = arith.constant 6 : index
    %628 = vector.load %arg2[%c0_482, %c0_483, %c6_484] : memref<1x16x12xi32, #tpu.memory_space<vmem>>, vector<1x16x1xi32>
    %629 = vector.shape_cast %628 : vector<1x16x1xi32> to vector<16x1xi32>
    %c0_485 = arith.constant 0 : index
    %c0_486 = arith.constant 0 : index
    %c6_487 = arith.constant 6 : index
    %630 = vector.load %arg3[%c0_485, %c0_486, %c6_487] : memref<1x16x12xf32, #tpu.memory_space<vmem>>, vector<1x16x1xf32>
    %631 = vector.shape_cast %630 : vector<1x16x1xf32> to vector<16x1xf32>
    %632 = vector.broadcast %629 : vector<16x1xi32> to vector<16x16xi32>
    %633 = arith.cmpi eq, %632, %0 : vector<16x16xi32>
    %c0_488 = arith.constant 0 : index
    %c0_489 = arith.constant 0 : index
    %634 = vector.load %arg8[%c0_488, %c0_489] : memref<16x16xf32, #tpu.memory_space<vmem>>, vector<16x16xf32>
    %cst_490 = arith.constant 0.000000e+00 : f32
    %635 = vector.broadcast %cst_490 : f32 to vector<16x16xf32>
    %636 = arith.select %633, %634, %635 : vector<16x16xi1>, vector<16x16xf32>
    %cst_491 = arith.constant dense<0.000000e+00> : vector<16xf32>
    %637 = vector.multi_reduction <add>, %636, %cst_491 [1] : vector<16x16xf32> to vector<16xf32>
    %638 = vector.shape_cast %637 : vector<16xf32> to vector<16x1xf32>
    %639 = arith.mulf %631, %638 : vector<16x1xf32>
    %c0_492 = arith.constant 0 : index
    %c0_493 = arith.constant 0 : index
    %640 = vector.load %arg10[%c0_492, %c0_493] : memref<16x1xf32, #tpu.memory_space<vmem>>, vector<16x1xf32>
    %641 = arith.maximumf %640, %639 : vector<16x1xf32>
    %c0_494 = arith.constant 0 : index
    %c0_495 = arith.constant 0 : index
    %642 = vector.load %arg10[%c0_494, %c0_495] : memref<16x1xf32, #tpu.memory_space<vmem>>, vector<16x1xf32>
    %643 = arith.subf %642, %641 : vector<16x1xf32>
    %644 = math.exp %643 : vector<16x1xf32>
    %645 = arith.subf %639, %641 : vector<16x1xf32>
    %646 = math.exp %645 : vector<16x1xf32>
    %c0_496 = arith.constant 0 : index
    %c0_497 = arith.constant 0 : index
    %647 = vector.load %arg11[%c0_496, %c0_497] : memref<16x1xf32, #tpu.memory_space<vmem>>, vector<16x1xf32>
    %648 = arith.mulf %644, %647 : vector<16x1xf32>
    %649 = arith.addf %648, %646 : vector<16x1xf32>
    %c0_498 = arith.constant 0 : index
    %c0_499 = arith.constant 0 : index
    %650 = vector.load %arg11[%c0_498, %c0_499] : memref<16x1xf32, #tpu.memory_space<vmem>>, vector<16x1xf32>
    tpu.vector_store %arg11[%c0_498, %c0_499], %649 {strides = array<i32>} : memref<16x1xf32, #tpu.memory_space<vmem>>, vector<16x1xf32>,
    %c0_500 = arith.constant 0 : index
    %c0_501 = arith.constant 0 : index
    %651 = vector.load %arg9[%c0_500, %c0_501] : memref<16x16xf32, #tpu.memory_space<vmem>>, vector<16x16xf32>
    %652 = vector.broadcast %644 : vector<16x1xf32> to vector<16x16xf32>
    %653 = arith.mulf %652, %651 : vector<16x16xf32>
    %cst_502 = arith.constant 0.000000e+00 : f32
    %654 = vector.shape_cast %646 : vector<16x1xf32> to vector<16x1xf32>
    %655 = vector.broadcast %654 : vector<16x1xf32> to vector<16x16xf32>
    %656 = vector.broadcast %cst_502 : f32 to vector<16x16xf32>
    %657 = arith.select %633, %655, %656 : vector<16x16xi1>, vector<16x16xf32>
    %658 = arith.addf %653, %657 : vector<16x16xf32>
    %c0_503 = arith.constant 0 : index
    %c0_504 = arith.constant 0 : index
    %659 = vector.load %arg9[%c0_503, %c0_504] : memref<16x16xf32, #tpu.memory_space<vmem>>, vector<16x16xf32>
    tpu.vector_store %arg9[%c0_503, %c0_504], %658 {strides = array<i32>} : memref<16x16xf32, #tpu.memory_space<vmem>>, vector<16x16xf32>,
    %c0_505 = arith.constant 0 : index
    %c0_506 = arith.constant 0 : index
    %660 = vector.load %arg10[%c0_505, %c0_506] : memref<16x1xf32, #tpu.memory_space<vmem>>, vector<16x1xf32>
    tpu.vector_store %arg10[%c0_505, %c0_506], %641 {strides = array<i32>} : memref<16x1xf32, #tpu.memory_space<vmem>>, vector<16x1xf32>,
    %c0_507 = arith.constant 0 : index
    %c0_508 = arith.constant 0 : index
    %c7_509 = arith.constant 7 : index
    %661 = vector.load %arg2[%c0_507, %c0_508, %c7_509] : memref<1x16x12xi32, #tpu.memory_space<vmem>>, vector<1x16x1xi32>
    %662 = vector.shape_cast %661 : vector<1x16x1xi32> to vector<16x1xi32>
    %c0_510 = arith.constant 0 : index
    %c0_511 = arith.constant 0 : index
    %c7_512 = arith.constant 7 : index
    %663 = vector.load %arg3[%c0_510, %c0_511, %c7_512] : memref<1x16x12xf32, #tpu.memory_space<vmem>>, vector<1x16x1xf32>
    %664 = vector.shape_cast %663 : vector<1x16x1xf32> to vector<16x1xf32>
    %665 = vector.broadcast %662 : vector<16x1xi32> to vector<16x16xi32>
    %666 = arith.cmpi eq, %665, %0 : vector<16x16xi32>
    %c0_513 = arith.constant 0 : index
    %c0_514 = arith.constant 0 : index
    %667 = vector.load %arg8[%c0_513, %c0_514] : memref<16x16xf32, #tpu.memory_space<vmem>>, vector<16x16xf32>
    %cst_515 = arith.constant 0.000000e+00 : f32
    %668 = vector.broadcast %cst_515 : f32 to vector<16x16xf32>
    %669 = arith.select %666, %667, %668 : vector<16x16xi1>, vector<16x16xf32>
    %cst_516 = arith.constant dense<0.000000e+00> : vector<16xf32>
    %670 = vector.multi_reduction <add>, %669, %cst_516 [1] : vector<16x16xf32> to vector<16xf32>
    %671 = vector.shape_cast %670 : vector<16xf32> to vector<16x1xf32>
    %672 = arith.mulf %664, %671 : vector<16x1xf32>
    %c0_517 = arith.constant 0 : index
    %c0_518 = arith.constant 0 : index
    %673 = vector.load %arg10[%c0_517, %c0_518] : memref<16x1xf32, #tpu.memory_space<vmem>>, vector<16x1xf32>
    %674 = arith.maximumf %673, %672 : vector<16x1xf32>
    %c0_519 = arith.constant 0 : index
    %c0_520 = arith.constant 0 : index
    %675 = vector.load %arg10[%c0_519, %c0_520] : memref<16x1xf32, #tpu.memory_space<vmem>>, vector<16x1xf32>
    %676 = arith.subf %675, %674 : vector<16x1xf32>
    %677 = math.exp %676 : vector<16x1xf32>
    %678 = arith.subf %672, %674 : vector<16x1xf32>
    %679 = math.exp %678 : vector<16x1xf32>
    %c0_521 = arith.constant 0 : index
    %c0_522 = arith.constant 0 : index
    %680 = vector.load %arg11[%c0_521, %c0_522] : memref<16x1xf32, #tpu.memory_space<vmem>>, vector<16x1xf32>
    %681 = arith.mulf %677, %680 : vector<16x1xf32>
    %682 = arith.addf %681, %679 : vector<16x1xf32>
    %c0_523 = arith.constant 0 : index
    %c0_524 = arith.constant 0 : index
    %683 = vector.load %arg11[%c0_523, %c0_524] : memref<16x1xf32, #tpu.memory_space<vmem>>, vector<16x1xf32>
    tpu.vector_store %arg11[%c0_523, %c0_524], %682 {strides = array<i32>} : memref<16x1xf32, #tpu.memory_space<vmem>>, vector<16x1xf32>,
    %c0_525 = arith.constant 0 : index
    %c0_526 = arith.constant 0 : index
    %684 = vector.load %arg9[%c0_525, %c0_526] : memref<16x16xf32, #tpu.memory_space<vmem>>, vector<16x16xf32>
    %685 = vector.broadcast %677 : vector<16x1xf32> to vector<16x16xf32>
    %686 = arith.mulf %685, %684 : vector<16x16xf32>
    %cst_527 = arith.constant 0.000000e+00 : f32
    %687 = vector.shape_cast %679 : vector<16x1xf32> to vector<16x1xf32>
    %688 = vector.broadcast %687 : vector<16x1xf32> to vector<16x16xf32>
    %689 = vector.broadcast %cst_527 : f32 to vector<16x16xf32>
    %690 = arith.select %666, %688, %689 : vector<16x16xi1>, vector<16x16xf32>
    %691 = arith.addf %686, %690 : vector<16x16xf32>
    %c0_528 = arith.constant 0 : index
    %c0_529 = arith.constant 0 : index
    %692 = vector.load %arg9[%c0_528, %c0_529] : memref<16x16xf32, #tpu.memory_space<vmem>>, vector<16x16xf32>
    tpu.vector_store %arg9[%c0_528, %c0_529], %691 {strides = array<i32>} : memref<16x16xf32, #tpu.memory_space<vmem>>, vector<16x16xf32>,
    %c0_530 = arith.constant 0 : index
    %c0_531 = arith.constant 0 : index
    %693 = vector.load %arg10[%c0_530, %c0_531] : memref<16x1xf32, #tpu.memory_space<vmem>>, vector<16x1xf32>
    tpu.vector_store %arg10[%c0_530, %c0_531], %674 {strides = array<i32>} : memref<16x1xf32, #tpu.memory_space<vmem>>, vector<16x1xf32>,
    %c0_532 = arith.constant 0 : index
    %c0_533 = arith.constant 0 : index
    %c8_534 = arith.constant 8 : index
    %694 = vector.load %arg2[%c0_532, %c0_533, %c8_534] : memref<1x16x12xi32, #tpu.memory_space<vmem>>, vector<1x16x1xi32>
    %695 = vector.shape_cast %694 : vector<1x16x1xi32> to vector<16x1xi32>
    %c0_535 = arith.constant 0 : index
    %c0_536 = arith.constant 0 : index
    %c8_537 = arith.constant 8 : index
    %696 = vector.load %arg3[%c0_535, %c0_536, %c8_537] : memref<1x16x12xf32, #tpu.memory_space<vmem>>, vector<1x16x1xf32>
    %697 = vector.shape_cast %696 : vector<1x16x1xf32> to vector<16x1xf32>
    %698 = vector.broadcast %695 : vector<16x1xi32> to vector<16x16xi32>
    %699 = arith.cmpi eq, %698, %0 : vector<16x16xi32>
    %c0_538 = arith.constant 0 : index
    %c0_539 = arith.constant 0 : index
    %700 = vector.load %arg8[%c0_538, %c0_539] : memref<16x16xf32, #tpu.memory_space<vmem>>, vector<16x16xf32>
    %cst_540 = arith.constant 0.000000e+00 : f32
    %701 = vector.broadcast %cst_540 : f32 to vector<16x16xf32>
    %702 = arith.select %699, %700, %701 : vector<16x16xi1>, vector<16x16xf32>
    %cst_541 = arith.constant dense<0.000000e+00> : vector<16xf32>
    %703 = vector.multi_reduction <add>, %702, %cst_541 [1] : vector<16x16xf32> to vector<16xf32>
    %704 = vector.shape_cast %703 : vector<16xf32> to vector<16x1xf32>
    %705 = arith.mulf %697, %704 : vector<16x1xf32>
    %c0_542 = arith.constant 0 : index
    %c0_543 = arith.constant 0 : index
    %706 = vector.load %arg10[%c0_542, %c0_543] : memref<16x1xf32, #tpu.memory_space<vmem>>, vector<16x1xf32>
    %707 = arith.maximumf %706, %705 : vector<16x1xf32>
    %c0_544 = arith.constant 0 : index
    %c0_545 = arith.constant 0 : index
    %708 = vector.load %arg10[%c0_544, %c0_545] : memref<16x1xf32, #tpu.memory_space<vmem>>, vector<16x1xf32>
    %709 = arith.subf %708, %707 : vector<16x1xf32>
    %710 = math.exp %709 : vector<16x1xf32>
    %711 = arith.subf %705, %707 : vector<16x1xf32>
    %712 = math.exp %711 : vector<16x1xf32>
    %c0_546 = arith.constant 0 : index
    %c0_547 = arith.constant 0 : index
    %713 = vector.load %arg11[%c0_546, %c0_547] : memref<16x1xf32, #tpu.memory_space<vmem>>, vector<16x1xf32>
    %714 = arith.mulf %710, %713 : vector<16x1xf32>
    %715 = arith.addf %714, %712 : vector<16x1xf32>
    %c0_548 = arith.constant 0 : index
    %c0_549 = arith.constant 0 : index
    %716 = vector.load %arg11[%c0_548, %c0_549] : memref<16x1xf32, #tpu.memory_space<vmem>>, vector<16x1xf32>
    tpu.vector_store %arg11[%c0_548, %c0_549], %715 {strides = array<i32>} : memref<16x1xf32, #tpu.memory_space<vmem>>, vector<16x1xf32>,
    %c0_550 = arith.constant 0 : index
    %c0_551 = arith.constant 0 : index
    %717 = vector.load %arg9[%c0_550, %c0_551] : memref<16x16xf32, #tpu.memory_space<vmem>>, vector<16x16xf32>
    %718 = vector.broadcast %710 : vector<16x1xf32> to vector<16x16xf32>
    %719 = arith.mulf %718, %717 : vector<16x16xf32>
    %cst_552 = arith.constant 0.000000e+00 : f32
    %720 = vector.shape_cast %712 : vector<16x1xf32> to vector<16x1xf32>
    %721 = vector.broadcast %720 : vector<16x1xf32> to vector<16x16xf32>
    %722 = vector.broadcast %cst_552 : f32 to vector<16x16xf32>
    %723 = arith.select %699, %721, %722 : vector<16x16xi1>, vector<16x16xf32>
    %724 = arith.addf %719, %723 : vector<16x16xf32>
    %c0_553 = arith.constant 0 : index
    %c0_554 = arith.constant 0 : index
    %725 = vector.load %arg9[%c0_553, %c0_554] : memref<16x16xf32, #tpu.memory_space<vmem>>, vector<16x16xf32>
    tpu.vector_store %arg9[%c0_553, %c0_554], %724 {strides = array<i32>} : memref<16x16xf32, #tpu.memory_space<vmem>>, vector<16x16xf32>,
    %c0_555 = arith.constant 0 : index
    %c0_556 = arith.constant 0 : index
    %726 = vector.load %arg10[%c0_555, %c0_556] : memref<16x1xf32, #tpu.memory_space<vmem>>, vector<16x1xf32>
    tpu.vector_store %arg10[%c0_555, %c0_556], %707 {strides = array<i32>} : memref<16x1xf32, #tpu.memory_space<vmem>>, vector<16x1xf32>,
    %c0_557 = arith.constant 0 : index
    %c0_558 = arith.constant 0 : index
    %c9_559 = arith.constant 9 : index
    %727 = vector.load %arg2[%c0_557, %c0_558, %c9_559] : memref<1x16x12xi32, #tpu.memory_space<vmem>>, vector<1x16x1xi32>
    %728 = vector.shape_cast %727 : vector<1x16x1xi32> to vector<16x1xi32>
    %c0_560 = arith.constant 0 : index
    %c0_561 = arith.constant 0 : index
    %c9_562 = arith.constant 9 : index
    %729 = vector.load %arg3[%c0_560, %c0_561, %c9_562] : memref<1x16x12xf32, #tpu.memory_space<vmem>>, vector<1x16x1xf32>
    %730 = vector.shape_cast %729 : vector<1x16x1xf32> to vector<16x1xf32>
    %731 = vector.broadcast %728 : vector<16x1xi32> to vector<16x16xi32>
    %732 = arith.cmpi eq, %731, %0 : vector<16x16xi32>
    %c0_563 = arith.constant 0 : index
    %c0_564 = arith.constant 0 : index
    %733 = vector.load %arg8[%c0_563, %c0_564] : memref<16x16xf32, #tpu.memory_space<vmem>>, vector<16x16xf32>
    %cst_565 = arith.constant 0.000000e+00 : f32
    %734 = vector.broadcast %cst_565 : f32 to vector<16x16xf32>
    %735 = arith.select %732, %733, %734 : vector<16x16xi1>, vector<16x16xf32>
    %cst_566 = arith.constant dense<0.000000e+00> : vector<16xf32>
    %736 = vector.multi_reduction <add>, %735, %cst_566 [1] : vector<16x16xf32> to vector<16xf32>
    %737 = vector.shape_cast %736 : vector<16xf32> to vector<16x1xf32>
    %738 = arith.mulf %730, %737 : vector<16x1xf32>
    %c0_567 = arith.constant 0 : index
    %c0_568 = arith.constant 0 : index
    %739 = vector.load %arg10[%c0_567, %c0_568] : memref<16x1xf32, #tpu.memory_space<vmem>>, vector<16x1xf32>
    %740 = arith.maximumf %739, %738 : vector<16x1xf32>
    %c0_569 = arith.constant 0 : index
    %c0_570 = arith.constant 0 : index
    %741 = vector.load %arg10[%c0_569, %c0_570] : memref<16x1xf32, #tpu.memory_space<vmem>>, vector<16x1xf32>
    %742 = arith.subf %741, %740 : vector<16x1xf32>
    %743 = math.exp %742 : vector<16x1xf32>
    %744 = arith.subf %738, %740 : vector<16x1xf32>
    %745 = math.exp %744 : vector<16x1xf32>
    %c0_571 = arith.constant 0 : index
    %c0_572 = arith.constant 0 : index
    %746 = vector.load %arg11[%c0_571, %c0_572] : memref<16x1xf32, #tpu.memory_space<vmem>>, vector<16x1xf32>
    %747 = arith.mulf %743, %746 : vector<16x1xf32>
    %748 = arith.addf %747, %745 : vector<16x1xf32>
    %c0_573 = arith.constant 0 : index
    %c0_574 = arith.constant 0 : index
    %749 = vector.load %arg11[%c0_573, %c0_574] : memref<16x1xf32, #tpu.memory_space<vmem>>, vector<16x1xf32>
    tpu.vector_store %arg11[%c0_573, %c0_574], %748 {strides = array<i32>} : memref<16x1xf32, #tpu.memory_space<vmem>>, vector<16x1xf32>,
    %c0_575 = arith.constant 0 : index
    %c0_576 = arith.constant 0 : index
    %750 = vector.load %arg9[%c0_575, %c0_576] : memref<16x16xf32, #tpu.memory_space<vmem>>, vector<16x16xf32>
    %751 = vector.broadcast %743 : vector<16x1xf32> to vector<16x16xf32>
    %752 = arith.mulf %751, %750 : vector<16x16xf32>
    %cst_577 = arith.constant 0.000000e+00 : f32
    %753 = vector.shape_cast %745 : vector<16x1xf32> to vector<16x1xf32>
    %754 = vector.broadcast %753 : vector<16x1xf32> to vector<16x16xf32>
    %755 = vector.broadcast %cst_577 : f32 to vector<16x16xf32>
    %756 = arith.select %732, %754, %755 : vector<16x16xi1>, vector<16x16xf32>
    %757 = arith.addf %752, %756 : vector<16x16xf32>
    %c0_578 = arith.constant 0 : index
    %c0_579 = arith.constant 0 : index
    %758 = vector.load %arg9[%c0_578, %c0_579] : memref<16x16xf32, #tpu.memory_space<vmem>>, vector<16x16xf32>
    tpu.vector_store %arg9[%c0_578, %c0_579], %757 {strides = array<i32>} : memref<16x16xf32, #tpu.memory_space<vmem>>, vector<16x16xf32>,
    %c0_580 = arith.constant 0 : index
    %c0_581 = arith.constant 0 : index
    %759 = vector.load %arg10[%c0_580, %c0_581] : memref<16x1xf32, #tpu.memory_space<vmem>>, vector<16x1xf32>
    tpu.vector_store %arg10[%c0_580, %c0_581], %740 {strides = array<i32>} : memref<16x1xf32, #tpu.memory_space<vmem>>, vector<16x1xf32>,
    %c0_582 = arith.constant 0 : index
    %c0_583 = arith.constant 0 : index
    %c10_584 = arith.constant 10 : index
    %760 = vector.load %arg2[%c0_582, %c0_583, %c10_584] : memref<1x16x12xi32, #tpu.memory_space<vmem>>, vector<1x16x1xi32>
    %761 = vector.shape_cast %760 : vector<1x16x1xi32> to vector<16x1xi32>
    %c0_585 = arith.constant 0 : index
    %c0_586 = arith.constant 0 : index
    %c10_587 = arith.constant 10 : index
    %762 = vector.load %arg3[%c0_585, %c0_586, %c10_587] : memref<1x16x12xf32, #tpu.memory_space<vmem>>, vector<1x16x1xf32>
    %763 = vector.shape_cast %762 : vector<1x16x1xf32> to vector<16x1xf32>
    %764 = vector.broadcast %761 : vector<16x1xi32> to vector<16x16xi32>
    %765 = arith.cmpi eq, %764, %0 : vector<16x16xi32>
    %c0_588 = arith.constant 0 : index
    %c0_589 = arith.constant 0 : index
    %766 = vector.load %arg8[%c0_588, %c0_589] : memref<16x16xf32, #tpu.memory_space<vmem>>, vector<16x16xf32>
    %cst_590 = arith.constant 0.000000e+00 : f32
    %767 = vector.broadcast %cst_590 : f32 to vector<16x16xf32>
    %768 = arith.select %765, %766, %767 : vector<16x16xi1>, vector<16x16xf32>
    %cst_591 = arith.constant dense<0.000000e+00> : vector<16xf32>
    %769 = vector.multi_reduction <add>, %768, %cst_591 [1] : vector<16x16xf32> to vector<16xf32>
    %770 = vector.shape_cast %769 : vector<16xf32> to vector<16x1xf32>
    %771 = arith.mulf %763, %770 : vector<16x1xf32>
    %c0_592 = arith.constant 0 : index
    %c0_593 = arith.constant 0 : index
    %772 = vector.load %arg10[%c0_592, %c0_593] : memref<16x1xf32, #tpu.memory_space<vmem>>, vector<16x1xf32>
    %773 = arith.maximumf %772, %771 : vector<16x1xf32>
    %c0_594 = arith.constant 0 : index
    %c0_595 = arith.constant 0 : index
    %774 = vector.load %arg10[%c0_594, %c0_595] : memref<16x1xf32, #tpu.memory_space<vmem>>, vector<16x1xf32>
    %775 = arith.subf %774, %773 : vector<16x1xf32>
    %776 = math.exp %775 : vector<16x1xf32>
    %777 = arith.subf %771, %773 : vector<16x1xf32>
    %778 = math.exp %777 : vector<16x1xf32>
    %c0_596 = arith.constant 0 : index
    %c0_597 = arith.constant 0 : index
    %779 = vector.load %arg11[%c0_596, %c0_597] : memref<16x1xf32, #tpu.memory_space<vmem>>, vector<16x1xf32>
    %780 = arith.mulf %776, %779 : vector<16x1xf32>
    %781 = arith.addf %780, %778 : vector<16x1xf32>
    %c0_598 = arith.constant 0 : index
    %c0_599 = arith.constant 0 : index
    %782 = vector.load %arg11[%c0_598, %c0_599] : memref<16x1xf32, #tpu.memory_space<vmem>>, vector<16x1xf32>
    tpu.vector_store %arg11[%c0_598, %c0_599], %781 {strides = array<i32>} : memref<16x1xf32, #tpu.memory_space<vmem>>, vector<16x1xf32>,
    %c0_600 = arith.constant 0 : index
    %c0_601 = arith.constant 0 : index
    %783 = vector.load %arg9[%c0_600, %c0_601] : memref<16x16xf32, #tpu.memory_space<vmem>>, vector<16x16xf32>
    %784 = vector.broadcast %776 : vector<16x1xf32> to vector<16x16xf32>
    %785 = arith.mulf %784, %783 : vector<16x16xf32>
    %cst_602 = arith.constant 0.000000e+00 : f32
    %786 = vector.shape_cast %778 : vector<16x1xf32> to vector<16x1xf32>
    %787 = vector.broadcast %786 : vector<16x1xf32> to vector<16x16xf32>
    %788 = vector.broadcast %cst_602 : f32 to vector<16x16xf32>
    %789 = arith.select %765, %787, %788 : vector<16x16xi1>, vector<16x16xf32>
    %790 = arith.addf %785, %789 : vector<16x16xf32>
    %c0_603 = arith.constant 0 : index
    %c0_604 = arith.constant 0 : index
    %791 = vector.load %arg9[%c0_603, %c0_604] : memref<16x16xf32, #tpu.memory_space<vmem>>, vector<16x16xf32>
    tpu.vector_store %arg9[%c0_603, %c0_604], %790 {strides = array<i32>} : memref<16x16xf32, #tpu.memory_space<vmem>>, vector<16x16xf32>,
    %c0_605 = arith.constant 0 : index
    %c0_606 = arith.constant 0 : index
    %792 = vector.load %arg10[%c0_605, %c0_606] : memref<16x1xf32, #tpu.memory_space<vmem>>, vector<16x1xf32>
    tpu.vector_store %arg10[%c0_605, %c0_606], %773 {strides = array<i32>} : memref<16x1xf32, #tpu.memory_space<vmem>>, vector<16x1xf32>,
    %c0_607 = arith.constant 0 : index
    %c0_608 = arith.constant 0 : index
    %c11_609 = arith.constant 11 : index
    %793 = vector.load %arg2[%c0_607, %c0_608, %c11_609] : memref<1x16x12xi32, #tpu.memory_space<vmem>>, vector<1x16x1xi32>
    %794 = vector.shape_cast %793 : vector<1x16x1xi32> to vector<16x1xi32>
    %c0_610 = arith.constant 0 : index
    %c0_611 = arith.constant 0 : index
    %c11_612 = arith.constant 11 : index
    %795 = vector.load %arg3[%c0_610, %c0_611, %c11_612] : memref<1x16x12xf32, #tpu.memory_space<vmem>>, vector<1x16x1xf32>
    %796 = vector.shape_cast %795 : vector<1x16x1xf32> to vector<16x1xf32>
    %797 = vector.broadcast %794 : vector<16x1xi32> to vector<16x16xi32>
    %798 = arith.cmpi eq, %797, %0 : vector<16x16xi32>
    %c0_613 = arith.constant 0 : index
    %c0_614 = arith.constant 0 : index
    %799 = vector.load %arg8[%c0_613, %c0_614] : memref<16x16xf32, #tpu.memory_space<vmem>>, vector<16x16xf32>
    %cst_615 = arith.constant 0.000000e+00 : f32
    %800 = vector.broadcast %cst_615 : f32 to vector<16x16xf32>
    %801 = arith.select %798, %799, %800 : vector<16x16xi1>, vector<16x16xf32>
    %cst_616 = arith.constant dense<0.000000e+00> : vector<16xf32>
    %802 = vector.multi_reduction <add>, %801, %cst_616 [1] : vector<16x16xf32> to vector<16xf32>
    %803 = vector.shape_cast %802 : vector<16xf32> to vector<16x1xf32>
    %804 = arith.mulf %796, %803 : vector<16x1xf32>
    %c0_617 = arith.constant 0 : index
    %c0_618 = arith.constant 0 : index
    %805 = vector.load %arg10[%c0_617, %c0_618] : memref<16x1xf32, #tpu.memory_space<vmem>>, vector<16x1xf32>
    %806 = arith.maximumf %805, %804 : vector<16x1xf32>
    %c0_619 = arith.constant 0 : index
    %c0_620 = arith.constant 0 : index
    %807 = vector.load %arg10[%c0_619, %c0_620] : memref<16x1xf32, #tpu.memory_space<vmem>>, vector<16x1xf32>
    %808 = arith.subf %807, %806 : vector<16x1xf32>
    %809 = math.exp %808 : vector<16x1xf32>
    %810 = arith.subf %804, %806 : vector<16x1xf32>
    %811 = math.exp %810 : vector<16x1xf32>
    %c0_621 = arith.constant 0 : index
    %c0_622 = arith.constant 0 : index
    %812 = vector.load %arg11[%c0_621, %c0_622] : memref<16x1xf32, #tpu.memory_space<vmem>>, vector<16x1xf32>
    %813 = arith.mulf %809, %812 : vector<16x1xf32>
    %814 = arith.addf %813, %811 : vector<16x1xf32>
    %c0_623 = arith.constant 0 : index
    %c0_624 = arith.constant 0 : index
    %815 = vector.load %arg11[%c0_623, %c0_624] : memref<16x1xf32, #tpu.memory_space<vmem>>, vector<16x1xf32>
    tpu.vector_store %arg11[%c0_623, %c0_624], %814 {strides = array<i32>} : memref<16x1xf32, #tpu.memory_space<vmem>>, vector<16x1xf32>,
    %c0_625 = arith.constant 0 : index
    %c0_626 = arith.constant 0 : index
    %816 = vector.load %arg9[%c0_625, %c0_626] : memref<16x16xf32, #tpu.memory_space<vmem>>, vector<16x16xf32>
    %817 = vector.broadcast %809 : vector<16x1xf32> to vector<16x16xf32>
    %818 = arith.mulf %817, %816 : vector<16x16xf32>
    %cst_627 = arith.constant 0.000000e+00 : f32
    %819 = vector.shape_cast %811 : vector<16x1xf32> to vector<16x1xf32>
    %820 = vector.broadcast %819 : vector<16x1xf32> to vector<16x16xf32>
    %821 = vector.broadcast %cst_627 : f32 to vector<16x16xf32>
    %822 = arith.select %798, %820, %821 : vector<16x16xi1>, vector<16x16xf32>
    %823 = arith.addf %818, %822 : vector<16x16xf32>
    %c0_628 = arith.constant 0 : index
    %c0_629 = arith.constant 0 : index
    %824 = vector.load %arg9[%c0_628, %c0_629] : memref<16x16xf32, #tpu.memory_space<vmem>>, vector<16x16xf32>
    tpu.vector_store %arg9[%c0_628, %c0_629], %823 {strides = array<i32>} : memref<16x16xf32, #tpu.memory_space<vmem>>, vector<16x16xf32>,
    %c0_630 = arith.constant 0 : index
    %c0_631 = arith.constant 0 : index
    %825 = vector.load %arg10[%c0_630, %c0_631] : memref<16x1xf32, #tpu.memory_space<vmem>>, vector<16x1xf32>
    tpu.vector_store %arg10[%c0_630, %c0_631], %806 {strides = array<i32>} : memref<16x1xf32, #tpu.memory_space<vmem>>, vector<16x1xf32>,
    %c0_632 = arith.constant 0 : index
    %c0_633 = arith.constant 0 : index
    %c16_634 = arith.constant 16 : index
    %826 = vector.load %arg6[%c0_632, %c0_633, %c16_634] : memref<1x16x32xbf16, #tpu.memory_space<vmem>>, vector<1x16x16xbf16>
    %827 = vector.shape_cast %826 : vector<1x16x16xbf16> to vector<16x16xbf16>
    %c0_635 = arith.constant 0 : index
    %c0_636 = arith.constant 0 : index
    %828 = vector.load %arg9[%c0_635, %c0_636] : memref<16x16xf32, #tpu.memory_space<vmem>>, vector<16x16xf32>
    %829 = arith.truncf %828 : vector<16x16xf32> to vector<16x16xbf16>
    %cst_637 = arith.constant dense<0.000000e+00> : vector<16x16xf32>
    %830 = tpu.matmul %829, %827, %cst_637 {dimension_numbers = #tpu.dot_dimension_numbers<[1], [0], [0], [1], [0, 0, 1, 1], [], []>} : vector<16x16xbf16>, vector<16x16xbf16>, vector<16x16xf32> -> vector<16x16xf32>
    %c0_638 = arith.constant 0 : index
    %c0_639 = arith.constant 0 : index
    %831 = vector.load %arg11[%c0_638, %c0_639] : memref<16x1xf32, #tpu.memory_space<vmem>>, vector<16x1xf32>
    %832 = vector.broadcast %831 : vector<16x1xf32> to vector<16x16xf32>
    %833 = arith.divf %830, %832 : vector<16x16xf32>
    %c0_640 = arith.constant 0 : index
    %c16_641 = arith.constant 16 : index
    %834 = vector.load %arg12[%c0_640, %c16_641] : memref<16x32xf32, #tpu.memory_space<vmem>>, vector<16x16xf32>
    tpu.vector_store %arg12[%c0_640, %c16_641], %833 {strides = array<i32>} : memref<16x32xf32, #tpu.memory_space<vmem>>, vector<16x16xf32>,
    %c0_642 = arith.constant 0 : index
    %c0_643 = arith.constant 0 : index
    %835 = vector.load %arg12[%c0_642, %c0_643] : memref<16x32xf32, #tpu.memory_space<vmem>>, vector<16x32xf32>
    %c0_644 = arith.constant 0 : index
    %c0_645 = arith.constant 0 : index
    %c0_646 = arith.constant 0 : index
    %836 = vector.load %arg7[%c0_644, %c0_645, %c0_646] : memref<1x16x32xf32, #tpu.memory_space<vmem>>, vector<1x16x32xf32>
    %837 = vector.shape_cast %836 : vector<1x16x32xf32> to vector<16x32xf32>
    %838 = vector.shape_cast %835 : vector<16x32xf32> to vector<1x16x32xf32>
    tpu.vector_store %arg7[%c0_644, %c0_645, %c0_646], %838 {strides = array<i32>} : memref<1x16x32xf32, #tpu.memory_space<vmem>>, vector<1x16x32xf32>,
    return
  }
  func.func @transform_0(%arg0: i32, %arg1: i32) -> (i32, i32, i32) {
    %c0_i32 = arith.constant 0 : i32
    %c0_i32_0 = arith.constant 0 : i32
    return %arg0, %arg1, %c0_i32 : i32, i32, i32
  }
  func.func @transform_1(%arg0: i32, %arg1: i32) -> (i32, i32, i32) {
    %c0_i32 = arith.constant 0 : i32
    %c0_i32_0 = arith.constant 0 : i32
    return %arg0, %arg1, %c0_i32 : i32, i32, i32
  }
  func.func @transform_2(%arg0: i32, %arg1: i32) -> (i32, i32, i32) {
    %c0_i32 = arith.constant 0 : i32
    %c0_i32_0 = arith.constant 0 : i32
    return %arg0, %arg1, %c0_i32 : i32, i32, i32
  }
  func.func @transform_3(%arg0: i32, %arg1: i32) -> (i32, i32, i32) {
    %c0_i32 = arith.constant 0 : i32
    %c0_i32_0 = arith.constant 0 : i32
    %c0_i32_1 = arith.constant 0 : i32
    return %arg0, %c0_i32, %c0_i32_0 : i32, i32, i32
  }
  func.func @transform_4(%arg0: i32, %arg1: i32) -> (i32, i32, i32) {
    %c0_i32 = arith.constant 0 : i32
    %c0_i32_0 = arith.constant 0 : i32
    %c0_i32_1 = arith.constant 0 : i32
    return %arg0, %c0_i32, %c0_i32_0 : i32, i32, i32
  }
  func.func @transform_5(%arg0: i32, %arg1: i32) -> (i32, i32, i32) {
    %c0_i32 = arith.constant 0 : i32
    %c0_i32_0 = arith.constant 0 : i32
    return %arg0, %arg1, %c0_i32 : i32, i32, i32
  }
}

module attributes {stable_mosaic.version = 11 : i64} {
  func.func @_linear_bias_kernel(%arg0: i32, %arg1: i32, %arg2: i32, %arg3: memref<32x32xbf16, #tpu.memory_space<vmem>>, %arg4: memref<32x16xbf16, #tpu.memory_space<vmem>>, %arg5: memref<1x16xf32, #tpu.memory_space<vmem>>, %arg6: memref<32x16xf32, #tpu.memory_space<vmem>>, %arg7: memref<32x16xf32, #tpu.memory_space<vmem>>) attributes {dimension_semantics = [#tpu.dimension_semantics<parallel>, #tpu.dimension_semantics<parallel>, #tpu.dimension_semantics<arbitrary>], iteration_bounds = array<i64: 1, 1, 1>, scalar_prefetch = 0 : i64, scratch_operands = 1 : i64, tpu.core_type = #tpu.core_type<tc>, window_params = [{transform_indices = @transform_0, window_bounds = array<i64: 32, 32>}, {transform_indices = @transform_1, window_bounds = array<i64: 32, 16>}, {transform_indices = @transform_2, window_bounds = array<i64: 1, 16>}, {transform_indices = @transform_3, window_bounds = array<i64: 32, 16>}]} {
    %c0_i32 = arith.constant 0 : i32
    %0 = arith.cmpi eq, %arg2, %c0_i32 : i32
    %1 = arith.extui %0 : i1 to i32
    %c0_i32_0 = arith.constant 0 : i32
    %2 = arith.cmpi ne, %1, %c0_i32_0 : i32
    scf.if %2 {
      %cst_10 = arith.constant 0.000000e+00 : f32
      %12 = vector.broadcast %cst_10 : f32 to vector<32x16xf32>
      %c0_11 = arith.constant 0 : index
      %c0_12 = arith.constant 0 : index
      %13 = vector.load %arg7[%c0_11, %c0_12] : memref<32x16xf32, #tpu.memory_space<vmem>>, vector<32x16xf32>
      tpu.vector_store %arg7[%c0_11, %c0_12], %12 {strides = array<i32>} : memref<32x16xf32, #tpu.memory_space<vmem>>, vector<32x16xf32>,
    } else {
    }
    %c0 = arith.constant 0 : index
    %c0_1 = arith.constant 0 : index
    %3 = vector.load %arg7[%c0, %c0_1] : memref<32x16xf32, #tpu.memory_space<vmem>>, vector<32x16xf32>
    %c0_2 = arith.constant 0 : index
    %c0_3 = arith.constant 0 : index
    %4 = vector.load %arg3[%c0_2, %c0_3] : memref<32x32xbf16, #tpu.memory_space<vmem>>, vector<32x32xbf16>
    %c0_4 = arith.constant 0 : index
    %c0_5 = arith.constant 0 : index
    %5 = vector.load %arg4[%c0_4, %c0_5] : memref<32x16xbf16, #tpu.memory_space<vmem>>, vector<32x16xbf16>
    %cst = arith.constant dense<0.000000e+00> : vector<32x16xf32>
    %6 = tpu.matmul %4, %5, %cst {dimension_numbers = #tpu.dot_dimension_numbers<[1], [0], [0], [1], [0, 0, 1, 1], [], []>} : vector<32x32xbf16>, vector<32x16xbf16>, vector<32x16xf32> -> vector<32x16xf32>
    %7 = arith.addf %3, %6 : vector<32x16xf32>
    %c0_6 = arith.constant 0 : index
    %c0_7 = arith.constant 0 : index
    %8 = vector.load %arg7[%c0_6, %c0_7] : memref<32x16xf32, #tpu.memory_space<vmem>>, vector<32x16xf32>
    tpu.vector_store %arg7[%c0_6, %c0_7], %7 {strides = array<i32>} : memref<32x16xf32, #tpu.memory_space<vmem>>, vector<32x16xf32>,
    %c0_i32_8 = arith.constant 0 : i32
    %9 = arith.cmpi eq, %arg2, %c0_i32_8 : i32
    %10 = arith.extui %9 : i1 to i32
    %c0_i32_9 = arith.constant 0 : i32
    %11 = arith.cmpi ne, %10, %c0_i32_9 : i32
    scf.if %11 {
      %c0_10 = arith.constant 0 : index
      %c0_11 = arith.constant 0 : index
      %12 = vector.load %arg7[%c0_10, %c0_11] : memref<32x16xf32, #tpu.memory_space<vmem>>, vector<32x16xf32>
      %c0_12 = arith.constant 0 : index
      %c0_13 = arith.constant 0 : index
      %13 = vector.load %arg5[%c0_12, %c0_13] : memref<1x16xf32, #tpu.memory_space<vmem>>, vector<1x16xf32>
      %14 = vector.broadcast %13 : vector<1x16xf32> to vector<32x16xf32>
      %15 = arith.addf %12, %14 : vector<32x16xf32>
      %c0_14 = arith.constant 0 : index
      %c0_15 = arith.constant 0 : index
      %16 = vector.load %arg6[%c0_14, %c0_15] : memref<32x16xf32, #tpu.memory_space<vmem>>, vector<32x16xf32>
      tpu.vector_store %arg6[%c0_14, %c0_15], %15 {strides = array<i32>} : memref<32x16xf32, #tpu.memory_space<vmem>>, vector<32x16xf32>,
    } else {
    }
    return
  }
  func.func @transform_0(%arg0: i32, %arg1: i32, %arg2: i32) -> (i32, i32) {
    %c0_i32 = arith.constant 0 : i32
    return %arg0, %arg2 : i32, i32
  }
  func.func @transform_1(%arg0: i32, %arg1: i32, %arg2: i32) -> (i32, i32) {
    %c0_i32 = arith.constant 0 : i32
    return %arg2, %arg1 : i32, i32
  }
  func.func @transform_2(%arg0: i32, %arg1: i32, %arg2: i32) -> (i32, i32) {
    %c0_i32 = arith.constant 0 : i32
    %c0_i32_0 = arith.constant 0 : i32
    return %c0_i32, %arg1 : i32, i32
  }
  func.func @transform_3(%arg0: i32, %arg1: i32, %arg2: i32) -> (i32, i32) {
    %c0_i32 = arith.constant 0 : i32
    return %arg0, %arg1 : i32, i32
  }
}

</mosaic_0001>

<bundles_post_ra>
// kernel: ash1d_forward.5
= control target key start
LH: loop header
LB: loop body
LE: loop exit
PB: predicated region body
PF: predicated region fallthrough
CT: control target
= control target key end

     0   :  { %vm16_vm0 = vcmask 261120   ;;  %vm47_vm1 = vcmask 130048   ;;  %v170_v1 = vmov 0.0   ;;  %vm135_vm2 = vcmask 257024   ;;  %s215_s1 = inlined_call_operand.vmem [shape: bf16[16,32], index: 1, kind: input, shape index: {}]   ;;  %s216_s0 = inlined_call_operand.vmem [shape: bf16[32,16], index: 0, kind: input, shape index: {}]   ;;  %s217_s2 = inlined_call_operand.vmem [shape: bf16[32,32], index: 2, kind: output, shape index: {}]  }
   0x1   :  { %v167_v0 = vld [vmem:[%s215_s1] sm:$0xff]   ;;  %19 = vst.msk [vmem:[#allocation2 + $0x10] sm:$0xff] %vm16_vm0, %v170_v1  ;;  %17 = vst.msk [vmem:[#allocation2] sm:$0xff] %vm16_vm0, %v170_v1  ;;  %v169_v3 = vld [vmem:[%s216_s0 + $0x8] sm:$0xff]  }
   0x2   :  { %18 = vst.msk [vmem:[#allocation2 + $0x8] sm:$0xff] %vm16_vm0, %v170_v1  ;;  %20 = vst.msk [vmem:[#allocation2 + $0x18] sm:$0xff] %vm16_vm0, %v170_v1  ;;  %v168_v2 = vld [vmem:[%s216_s0] sm:$0xff]   ;;  %160 = vmatprep.subr.bf16.mxu0 %v167_v0 }
   0x3   :  { %161 = vmatpush3.bf16.msra.mxu0 %v167_v0  ;;  %162 = vmatprep.mubr.msk.bf16.mxu0 %vm47_vm1, %v168_v2 }
   0x6   :  { %163 = vmatmul.mubr.msk.bf16.vlgmr.msra.gmra.mrb[0].mxu0 %vm47_vm1, %v169_v3 }
   0x8   :  { %v23_v4 = vld [vmem:[#allocation2 + $0x10] sm:$0xff]  ;;  %v21_v5 = vld [vmem:[#allocation2] sm:$0xff] }
   0x9   :  { %v24_v7 = vld [vmem:[#allocation2 + $0x18] sm:$0xff]  ;;  %v22_v10 = vld [vmem:[#allocation2 + $0x8] sm:$0xff] }
  0xd9   :  { %v164_v6 = vpop.f32.mrb[0].mxu0 }
  0xda   :  { %v105_v8 = vadd.f32 %v164_v6, %v23_v4  ;;  %v88_v9 = vpop.f32.mrb[1].mxu0 }
  0xdb   :  { %v103_v11 = vadd.f32 %v88_v9, %v21_v5  ;;  %v165_v12 = vpop.f32.mrb[2].mxu0 }
  0xdc   :  { %110 = vst.msk [vmem:[#allocation2 + $0x10] sm:$0xff] %vm16_vm0, %v105_v8  ;;  %v106_v13 = vadd.f32 %v165_v12, %v24_v7  ;;  %v91_v14 = vpop.f32.mrb[3].mxu0 }
  0xdd   :  { %108 = vst.msk [vmem:[#allocation2] sm:$0xff] %vm16_vm0, %v103_v11  ;;  %v104_v15 = vadd.f32 %v91_v14, %v22_v10 }
  0xde   :  { %111 = vst.msk [vmem:[#allocation2 + $0x18] sm:$0xff] %vm16_vm0, %v106_v13 }
  0xdf   :  { %109 = vst.msk [vmem:[#allocation2 + $0x8] sm:$0xff] %vm16_vm0, %v104_v15 }
  0xe3   :  { %v117_v16 = vld [vmem:[#allocation2 + $0x10] sm:$0xff] }
  0xe4   :  { %v155_v17 = vpack.c.bf16 %v117_v16, %v117_v16  ;;  %v115_v18 = vld [vmem:[#allocation2] sm:$0xff] }
  0xe5   :  { %v153_v19 = vpack.c.bf16 %v115_v18, %v115_v18  ;;  %v118_v20 = vld [vmem:[#allocation2 + $0x18] sm:$0xff] }
  0xe6   :  { %138 = vst.msk [vmem:[%s217_s2 + $0x8] sm:$0xf] %vm135_vm2, %v155_v17  ;;  %v156_v21 = vpack.c.bf16 %v118_v20, %v118_v20  ;;  %v116_v22 = vld [vmem:[#allocation2 + $0x8] sm:$0xff] }
  0xe7   :  { %136 = vst.msk [vmem:[%s217_s2] sm:$0xf] %vm135_vm2, %v153_v19  ;;  %v154_v23 = vpack.c.bf16 %v116_v22, %v116_v22 }
  0xe8   :  { %139 = vst.msk [vmem:[%s217_s2 + $0xc] sm:$0xf] %vm135_vm2, %v156_v21 }
  0xe9   :  { %137 = vst.msk [vmem:[%s217_s2 + $0x4] sm:$0xf] %vm135_vm2, %v154_v23 }

// kernel: ash1d_forward.9
= control target key start
LH: loop header
LB: loop body
LE: loop exit
PB: predicated region body
PF: predicated region fallthrough
CT: control target
= control target key end

     0   :  { %vm59_vm0 = vcmask 261120   ;;  %vm20_vm1 = vcmask 130048   ;;  %v213_v3 = vmov 0.0   ;;  %s278_s0 = inlined_call_operand.vmem [shape: bf16[32,32], index: 0, kind: input, shape index: {}]   ;;  %s279_s1 = inlined_call_operand.vmem [shape: bf16[32,16], index: 1, kind: input, shape index: {}]   ;;  %s280_s2 = inlined_call_operand.vmem [shape: f32[1,16], index: 2, kind: input, shape index: {}]   ;;  %s281_s3 = inlined_call_operand.hbm [shape: f32[32,16], index: 3, kind: output, shape index: {}]  }
   0x1   :  { %v185_v0 = vld [vmem:[%s279_s1] sm:$0xff]   ;;  %v186_v1 = vld [vmem:[%s279_s1 + $0x8] sm:$0xff]   ;;  %23 = vst.msk [vmem:[#allocation2 + $0x10] sm:$0xff] %vm20_vm1, %v213_v3  ;;  %21 = vst.msk [vmem:[#allocation2] sm:$0xff] %vm20_vm1, %v213_v3 }
   0x2   :  { %173 = vmatprep.subr.bf16.mxu0 %v185_v0  ;;  %v187_v2 = vld [vmem:[%s278_s0] sm:$0xff]   ;;  %22 = vst.msk [vmem:[#allocation2 + $0x8] sm:$0xff] %vm20_vm1, %v213_v3  ;;  %24 = vst.msk [vmem:[#allocation2 + $0x18] sm:$0xff] %vm20_vm1, %v213_v3 }
   0x3   :  { %174 = vmatpush3.bf16.msra.mxu0 %v185_v0  ;;  %177 = vmatprep.mubr.msk.bf16.mxu0 %vm59_vm0, %v187_v2 }
   0x4   :  { %175 = vmatprep.subr.bf16.mxu0 %v186_v1 }
   0x5   :  { %8 = vsyncpa [#allocation4], 0  ;;  %v188_v4 = vld [vmem:[%s278_s0 + $0x8] sm:$0xff]   ;;  %v168_v17 = vld [vmem:[%s280_s2] ss:$0 sm:$0xff]  ;;  %s214_s20 = smov [#allocation3]  }
   0x6   :  { %s151_s21 = sshll.u32 %s214_s20, 4  ;;  %s152_s21 = int_to_ptr.vmem [resolvable:$true] %s151_s21 }
   0x7   :  { %176 = vmatpush3.bf16.msra.mxu0 %v186_v1  ;;  %s189_s2 = scalar_lea.vmem %s152_s21, 512  ;;  %p194_p1 = scmp.lt.s32.totalorder %s152_s21, %s152_s21 }
   0x8   :  { %v27_v5 = vld [vmem:[#allocation2 + $0x10] sm:$0xff]  ;;  %v25_v6 = vld [vmem:[#allocation2] sm:$0xff]  ;;  %p190_p0 = scmp.ne.s32.totalorder %s152_s21, %s189_s2  ;;  %p195_p2 = scmp.lt.s32.totalorder %s189_s2, %s189_s2 }
   0x9   :  { %v28_v8 = vld [vmem:[#allocation2 + $0x18] sm:$0xff]  ;;  %v26_v11 = vld [vmem:[#allocation2 + $0x8] sm:$0xff] }
   0xa   :  { %178 = vmatmul.mubr.msk.bf16.vlgmr.msra.gmra.mrb[0].mxu0 %vm59_vm0, %v188_v4  ;;  %p196_p3 = por %p195_p2, %p194_p1 }
   0xc   :  { %p197_p4 = pnand %p196_p3, %p190_p0 }
  0xdd   :  { %v179_v7 = vpop.f32.mrb[0].mxu0 }
  0xde   :  { %v117_v9 = vadd.f32 %v179_v7, %v27_v5  ;;  %v100_v10 = vpop.f32.mrb[1].mxu0 }
  0xdf   :  { %v115_v12 = vadd.f32 %v100_v10, %v25_v6  ;;  %v180_v13 = vpop.f32.mrb[2].mxu0 }
  0xe0   :  { %122 = vst.msk [vmem:[#allocation2 + $0x10] sm:$0xff] %vm20_vm1, %v117_v9  ;;  %v118_v14 = vadd.f32 %v180_v13, %v28_v8  ;;  %v103_v15 = vpop.f32.mrb[3].mxu0 }
  0xe1   :  { %120 = vst.msk [vmem:[#allocation2] sm:$0xff] %vm20_vm1, %v115_v12  ;;  %v116_v16 = vadd.f32 %v103_v15, %v26_v11 }
  0xe2   :  { %123 = vst.msk [vmem:[#allocation2 + $0x18] sm:$0xff] %vm20_vm1, %v118_v14 }
  0xe3   :  { %121 = vst.msk [vmem:[#allocation2 + $0x8] sm:$0xff] %vm20_vm1, %v116_v16 }
  0xe7   :  { %v129_v18 = vld [vmem:[#allocation2 + $0x10] sm:$0xff] }
  0xe8   :  { %v127_v19 = vld [vmem:[#allocation2] sm:$0xff]  ;;  %v140_v20 = vadd.f32 %v168_v17, %v129_v18 }
  0xe9   :  { %v130_v21 = vld [vmem:[#allocation2 + $0x18] sm:$0xff]  ;;  %v138_v22 = vadd.f32 %v168_v17, %v127_v19 }
  0xea   :  { %v128_v23 = vld [vmem:[#allocation2 + $0x8] sm:$0xff]  ;;  %v141_v24 = vadd.f32 %v168_v17, %v130_v21  ;;  %144 = vst.msk [vmem:[#allocation3 + $0x10] sm:$0xff] %vm20_vm1, %v140_v20 }
  0xeb   :  { %v139_v25 = vadd.f32 %v168_v17, %v128_v23  ;;  %142 = vst.msk [vmem:[#allocation3] sm:$0xff] %vm20_vm1, %v138_v22 }
  0xec   :  { %145 = vst.msk [vmem:[#allocation3 + $0x18] sm:$0xff] %vm20_vm1, %v141_v24 }
  0xed   :  { %143 = vst.msk [vmem:[#allocation3 + $0x8] sm:$0xff] %vm20_vm1, %v139_v25 }
  0xee   :  { %200 = shalt.err (!%p197_p4)
}
  0xef   :  { %s201_s24 = scalar_lea.hbm %s281_s3, 512 }
  0xf0   :  { %p202_p5 = scmp.ne.s32.totalorder %s281_s3, %s201_s24  ;;  %p205_p6 = scmp.lt.u32.totalorder %s201_s24, %s281_s3 }
  0xf2   :  { %p207_p7 = pnand %p205_p6, %p202_p5 }
  0xf4   :  { %210 = shalt.err (!%p207_p7)
}
  0xf5   :  { %s215_s29 = smov 128   ;;  %s216_s30 = smov 8  }
  0xf6   :  { %157 = dma.vmem_to_hbm [thread:$0]  %s152_s21, 512, %s281_s3, [#allocation4], %s215_s29, %s215_s29, %s216_s30  }
  0xf7   :  { %211 = dma.done.wait [#allocation4], 512  }
  0xf8   :  { %212 = vsyncadd [#allocation4], 4294966784 }
  0xf9   :  { %161 = vsyncpa [#allocation4], 1 }

// kernel: ash1d_forward.8
= control target key start
LH: loop header
LB: loop body
LE: loop exit
PB: predicated region body
PF: predicated region fallthrough
CT: control target
= control target key end

     0   :  { %s3774_s18 = smov 0   ;;  %s3776_s19 = smov 0   ;;  %s6014_s0 = inlined_call_operand.vmem [shape: s32[2,16,12], index: 0, kind: input, shape index: {}]   ;;  %s6015_s1 = inlined_call_operand.vmem [shape: f32[2,16,12], index: 1, kind: input, shape index: {}]   ;;  %s6016_s2 = inlined_call_operand.vmem [shape: bf16[2,16,32], index: 2, kind: input, shape index: {}]   ;;  %s6017_s3 = inlined_call_operand.vmem [shape: bf16[2,16,32], index: 3, kind: input, shape index: {}]   ;;  %s6018_s4 = inlined_call_operand.vmem [shape: bf16[2,16,32], index: 4, kind: input, shape index: {}]   ;;  %s6019_s5 = inlined_call_operand.vmem [shape: f32[2,16,32], index: 5, kind: output, shape index: {}]  }
   0x1   :  { %s3778_s20 = smov 0  }
   0x2 LB: > { %s27_s21 = sadd.s32 1, %s3699_s19  ;;  %p3240_p0 = scmp.ge.s32.totalorder %s3703_s20, 1  ;;  %s3703_s20 = sphi %s3778_s20, %s15_s20   ;;  %s3699_s19 = sphi %s3776_s19, %s6335_s19   ;;  %s3695_s18 = sphi %s3774_s18, %s6334_s18  }
   0x3   : > { %p29_p1 = scmp.ge.s32.totalorder %s27_s21, 2  ;;  %p262_p2 = scmp.lt.s32.totalorder %s3703_s20, 3 }
   0x5   : > { %s6337_s21 = smov (%p29_p1, %s27_s21), 0  ;;  %p263_p3 = pnand %p3240_p0, %p262_p2 }
   0x7   : > { %266 = sbr.rel (%p263_p3) target bundleno = 2454 (0x996), region = 40 }
   0xe   : > { %p327_p4 = scmp.lt.s32.totalorder %s3695_s18, 1  ;;  %vm393_vm0 = vcmask 130048   ;;  %v6031_v0 = vmov 0.0   ;;  %vm6020_vm1 = vmmov 0   ;;  %v6051_v1 = vmov 1   ;;  %s3720_s11 = smov 127  }
   0xf   : > { %3279 = vmatprep.subr.bf16.mxu0 %v6031_v0  ;;  %443 = vst.msk [vmem:[#allocation3] sm:$0xff] %vm393_vm0, %v6031_v0  ;;  %444 = vst.msk [vmem:[#allocation3 + $0x8] sm:$0xff] %vm393_vm0, %v6031_v0  ;;  %3281 = vmatprep.mubr.msk.bf16.mxu0 %vm6020_vm1, %v6031_v0  ;;  %v6057_v2 = vmov 0   ;;  %v6055_v7 = vmov 2   ;;  %v6053_v9 = vmov 3   ;;  %v6049_v10 = vmov 4  }
  0x10   : > { %s6339_s18 = smov (!%p327_p4, %s3695_s18), 1  ;;  %3368 = vset.pattern.permute.xlu1 %v6051_v1  ;;  %3366 = vset.pattern.permute.xlu0 %v6057_v2  ;;  %v6045_v11 = vmov 5   ;;  %v6043_v12 = vmov 6   ;;  %v6041_v13 = vmov 7   ;;  %v6039_v14 = vmov 8   ;;  %s3721_s12 = smov 125  }
  0x11   : > { %3285 = vmatprep.subr.bf16.mxu1 %v6031_v0  ;;  %3287 = vmatprep.mubr.msk.bf16.mxu1 %vm6020_vm1, %v6031_v0  ;;  %s3804_s22 = sshll.u32 %s6339_s18, 4  ;;  %s3806_s23 = sshll.u32 %s6339_s18, 3  ;;  %v6037_v15 = vmov 9   ;;  %v6033_v16 = vmov 10   ;;  %v6035_v17 = vmov 11   ;;  %vm445_vm2 = vcmask 7168  }
  0x12   : > { %s3812_s26 = scalar_lea.vmem %s6014_s0, %s3804_s22  ;;  %s3818_s29 = scalar_lea.vmem %s6017_s3, %s3806_s23  ;;  %v6047_v18 = vmov -1e+30   ;;  %448 = vst.msk [vmem:[#allocation5] sm:$0xff] %vm445_vm2, %v6031_v0  ;;  %449 = vst.msk [vmem:[#allocation5 + $0x8] sm:$0xff] %vm445_vm2, %v6031_v0  ;;  %v377_v25 = vlaneseq }
  0x13   : > { %v3821_v3 = vld [vmem:[%s3812_s26 + $0x8] sm:$0xff]  ;;  %v3824_v4 = vld [vmem:[%s3812_s26] sm:$0xff]  ;;  %s3830_s7 = scalar_lea.vmem %s6016_s2, %s3806_s23  ;;  %446 = vst.msk [vmem:[#allocation4] sm:$0xff] %vm445_vm2, %v6047_v18  ;;  %447 = vst.msk [vmem:[#allocation4 + $0x8] sm:$0xff] %vm445_vm2, %v6047_v18  ;;  %s4085_s10 = scalar_lea.vmem %s6015_s1, %s3804_s22 }
  0x14   : > { %v3475_v5 = vld [vmem:[%s3818_s29] sm:$0xff]   ;;  %538 = vperm.xlu1 %3368, %v3821_v3   ;;  %455 = vperm.xlu0 %3366, %v3824_v4   ;;  %v3903_v31 = vand.u32 127, %v377_v25  ;;  %s3722_s13 = smov 126   ;;  %s3723_s14 = smov 124  }
  0x15   : > { %v398_v6 = vsel %vm393_vm0, %v3475_v5, 0  ;;  %v3476_v8 = vld [vmem:[%s3830_s7] sm:$0xff]   ;;  %s3724_s15 = smov 1   ;;  %s3725_s16 = smov 123  }
  0x16   : > { %3280 = vmatpush3.bf16.xpose.msra.mxu0 %v398_v6  ;;  %s3726_s17 = smov 2   ;;  %s3727_s18 = smov 122  }
  0x17   : > { %3297 = vmatprep.subr.bf16.mxu0 %v6031_v0  ;;  %s3728_s24 = smov 121   ;;  %s3729_s25 = smov 3  }
  0x18   : > { %3369 = vset.pattern.permute.xlu1 %v6055_v7  ;;  %458 = vperm.xlu0 %3366, %v3821_v3   ;;  %s3730_s27 = smov 120   ;;  %s6098_s28 = smov 4  }
  0x19   : > { %637 = vperm.xlu1 %3369, %v3824_v4   ;;  %s3732_s30 = smov 119   ;;  %s6070_s6 = smov 5  }
  0x1a   : > { %s3734_s8 = smov 118   ;;  %s6078_s9 = smov 6  }
  0x1c   : > { %3367 = vset.pattern.permute.xlu0 %v6051_v1 }
  0x1d   : > { %640 = vperm.xlu1 %3369, %v3821_v3   ;;  %535 = vperm.xlu0 %3367, %v3824_v4  }
  0x1e   : > { %3282 = vmatmul.mubr.msk.bf16.vlgmr.msra.gmra.mrb[0].mxu0 %vm393_vm0, %v3476_v8 }
  0x1f   : > { %3299 = vmatprep.mubr.msk.bf16.mxu0 %vm6020_vm1, %v6031_v0 }
  0x21   : > { %3370 = vset.pattern.permute.xlu1 %v6053_v9  ;;  %3371 = vset.pattern.permute.xlu0 %v6053_v9 }
  0x22   : > { %739 = vperm.xlu1 %3370, %v3824_v4   ;;  %742 = vperm.xlu0 %3371, %v3821_v3  }
  0x26   : > { %3373 = vset.pattern.permute.xlu1 %v6049_v10  ;;  %3372 = vset.pattern.permute.xlu0 %v6049_v10 }
  0x27   : > { %844 = vperm.xlu1 %3373, %v3821_v3   ;;  %841 = vperm.xlu0 %3372, %v3824_v4  }
  0x2b   : > { %3374 = vset.pattern.permute.xlu1 %v6045_v11  ;;  %3376 = vset.pattern.permute.xlu0 %v6043_v12 }
  0x2c   : > { %943 = vperm.xlu1 %3374, %v3824_v4   ;;  %1048 = vperm.xlu0 %3376, %v3821_v3  }
  0x30   : > { %946 = vperm.xlu1 %3374, %v3821_v3   ;;  %3378 = vset.pattern.permute.xlu0 %v6041_v13 }
  0x31   : > { %1150 = vperm.xlu0 %3378, %v3821_v3  }
  0x34   : > { %3375 = vset.pattern.permute.xlu1 %v6043_v12 }
  0x35   : > { %1045 = vperm.xlu1 %3375, %v3824_v4   ;;  %3380 = vset.pattern.permute.xlu0 %v6039_v14 }
  0x36   : > { %1252 = vperm.xlu0 %3380, %v3821_v3  }
  0x39   : > { %3377 = vset.pattern.permute.xlu1 %v6041_v13 }
  0x3a   : > { %1147 = vperm.xlu1 %3377, %v3824_v4   ;;  %3382 = vset.pattern.permute.xlu0 %v6037_v15 }
  0x3b   : > { %1354 = vperm.xlu0 %3382, %v3821_v3  }
  0x3e   : > { %3379 = vset.pattern.permute.xlu1 %v6039_v14 }
  0x3f   : > { %1249 = vperm.xlu1 %3379, %v3824_v4   ;;  %3384 = vset.pattern.permute.xlu0 %v6035_v17 }
  0x43   : > { %3381 = vset.pattern.permute.xlu1 %v6037_v15 }
  0x44   : > { %1351 = vperm.xlu1 %3381, %v3824_v4  }
  0x48   : > { %3383 = vset.pattern.permute.xlu1 %v6033_v16 }
  0x49   : > { %1453 = vperm.xlu1 %3383, %v3824_v4  }
  0x4d   : > { %1456 = vperm.xlu1 %3383, %v3821_v3  }
  0x51   : > { %3385 = vset.pattern.permute.xlu1 %v6035_v17 }
  0x93   : > { %v3887_v19 = vpop.permute.xlu1 %538  ;;  %v3889_v20 = vpop.permute.xlu0 %455 }
  0x94   : > { %vm460_vm6 = vcmp.eq.s32.totalorder %v3889_v20, %v3903_v31  ;;  %vm541_vm12 = vcmp.eq.s32.totalorder %v3887_v19, %v3903_v31 }
  0x97   : > { %v3893_v22 = vpop.permute.xlu0 %458 }
  0x98   : > { %v3891_v21 = vpop.permute.xlu1 %637  ;;  %vm461_vm10 = vcmp.eq.s32.totalorder %v3893_v22, %v3903_v31 }
  0x99   : > { %vm642_vm4 = vcmp.eq.s32.totalorder %v3891_v21, %v3903_v31 }
  0x9c   : > { %v3895_v23 = vpop.permute.xlu1 %640  ;;  %v3897_v24 = vpop.permute.xlu0 %535 }
  0x9d   : > { %6142 = vst [vmem:[#allocation7_spill] sm:$0xff] %v3895_v23  ;;  %vm540_vm3 = vcmp.eq.s32.totalorder %v3897_v24, %v3903_v31  ;;  %vm643_vm13 = vcmp.eq.s32.totalorder %v3895_v23, %v3903_v31 }
  0xa1   : > { %v3899_v27 = vpop.permute.xlu1 %739  ;;  %v3905_v32 = vpop.permute.xlu0 %742 }
  0xa2   : > { %6143 = vst [vmem:[#allocation8_spill] sm:$0xff] %v3899_v27  ;;  %6144 = vst [vmem:[#allocation9_spill] sm:$0xff] %v3905_v32  ;;  %vm744_vm5 = vcmp.eq.s32.totalorder %v3899_v27, %v3903_v31  ;;  %vm745_vm7 = vcmp.eq.s32.totalorder %v3905_v32, %v3903_v31 }
  0xa6   : > { %v3909_v33 = vpop.permute.xlu1 %844  ;;  %v3929_v39 = vpop.permute.xlu0 %841 }
  0xa7   : > { %6145 = vst [vmem:[#allocation10_spill] sm:$0xff] %v3909_v33  ;;  %6146 = vst [vmem:[#allocation11_spill] sm:$0xff] %v3929_v39  ;;  %vm846_vm8 = vcmp.eq.s32.totalorder %v3929_v39, %v3903_v31  ;;  %vm847_vm9 = vcmp.eq.s32.totalorder %v3909_v33, %v3903_v31 }
  0xab   : > { %v3945_v43 = vpop.permute.xlu1 %943  ;;  %v4007_v63 = vpop.permute.xlu0 %1048 }
  0xac   : > { %6147 = vst [vmem:[#allocation12_spill] sm:$0xff] %v3945_v43  ;;  %vm6022_vm14 = vcmp.eq.s32.totalorder %v3945_v43, %v3903_v31  ;;  %6149 = vst [vmem:[#allocation14_spill] sm:$0xff] %v4007_v63 }
  0xaf   : > { %v3963_v50 = vpop.permute.xlu1 %946 }
  0xb0   : > { %6148 = vst [vmem:[#allocation13_spill] sm:$0xff] %v3963_v50  ;;  %vm6021_vm11 = vcmp.eq.s32.totalorder %v3963_v50, %v3903_v31  ;;  %v4013_v6 = vpop.permute.xlu0 %1150 }
  0xb1   : > { %6151 = vst [vmem:[#allocation16_spill] sm:$0xff] %v4013_v6 }
  0xb4   : > { %v4009_v5 = vpop.permute.xlu1 %1045 }
  0xb5   : > { %6150 = vst [vmem:[#allocation15_spill] sm:$0xff] %v4009_v5  ;;  %vm6024_vm15 = vcmp.eq.s32.totalorder %v4009_v5, %v3903_v31  ;;  %v4024_v25 = vpop.permute.xlu0 %1252 }
  0xb6   : > { %6153 = vst [vmem:[#allocation18_spill] sm:$0xff] %v4024_v25 }
  0xb9   : > { %v4015_v8 = vpop.permute.xlu1 %1147 }
  0xba   : > { %6152 = vst [vmem:[#allocation17_spill] sm:$0xff] %v4015_v8  ;;  %vm6023_vm1 = vcmp.eq.s32.totalorder %v4015_v8, %v3903_v31 }
  0xf1   : > { %v434_v26 = vpop.f32.mrb[0].mxu0 }
  0xf2   : > { %441 = vst.msk [vmem:[#allocation2] sm:$0xff] %vm393_vm0, %v434_v26  ;;  %v3283_v28 = vpop.f32.mrb[1].mxu0 }
  0xf3   : > { %v437_v29 = vpop.f32.mrb[2].mxu0  ;;  %v4034_v28 = vpop.permute.xlu1 %1249 }
  0xf4   : > { %442 = vst.msk [vmem:[#allocation2 + $0x8] sm:$0xff] %vm393_vm0, %v437_v29  ;;  %v3284_v30 = vpop.f32.mrb[3].mxu0  ;;  %6154 = vst [vmem:[#allocation19_spill] sm:$0xff] %v4034_v28 }
  0xf9   : > { %v3917_v34 = vld [vmem:[#allocation2] sm:$0xff] }
  0xfa   : > { %v464_v35 = vsel %vm460_vm6, %v3917_v34, 0.0  ;;  %v544_v36 = vsel %vm540_vm3, %v3917_v34, 0.0  ;;  %v748_v40 = vsel %vm744_vm5, %v3917_v34, 0.0  ;;  %v646_v41 = vsel %vm642_vm4, %v3917_v34, 0.0 }
  0xfb   : > { %v466_v37 = vsel %vm393_vm0, %v464_v35, 0.0  ;;  %v546_v38 = vsel %vm393_vm0, %v544_v36, 0.0  ;;  %v3943_v42 = vld [vmem:[#allocation2 + $0x8] sm:$0xff]  ;;  %v750_v44 = vsel %vm393_vm0, %v748_v40, 0.0  ;;  %v648_v45 = vsel %vm393_vm0, %v646_v41, 0.0  ;;  %v4049_v36 = vpop.permute.xlu0 %1354  ;;  %v4053_v40 = vpop.permute.xlu1 %1351 }
  0xfc   : > { %467 = vadd.xlane.f32.xlu1 %v466_v37  ;;  %547 = vadd.xlane.f32.xlu0 %v546_v38  ;;  %v749_v46 = vsel %vm745_vm7, %v3943_v42, 0.0  ;;  %v850_v47 = vsel %vm846_vm8, %v3917_v34, 0.0  ;;  %v851_v51 = vsel %vm847_vm9, %v3943_v42, 0.0  ;;  %v465_v52 = vsel %vm461_vm10, %v3943_v42, 0.0  ;;  %6155 = vst [vmem:[#allocation20_spill] sm:$0xff] %v4049_v36  ;;  %6156 = vst [vmem:[#allocation21_spill] sm:$0xff] %v4053_v40 }
  0xfd   : > { %v753_v48 = vsel %vm393_vm0, %v749_v46, 0.0  ;;  %v852_v49 = vsel %vm393_vm0, %v850_v47, 0.0  ;;  %v855_v53 = vsel %vm393_vm0, %v851_v51, 0.0  ;;  %v469_v54 = vsel %vm393_vm0, %v465_v52, 0.0 }
  0xfe   : > { %v953_v55 = vsel %vm6021_vm11, %v3943_v42, 0.0  ;;  %v545_v56 = vsel %vm541_vm12, %v3943_v42, 0.0  ;;  %v647_v59 = vsel %vm643_vm13, %v3943_v42, 0.0  ;;  %v952_v61 = vsel %vm6022_vm14, %v3917_v34, 0.0 }
  0xff   : > { %v957_v57 = vsel %vm393_vm0, %v953_v55, 0.0  ;;  %v549_v58 = vsel %vm393_vm0, %v545_v56, 0.0  ;;  %v651_v60 = vsel %vm393_vm0, %v647_v59, 0.0  ;;  %v954_v62 = vsel %vm393_vm0, %v952_v61, 0.0  ;;  %v4079_v52 = vpop.permute.xlu1 %1453  ;;  %v474_v55 = vld [vmem:[#allocation4] sm:$0xff] }
 0x100   : > { %751 = vadd.xlane.f32.xlu1 %v750_v44  ;;  %649 = vadd.xlane.f32.xlu0 %v648_v45  ;;  %v1156_v26 = vsel %vm6023_vm1, %v3917_v34, 0.0  ;;  %vm6026_vm11 = vcmp.eq.s32.totalorder %v4007_v63, %v3903_v31  ;;  %vm6025_vm14 = vcmp.eq.s32.totalorder %v4013_v6, %v3903_v31  ;;  %vm1254_vm1 = vcmp.eq.s32.totalorder %v4034_v28, %v3903_v31 }
 0x101   : > { %v1158_v29 = vsel %vm393_vm0, %v1156_v26, 0.0  ;;  %v1055_v30 = vsel %vm6026_vm11, %v3943_v42, 0.0  ;;  %v1157_v35 = vsel %vm6025_vm14, %v3943_v42, 0.0  ;;  %v1258_v41 = vsel %vm1254_vm1, %v3917_v34, 0.0  ;;  %6157 = vst [vmem:[#allocation22_spill] sm:$0xff] %v4079_v52 }
 0x102   : > { %v1059_v37 = vsel %vm393_vm0, %v1055_v30, 0.0  ;;  %v1161_v38 = vsel %vm393_vm0, %v1157_v35, 0.0  ;;  %vm6028_vm14 = vcmp.eq.s32.totalorder %v4053_v40, %v3903_v31  ;;  %vm6027_vm11 = vcmp.eq.s32.totalorder %v4049_v36, %v3903_v31  ;;  %v4106_v30 = vld [vmem:[%s4085_s10 + $0x8] sm:$0xff]  ;;  %v499_v40 = vld [vmem:[#allocation3 + $0x8] sm:$0xff] }
 0x103   : > { %v1260_v45 = vsel %vm393_vm0, %v1258_v41, 0.0  ;;  %v1360_v47 = vsel %vm6028_vm14, %v3917_v34, 0.0  ;;  %vm6030_vm14 = vcmp.eq.s32.totalorder %v4079_v52, %v3903_v31 }
 0x104   : > { %754 = vadd.xlane.f32.xlu0 %v753_v48  ;;  %853 = vadd.xlane.f32.xlu1 %v852_v49  ;;  %v1361_v48 = vsel %vm6027_vm11, %v3943_v42, 0.0  ;;  %v1362_v49 = vsel %vm393_vm0, %v1360_v47, 0.0 }
 0x105   : > { %v1365_v51 = vsel %vm393_vm0, %v1361_v48, 0.0 }
 0x108   : > { %856 = vadd.xlane.f32.xlu0 %v855_v53  ;;  %470 = vadd.xlane.f32.xlu1 %v469_v54  ;;  %v4087_v53 = vpop.permute.xlu1 %1456  ;;  %v4090_v54 = vld [vmem:[%s4085_s10] sm:$0xff] }
 0x109   : > { %6158 = vst [vmem:[#allocation23_spill] sm:$0xff] %v4087_v53  ;;  %vm6029_vm11 = vcmp.eq.s32.totalorder %v4087_v53, %v3903_v31 }
 0x10c   : > { %958 = vadd.xlane.f32.xlu0 %v957_v57  ;;  %550 = vadd.xlane.f32.xlu1 %v549_v58 }
 0x110   : > { %652 = vadd.xlane.f32.xlu1 %v651_v60 }
 0x114   : > { %955 = vadd.xlane.f32.xlu1 %v954_v62 }
 0x122   : > { %1555 = vperm.xlu0 %3384, %v3824_v4  }
 0x125   : > { %1558 = vperm.xlu1 %3385, %v3821_v3   ;;  %v1054_v3 = vsel %vm6024_vm15, %v3917_v34, 0.0  ;;  %vm1255_vm15 = vcmp.eq.s32.totalorder %v4024_v25, %v3903_v31 }
 0x126   : > { %3387 = vset.pattern.permute.xlu0 %v6057_v2  ;;  %v1056_v4 = vsel %vm393_vm0, %v1054_v3, 0.0  ;;  %v1259_v44 = vsel %vm1255_vm15, %v3943_v42, 0.0 }
 0x127   : > { %v1263_v46 = vsel %vm393_vm0, %v1259_v44, 0.0 }
 0x129   : > { %3386 = vset.pattern.permute.xlu1 %v6057_v2 }
 0x141   : > { %1057 = vadd.xlane.f32.xlu0 %v1056_v4 }
 0x145   : > { %1159 = vadd.xlane.f32.xlu0 %v1158_v29 }
 0x149   : > { %1060 = vadd.xlane.f32.xlu1 %v1059_v37  ;;  %1162 = vadd.xlane.f32.xlu0 %v1161_v38 }
 0x14d   : > { %1261 = vadd.xlane.f32.xlu1 %v1260_v45  ;;  %1264 = vadd.xlane.f32.xlu0 %v1263_v46  ;;  %v475_v45 = vld [vmem:[#allocation4 + $0x8] sm:$0xff] }
 0x151   : > { %1363 = vadd.xlane.f32.xlu1 %v1362_v49  ;;  %1366 = vadd.xlane.f32.xlu0 %v1365_v51  ;;  %v490_v51 = vld [vmem:[#allocation5] sm:$0xff] }
 0x189   : > { %v468_v56 = vpop.xlane.xlu1 %467  ;;  %v548_v57 = vpop.xlane.xlu0 %547 }
 0x18a   : > { %v472_v58 = vmul.f32 %v468_v56, %v4090_v54  ;;  %v4094_v59 = vmul.f32 %v548_v57, %v4090_v54 }
 0x18c   : > { %v476_v60 = vmax.f32 %v474_v55, %v472_v58  ;;  %558 = vrot.lane.b32.xlu0 %v4094_v59, %s3720_s11 }
 0x18d   : > { %v752_v61 = vpop.xlane.xlu1 %751  ;;  %v650_v62 = vpop.xlane.xlu0 %649 }
 0x18e   : > { %v478_v3 = vsub.f32 %v474_v55, %v476_v60  ;;  %v484_v4 = vsub.f32 %v472_v58, %v476_v60  ;;  %528 = vst.msk [vmem:[#allocation4] sm:$0xff] %vm445_vm2, %v476_v60  ;;  %v4100_v26 = vmul.f32 %v752_v61, %v4090_v54  ;;  %v4103_v29 = vmul.f32 %v650_v62, %v4090_v54 }
 0x190   : > { %v480_v35 = vmul.f32 1.442695, %v478_v3  ;;  %v486_v37 = vmul.f32 1.442695, %v484_v4  ;;  %762 = vrot.lane.b32.xlu1 %v4100_v26, %s3721_s12  ;;  %660 = vrot.lane.b32.xlu0 %v4103_v29, %s3722_s13 }
 0x191   : > { %v854_v38 = vpop.xlane.xlu1 %853  ;;  %v755_v41 = vpop.xlane.xlu0 %754 }
 0x192   : > { %3481 = vpow2.f32 %v480_v35  ;;  %v4113_v44 = vmul.f32 %v755_v41, %v4106_v30  ;;  %v491_v41 = vld [vmem:[#allocation5 + $0x8] sm:$0xff] }
 0x193   : > { %3483 = vpow2.f32 %v486_v37 }
 0x194   : > { %764 = vrot.lane.b32.xlu0 %v4113_v44, %s3721_s12 }
 0x195   : > { %v471_v46 = vpop.xlane.xlu1 %470 }
 0x196   : > { %v473_v47 = vmul.f32 %v4106_v30, %v471_v46 }
 0x198   : > { %v477_v48 = vmax.f32 %v475_v45, %v473_v47 }
 0x199   : > { %v551_v49 = vpop.xlane.xlu1 %550 }
 0x19a   : > { %v479_v55 = vsub.f32 %v475_v45, %v477_v48  ;;  %v485_v56 = vsub.f32 %v473_v47, %v477_v48  ;;  %529 = vst.msk [vmem:[#allocation4 + $0x8] sm:$0xff] %vm445_vm2, %v477_v48  ;;  %v4120_v57 = vmul.f32 %v4106_v30, %v551_v49  ;;  %v1463_v49 = vsel %vm6029_vm11, %v3943_v42, 0.0 }
 0x19c   : > { %v3482_v58 = vpop.eup %3481  ;;  %v482_v60 = vmul.f32 1.442695, %v479_v55  ;;  %v488_v61 = vmul.f32 1.442695, %v485_v56  ;;  %560 = vrot.lane.b32.xlu1 %v4120_v57, %s3720_s11  ;;  %v1462_v55 = vsel %vm6030_vm14, %v3917_v34, 0.0 }
 0x19d   : > { %v492_v62 = vmul.f32 %v3482_v58, %v490_v51  ;;  %v653_v3 = vpop.xlane.xlu1 %652  ;;  %v3484_v4 = vpop.eup %3483  ;;  %v1467_v51 = vsel %vm393_vm0, %v1463_v49, 0.0  ;;  %v1464_v56 = vsel %vm393_vm0, %v1462_v55, 0.0 }
 0x19e   : > { %3485 = vpow2.f32 %v482_v60  ;;  %v4125_v35 = vmul.f32 %v4106_v30, %v653_v3  ;;  %v857_v60 = vpop.xlane.xlu0 %856 }
 0x19f   : > { %v494_v37 = vadd.f32 %v3484_v4, %v492_v62  ;;  %3487 = vpow2.f32 %v488_v61  ;;  %v4146_v61 = vmul.f32 %v857_v60, %v4106_v30  ;;  %v4151_v62 = vmul.f32 %v854_v38, %v4090_v54 }
 0x1a0   : > { %662 = vrot.lane.b32.xlu1 %v4125_v35, %s3722_s13 }
 0x1a1   : > { %496 = vst.msk [vmem:[#allocation5] sm:$0xff] %vm445_vm2, %v494_v37  ;;  %v956_v3 = vpop.xlane.xlu1 %955 }
 0x1a2   : > { %v959_v37 = vpop.xlane.xlu0 %958 }
 0x1a8   : > { %v3486_v45 = vpop.eup %3485 }
 0x1a9   : > { %v493_v46 = vmul.f32 %v3486_v45, %v491_v41  ;;  %v3488_v47 = vpop.eup %3487  ;;  %v4155_v41 = vpop.permute.xlu0 %1555 }
 0x1aa   : > { %6159 = vst [vmem:[#allocation24_spill] sm:$0xff] %v4155_v41  ;;  %vm1560_vm14 = vcmp.eq.s32.totalorder %v4155_v41, %v3903_v31 }
 0x1ab   : > { %v495_v48 = vadd.f32 %v3488_v47, %v493_v46  ;;  %v4157_v46 = vpop.permute.xlu1 %1558  ;;  %v1564_v60 = vsel %vm1560_vm14, %v3917_v34, 0.0 }
 0x1ac   : > { %6160 = vst [vmem:[#allocation25_spill] sm:$0xff] %v4157_v46  ;;  %vm1561_vm11 = vcmp.eq.s32.totalorder %v4157_v46, %v3903_v31  ;;  %v1566_v0 = vsel %vm393_vm0, %v1564_v60, 0.0 }
 0x1ad   : > { %497 = vst.msk [vmem:[#allocation5 + $0x8] sm:$0xff] %vm445_vm2, %v495_v48  ;;  %v1565_v49 = vsel %vm1561_vm11, %v3943_v42, 0.0 }
 0x1ae   : > { %v1569_v38 = vsel %vm393_vm0, %v1565_v49, 0.0 }
 0x1b3   : > { %1468 = vadd.xlane.f32.xlu0 %v1467_v51 }
 0x1c4   : > { %1465 = vadd.xlane.f32.xlu1 %v1464_v56 }
 0x1c9   : > { %866 = vrot.lane.b32.xlu0 %v4146_v61, %s3723_s14 }
 0x1ce   : > { %v1058_v48 = vpop.xlane.xlu0 %1057 }
 0x1d2   : > { %v4166_v51 = vpop.xlane.xlu0 %1159 }
 0x1d5   : > { %864 = vrot.lane.b32.xlu1 %v4151_v62, %s3723_s14 }
 0x1d6   : > { %v4168_v55 = vpop.xlane.xlu0 %1162  ;;  %v1061_v42 = vpop.xlane.xlu1 %1060 }
 0x1da   : > { %v4172_v56 = vpop.xlane.xlu0 %1264  ;;  %v4181_v15 = vpop.xlane.xlu1 %1261 }
 0x1de   : > { %v4179_v49 = vpop.xlane.xlu0 %1366  ;;  %v4184_v13 = vpop.xlane.xlu1 %1363 }
 0x1e8   : > { %1570 = vadd.xlane.f32.xlu0 %v1569_v38  ;;  %v554_v38 = vld [vmem:[#allocation4] sm:$0xff] }
 0x1f9   : > { %1567 = vadd.xlane.f32.xlu1 %v1566_v0 }
 0x1fe   : > { %502 = vperm.xlu0 %3387, %v3482_v58   ;;  %v559_v16 = vpop.permute.xlu0 %558  ;;  %v4189_v58 = vmul.f32 %v959_v37, %v4106_v30  ;;  %v4207_v37 = vmul.f32 %v1058_v48, %v4090_v54 }
 0x1ff   : > { %v564_v17 = vmax.f32 %v554_v38, %v559_v16 }
 0x201   : > { %630 = vst.msk [vmem:[#allocation4] sm:$0xff] %vm445_vm2, %v564_v17  ;;  %v566_v14 = vsub.f32 %v554_v38, %v564_v17 }
 0x202   : > { %514 = vperm.xlu0 %3387, %v3484_v4   ;;  %v661_v60 = vpop.permute.xlu0 %660  ;;  %v763_v11 = vpop.permute.xlu1 %762  ;;  %v4192_v4 = vmul.f32 %v956_v3, %v4090_v54 }
 0x203   : > { %v568_v34 = vmul.f32 1.442695, %v566_v14  ;;  %v555_v14 = vld [vmem:[#allocation4 + $0x8] sm:$0xff] }
 0x205   : > { %3489 = vpow2.f32 %v568_v34 }
 0x206   : > { %519 = vperm.xlu0 %3387, %v3488_v47  }
 0x208   : > { %v656_v12 = vld [vmem:[#allocation4] sm:$0xff] }
 0x209   : > { %v666_v0 = vmax.f32 %v656_v12, %v661_v60 }
 0x20a   : > { %507 = vperm.xlu1 %3386, %v3486_v45   ;;  %574 = vrot.lane.b32.xlu0 %v564_v17, %s3724_s15 }
 0x20b   : > { %v668_v16 = vsub.f32 %v656_v12, %v666_v0  ;;  %732 = vst.msk [vmem:[#allocation4] sm:$0xff] %vm445_vm2, %v666_v0 }
 0x20d   : > { %v670_v47 = vmul.f32 1.442695, %v668_v16 }
 0x20e   : > { %v561_v38 = vpop.permute.xlu1 %560  ;;  %966 = vrot.lane.b32.xlu1 %v4192_v4, %s3725_s16  ;;  %968 = vrot.lane.b32.xlu0 %v4189_v58, %s3725_s16 }
 0x20f   : > { %3491 = vpow2.f32 %v670_v47  ;;  %v565_v12 = vmax.f32 %v555_v14, %v561_v38  ;;  %v4209_v60 = vpop.eup %3489  ;;  %v4224_v38 = vmul.f32 %v1061_v42, %v4106_v30 }
 0x211   : > { %v567_v17 = vsub.f32 %v555_v14, %v565_v12  ;;  %631 = vst.msk [vmem:[#allocation4 + $0x8] sm:$0xff] %vm445_vm2, %v565_v12 }
 0x212   : > { %576 = vrot.lane.b32.xlu1 %v565_v12, %s3724_s15  ;;  %676 = vrot.lane.b32.xlu0 %v666_v0, %s3726_s17  ;;  %v4201_v45 = vld [vmem:[#allocation4] sm:$0xff]  ;;  %v663_v0 = vpop.permute.xlu1 %662 }
 0x213   : > { %v4204_v3 = vmax.f32 %v4201_v45, %v763_v11  ;;  %v570_v34 = vmul.f32 1.442695, %v567_v17 }
 0x215   : > { %834 = vst.msk [vmem:[#allocation4] sm:$0xff] %vm445_vm2, %v4204_v3  ;;  %3493 = vpow2.f32 %v570_v34  ;;  %v765_v34 = vpop.permute.xlu0 %764 }
 0x216   : > { %1068 = vrot.lane.b32.xlu1 %v4207_v37, %s3727_s18  ;;  %606 = vperm.xlu0 %3387, %v4209_v60  }
 0x218   : > { %v657_v11 = vld [vmem:[#allocation4 + $0x8] sm:$0xff] }
 0x219   : > { %v4218_v48 = vpop.eup %3491  ;;  %v667_v47 = vmax.f32 %v657_v11, %v663_v0  ;;  %v4238_v0 = vmul.f32 %v4168_v55, %v4106_v30  ;;  %v4254_v55 = vmul.f32 %v4166_v51, %v4090_v54  ;;  %v4269_v51 = vmul.f32 %v4181_v15, %v4090_v54 }
 0x21a   : > { %708 = vperm.xlu0 %3387, %v4218_v48   ;;  %v4286_v15 = vmul.f32 %v4179_v49, %v4106_v30  ;;  %v4303_v49 = vmul.f32 %v4184_v13, %v4090_v54 }
 0x21b   : > { %v669_v14 = vsub.f32 %v657_v11, %v667_v47  ;;  %733 = vst.msk [vmem:[#allocation4 + $0x8] sm:$0xff] %vm445_vm2, %v667_v47  ;;  %678 = vrot.lane.b32.xlu1 %v667_v47, %s3726_s17 }
 0x21c   : > { %v4290_v7 = vld [vmem:[#allocation4] sm:$0xff] }
 0x21d   : > { %v672_v12 = vmul.f32 1.442695, %v669_v14  ;;  %v4258_v14 = vmul.f32 %v4172_v56, %v4106_v30 }
 0x21f   : > { %3495 = vpow2.f32 %v672_v12  ;;  %1070 = vrot.lane.b32.xlu1 %v4224_v38, %s3727_s18  ;;  %v4228_v17 = vpop.eup %3493 }
 0x222   : > { %v4230_v18 = vld [vmem:[#allocation4 + $0x8] sm:$0xff] }
 0x223   : > { %611 = vperm.xlu1 %3386, %v4228_v17   ;;  %v4234_v11 = vmax.f32 %v4230_v18, %v765_v34 }
 0x225   : > { %835 = vst.msk [vmem:[#allocation4 + $0x8] sm:$0xff] %vm445_vm2, %v4234_v11 }
 0x227   : > { %1172 = vrot.lane.b32.xlu1 %v4238_v0, %s3728_s24 }
 0x228   : > { %3388 = vset.pattern.permute.xlu1 %v6051_v1 }
 0x229   : > { %v4247_v47 = vpop.eup %3495 }
 0x22a   : > { %713 = vperm.xlu0 %3387, %v4247_v47  }
 0x22b   : > { %780 = vrot.lane.b32.xlu1 %v4234_v11, %s3729_s25 }
 0x22c   : > { %v4273_v12 = vld [vmem:[#allocation4 + $0x8] sm:$0xff] }
 0x22e   : > { %1170 = vrot.lane.b32.xlu0 %v4254_v55, %s3728_s24 }
 0x22f   : > { %1274 = vrot.lane.b32.xlu1 %v4258_v14, %s3730_s27  ;;  %3389 = vset.pattern.permute.xlu0 %v6051_v1 }
 0x232   : > { %778 = vrot.lane.b32.xlu0 %v4204_v3, %s3729_s25 }
 0x236   : > { %1272 = vrot.lane.b32.xlu0 %v4269_v51, %s3730_s27 }
 0x240   : > { %v1469_v56 = vpop.xlane.xlu0 %1468 }
 0x244   : > { %v867_v34 = vpop.permute.xlu0 %866 }
 0x245   : > { %v4276_v10 = vmax.f32 %v4273_v12, %v867_v34 }
 0x247   : > { %937 = vst.msk [vmem:[#allocation4 + $0x8] sm:$0xff] %vm445_vm2, %v4276_v10  ;;  %882 = vrot.lane.b32.xlu1 %v4276_v10, %s6098_s28 }
 0x24b   : > { %1376 = vrot.lane.b32.xlu1 %v4286_v15, %s3732_s30 }
 0x251   : > { %v1466_v34 = vpop.xlane.xlu1 %1465 }
 0x255   : > { %v865_v9 = vpop.permute.xlu1 %864 }
 0x256   : > { %v4293_v1 = vmax.f32 %v4290_v7, %v865_v9  ;;  %v498_v9 = vld [vmem:[#allocation3] sm:$0xff] }
 0x258   : > { %936 = vst.msk [vmem:[#allocation4] sm:$0xff] %vm445_vm2, %v4293_v1  ;;  %880 = vrot.lane.b32.xlu0 %v4293_v1, %s6098_s28  ;;  %s4802_s28 = scalar_lea.vmem %s6018_s4, %s3806_s23  ;;  %s6254_s23 = smov 4  }
 0x25c   : > { %1374 = vrot.lane.b32.xlu0 %v4303_v49, %s3732_s30 }
 0x275   : > { %v1571_v16 = vpop.xlane.xlu0 %1570 }
 0x27d   : > { %v503_v42 = vpop.permute.xlu0 %502 }
 0x27e   : > { %v510_v46 = vmul.f32 %v503_v42, %v498_v9  ;;  %v4314_v42 = vld [vmem:[#allocation4 + $0x8] sm:$0xff] }
 0x281   : > { %v515_v41 = vpop.permute.xlu0 %514 }
 0x282   : > { %v522_v2 = vsel %vm460_vm6, %v515_v41, 0.0  ;;  %v4319_v41 = vld [vmem:[#allocation4] sm:$0xff] }
 0x283   : > { %v524_v53 = vadd.f32 %v522_v2, %v510_v46 }
 0x285   : > { %526 = vst.msk [vmem:[#allocation3] sm:$0xff] %vm393_vm0, %v524_v53  ;;  %v520_v52 = vpop.permute.xlu0 %519 }
 0x286   : > { %v1568_v36 = vpop.xlane.xlu1 %1567  ;;  %v523_v6 = vsel %vm461_vm10, %v520_v52, 0.0 }
 0x289   : > { %v575_v13 = vpop.permute.xlu0 %574 }
 0x28a   : > { %v508_v25 = vpop.permute.xlu1 %507  ;;  %v580_v5 = vsub.f32 %v4094_v59, %v575_v13 }
 0x28b   : > { %v511_v28 = vmul.f32 %v508_v25, %v499_v40 }
 0x28d   : > { %v525_v8 = vadd.f32 %v523_v6, %v511_v28  ;;  %v969_v9 = vpop.permute.xlu0 %968  ;;  %v4338_v6 = vmul.f32 %v1469_v56, %v4106_v30  ;;  %v4341_v28 = vmul.f32 %v1466_v34, %v4090_v54 }
 0x28e   : > { %v4317_v20 = vmax.f32 %v4314_v42, %v969_v9  ;;  %v967_v2 = vpop.permute.xlu1 %966 }
 0x28f   : > { %527 = vst.msk [vmem:[#allocation3 + $0x8] sm:$0xff] %vm393_vm0, %v525_v8  ;;  %v4323_v53 = vmax.f32 %v4319_v41, %v967_v2  ;;  %6161 = vst [vmem:[#allocation26_spill] sm:$0xff] %v4338_v6  ;;  %v4363_v2 = vmul.f32 %v1568_v36, %v4090_v54  ;;  %v4383_v54 = vmul.f32 %v1571_v16, %v4106_v30 }
 0x290   : > { %1039 = vst.msk [vmem:[#allocation4 + $0x8] sm:$0xff] %vm445_vm2, %v4317_v20  ;;  %984 = vrot.lane.b32.xlu1 %v4317_v20, %s6070_s6  ;;  %6162 = vst [vmem:[#allocation27_spill] sm:$0xff] %v4341_v28  ;;  %v6166_v30 = vsub.f32 %v4230_v18, %v4234_v11 }
 0x291   : > { %1038 = vst.msk [vmem:[#allocation4] sm:$0xff] %vm445_vm2, %v4323_v53  ;;  %982 = vrot.lane.b32.xlu0 %v4323_v53, %s6070_s6  ;;  %v4349_v46 = vpop.permute.xlu0 %676  ;;  %6163 = vst [vmem:[#allocation28_spill] sm:$0xff] %v4363_v2  ;;  %s3736_s6 = smov 117  }
 0x292   : > { %v577_v8 = vpop.permute.xlu1 %576  ;;  %6164 = vst [vmem:[#allocation29_spill] sm:$0xff] %v4383_v54 }
 0x293   : > { %v581_v39 = vsub.f32 %v4120_v57, %v577_v8 }
 0x294   : > { %1478 = vrot.lane.b32.xlu1 %v4338_v6, %s3734_s8 }
 0x295   : > { %1476 = vrot.lane.b32.xlu0 %v4341_v28, %s3734_s8  ;;  %v584_v13 = vmul.f32 1.442695, %v581_v39 }
 0x296   : > { %v1069_v40 = vpop.permute.xlu1 %1068 }
 0x297   : > { %v4365_v22 = vld [vmem:[#allocation4 + $0x8] sm:$0xff] }
 0x298   : > { %v4347_v52 = vld [vmem:[#allocation4] sm:$0xff] }
 0x299   : > { %v4352_v9 = vmax.f32 %v4347_v52, %v1069_v40  ;;  %v4367_v40 = vpop.permute.xlu0 %606 }
 0x29a   : > { %v4354_v56 = vpop.permute.xlu1 %678 }
 0x29b   : > { %1140 = vst.msk [vmem:[#allocation4] sm:$0xff] %vm445_vm2, %v4352_v9  ;;  %1084 = vrot.lane.b32.xlu0 %v4352_v9, %s6078_s9  ;;  %v683_v28 = vsub.f32 %v4125_v35, %v4354_v56 }
 0x29e   : > { %v1071_v25 = vpop.permute.xlu1 %1070 }
 0x29f   : > { %v4370_v63 = vmax.f32 %v4365_v22, %v1071_v25  ;;  %1578 = vrot.lane.b32.xlu0 %v4363_v2, %s3736_s6  ;;  %v4385_v25 = vpop.permute.xlu0 %708  ;;  %v582_v2 = vmul.f32 1.442695, %v580_v5 }
 0x2a1   : > { %1141 = vst.msk [vmem:[#allocation4 + $0x8] sm:$0xff] %vm445_vm2, %v4370_v63  ;;  %1086 = vrot.lane.b32.xlu1 %v4370_v63, %s6078_s9  ;;  %s6081_s9 = smov 7   ;;  %3497 = vpow2.f32 %v582_v2 }
 0x2a2   : > { %v4380_v36 = vpop.permute.xlu1 %611  ;;  %v4406_v16 = vld [vmem:[#allocation4] sm:$0xff]  ;;  %3499 = vpow2.f32 %v584_v13  ;;  %v6167_v13 = vsub.f32 %v4201_v45, %v4204_v3 }
 0x2a5   : > { %1580 = vrot.lane.b32.xlu1 %v4383_v54, %s3736_s6  ;;  %v774_v54 = vmul.f32 1.442695, %v6166_v30 }
 0x2a6   : > { %v1173_v50 = vpop.permute.xlu1 %1172 }
 0x2a7   : > { %3501 = vpow2.f32 %v774_v54 }
 0x2a8   : > { %v4390_v34 = vld [vmem:[#allocation4 + $0x8] sm:$0xff] }
 0x2a9   : > { %v4393_v43 = vmax.f32 %v4390_v34, %v1173_v50  ;;  %v4395_v33 = vpop.permute.xlu0 %713 }
 0x2aa   : > { %6165 = vst [vmem:[#allocation30_spill] sm:$0xff] %v4395_v33  ;;  %v4404_v59 = vpop.permute.xlu1 %780 }
 0x2ab   : > { %1243 = vst.msk [vmem:[#allocation4 + $0x8] sm:$0xff] %vm445_vm2, %v4393_v43  ;;  %1188 = vrot.lane.b32.xlu1 %v4393_v43, %s6081_s9  ;;  %v3498_v30 = vpop.eup %3497 }
 0x2ac   : > { %v3500_v54 = vpop.eup %3499 }
 0x2ad   : > { %v1171_v50 = vpop.permute.xlu0 %1170 }
 0x2ae   : > { %v4409_v5 = vmax.f32 %v4406_v16, %v1171_v50  ;;  %v1275_v39 = vpop.permute.xlu1 %1274 }
 0x2b0   : > { %1242 = vst.msk [vmem:[#allocation4] sm:$0xff] %vm445_vm2, %v4409_v5  ;;  %1186 = vrot.lane.b32.xlu0 %v4409_v5, %s6081_s9  ;;  %s6088_s9 = smov 8  }
 0x2b1   : > { %v4417_v8 = vpop.permute.xlu0 %778 }
 0x2b2   : > { %v4422_v2 = vld [vmem:[#allocation4 + $0x8] sm:$0xff] }
 0x2b3   : > { %v4425_v50 = vmax.f32 %v4422_v2, %v1275_v39  ;;  %v772_v39 = vmul.f32 1.442695, %v6167_v13  ;;  %v4457_v13 = vpop.eup %3501 }
 0x2b4   : > { %6169 = vst [vmem:[#allocation31_spill] sm:$0xff] %v4457_v13 }
 0x2b5   : > { %1345 = vst.msk [vmem:[#allocation4 + $0x8] sm:$0xff] %vm445_vm2, %v4425_v50  ;;  %1290 = vrot.lane.b32.xlu1 %v4425_v50, %s6088_s9  ;;  %v1273_v11 = vpop.permute.xlu0 %1272  ;;  %3503 = vpow2.f32 %v772_v39  ;;  %v682_v39 = vsub.f32 %v4103_v29, %v4349_v46  ;;  %v6172_v29 = vmov 3   ;;  %v686_v46 = vmul.f32 1.442695, %v683_v28 }
 0x2b6   : > { %v6173_v28 = vsub.f32 %v4290_v7, %v4293_v1 }
 0x2b7   : > { %v4433_v18 = vld [vmem:[#allocation4] sm:$0xff] }
 0x2b8   : > { %v4439_v32 = vmax.f32 %v4433_v18, %v1273_v11  ;;  %v6168_v11 = vmov 0   ;;  %v874_v56 = vmul.f32 1.442695, %v6173_v28 }
 0x2b9   : > { %v4441_v57 = vpop.permute.xlu1 %882  ;;  %617 = vperm.xlu1 %3388, %v3498_v30  }
 0x2ba   : > { %1344 = vst.msk [vmem:[#allocation4] sm:$0xff] %vm445_vm2, %v4439_v32  ;;  %1288 = vrot.lane.b32.xlu0 %v4439_v32, %s6088_s9  ;;  %s6092_s9 = smov 9  }
 0x2bc   : > { %v4449_v6 = vld [vmem:[#allocation4 + $0x8] sm:$0xff] }
 0x2bd   : > { %v1377_v45 = vpop.permute.xlu1 %1376  ;;  %594 = vrot.lane.b32.xlu1 %v3500_v54, %s3720_s11 }
 0x2be   : > { %v4453_v3 = vmax.f32 %v4449_v6, %v1377_v45  ;;  %592 = vrot.lane.b32.xlu0 %v3498_v30, %s3720_s11  ;;  %3391 = vset.pattern.permute.xlu1 %v6168_v11  ;;  %v6170_v45 = vmov 2   ;;  %v684_v30 = vmul.f32 1.442695, %v682_v39 }
 0x2bf   : > { %v4467_v27 = vpop.eup %3503 }
 0x2c0   : > { %1447 = vst.msk [vmem:[#allocation4 + $0x8] sm:$0xff] %vm445_vm2, %v4453_v3  ;;  %6171 = vst [vmem:[#allocation32_spill] sm:$0xff] %v4467_v27  ;;  %3505 = vpow2.f32 %v684_v30 }
 0x2c1   : > { %815 = vperm.xlu1 %3391, %v4457_v13   ;;  %3507 = vpow2.f32 %v686_v46 }
 0x2c2   : > { %621 = vperm.xlu0 %3389, %v3500_v54   ;;  %v4476_v54 = vld [vmem:[#allocation4] sm:$0xff]  ;;  %3509 = vpow2.f32 %v874_v56 }
 0x2c5   : > { %3392 = vset.pattern.permute.xlu1 %v6170_v45  ;;  %v784_v45 = vsub.f32 %v4100_v26, %v4417_v8  ;;  %v887_v8 = vsub.f32 %v4146_v61, %v4441_v57 }
 0x2c6   : > { %3390 = vset.pattern.permute.xlu0 %v6168_v11 }
 0x2c7   : > { %810 = vperm.xlu0 %3390, %v4467_v27   ;;  %v786_v46 = vmul.f32 1.442695, %v784_v45 }
 0x2ca   : > { %v881_v23 = vpop.permute.xlu0 %880  ;;  %v3506_v35 = vpop.eup %3505 }
 0x2cb   : > { %1392 = vrot.lane.b32.xlu0 %v4453_v3, %s6092_s9  ;;  %v3508_v30 = vpop.eup %3507  ;;  %v886_v45 = vsub.f32 %v4151_v62, %v881_v23  ;;  %v6176_v23 = vsub.f32 %v4314_v42, %v4317_v20 }
 0x2cc   : > { %3396 = vset.pattern.permute.xlu0 %v6172_v29  ;;  %v4497_v33 = vpop.eup %3509 }
 0x2cd   : > { %v888_v56 = vmul.f32 1.442695, %v886_v45  ;;  %v978_v62 = vmul.f32 1.442695, %v6176_v23  ;;  %v6177_v45 = vmov 4   ;;  %v6179_v23 = vsub.f32 %v4347_v52, %v4352_v9 }
 0x2ce   : > { %v1375_v13 = vpop.permute.xlu0 %1374 }
 0x2cf   : > { %v4479_v39 = vmax.f32 %v4476_v54, %v1375_v13  ;;  %v6174_v13 = vsub.f32 %v4273_v12, %v4276_v10  ;;  %v785_v10 = vsub.f32 %v4113_v44, %v4404_v59 }
 0x2d1   : > { %1446 = vst.msk [vmem:[#allocation4] sm:$0xff] %vm445_vm2, %v4479_v39  ;;  %1390 = vrot.lane.b32.xlu1 %v4479_v39, %s6092_s9  ;;  %v876_v27 = vmul.f32 1.442695, %v6174_v13  ;;  %v788_v12 = vmul.f32 1.442695, %v785_v10  ;;  %s6094_s9 = smov 10  }
 0x2d3   : > { %3511 = vpow2.f32 %v876_v27  ;;  %v6175_v27 = vsub.f32 %v4319_v41, %v4323_v53 }
 0x2d4   : > { %3513 = vpow2.f32 %v786_v46  ;;  %v4517_v46 = vld [vmem:[#allocation4 + $0x8] sm:$0xff] }
 0x2d5   : > { %694 = vrot.lane.b32.xlu1 %v3506_v35, %s3722_s13  ;;  %v976_v26 = vmul.f32 1.442695, %v6175_v27 }
 0x2d7   : > { %3515 = vpow2.f32 %v976_v26 }
 0x2d8   : > { %3517 = vpow2.f32 %v788_v12  ;;  %v4522_v41 = vld [vmem:[#allocation4] sm:$0xff] }
 0x2d9   : > { %719 = vperm.xlu1 %3392, %v3506_v35   ;;  %v890_v35 = vmul.f32 1.442695, %v887_v8 }
 0x2db   : > { %3519 = vpow2.f32 %v890_v35 }
 0x2dc   : > { %3521 = vpow2.f32 %v888_v56  ;;  %v6178_v56 = vsub.f32 %v4365_v22, %v4370_v63  ;;  %v6181_v22 = vsub.f32 %v4406_v16, %v4409_v5 }
 0x2dd   : > { %696 = vrot.lane.b32.xlu1 %v3508_v30, %s3722_s13  ;;  %v4501_v1 = vpop.eup %3511  ;;  %3523 = vpow2.f32 %v978_v62  ;;  %v1078_v62 = vmul.f32 1.442695, %v6179_v23 }
 0x2de   : > { %v4504_v7 = vpop.eup %3513  ;;  %v1180_v52 = vmul.f32 1.442695, %v6181_v22 }
 0x2e1   : > { %723 = vperm.xlu1 %3392, %v3508_v30   ;;  %v4544_v20 = vpop.eup %3515 }
 0x2e2   : > { %v4546_v27 = vpop.eup %3517 }
 0x2e5   : > { %3393 = vset.pattern.permute.xlu1 %v6168_v11  ;;  %v4550_v8 = vpop.eup %3519 }
 0x2e6   : > { %912 = vperm.xlu1 %3393, %v4497_v33  }
 0x2ea   : > { %917 = vperm.xlu1 %3393, %v4501_v1  }
 0x2ee   : > { %3394 = vset.pattern.permute.xlu1 %v6172_v29 }
 0x2ef   : > { %821 = vperm.xlu1 %3394, %v4504_v7  }
 0x2f3   : > { %3395 = vset.pattern.permute.xlu1 %v6168_v11 }
 0x302   : > { %v985_v30 = vpop.permute.xlu1 %984 }
 0x303   : > { %v983_v28 = vpop.permute.xlu0 %982  ;;  %v989_v42 = vsub.f32 %v4189_v58, %v985_v30  ;;  %v4555_v58 = vpop.eup %3521 }
 0x304   : > { %v988_v57 = vsub.f32 %v4192_v4, %v983_v28  ;;  %v4576_v63 = vpop.eup %3523 }
 0x305   : > { %v992_v12 = vmul.f32 1.442695, %v989_v42  ;;  %v6180_v42 = vmov -1e+30  }
 0x306   : > { %v1479_v13 = vpop.permute.xlu1 %1478  ;;  %v990_v4 = vmul.f32 1.442695, %v988_v57 }
 0x307   : > { %v4520_v44 = vmax.f32 %v4517_v46, %v1479_v13  ;;  %v1477_v53 = vpop.permute.xlu0 %1476  ;;  %v1080_v13 = vmul.f32 1.442695, %v6178_v56 }
 0x308   : > { %v4525_v61 = vmax.f32 %v4522_v41, %v1477_v53  ;;  %3525 = vpow2.f32 %v990_v4 }
 0x309   : > { %v1485_v59 = vsub.f32 %v4517_v46, %v4520_v44  ;;  %1549 = vst.msk [vmem:[#allocation4 + $0x8] sm:$0xff] %vm445_vm2, %v4520_v44  ;;  %1494 = vrot.lane.b32.xlu1 %v4520_v44, %s6094_s9  ;;  %3527 = vpow2.f32 %v992_v12 }
 0x30a   : > { %v1484_v10 = vsub.f32 %v4522_v41, %v4525_v61  ;;  %1548 = vst.msk [vmem:[#allocation4] sm:$0xff] %vm445_vm2, %v4525_v61  ;;  %1492 = vrot.lane.b32.xlu0 %v4525_v61, %s6094_s9  ;;  %s6096_s9 = smov 11   ;;  %3529 = vpow2.f32 %v1080_v13 }
 0x30b   : > { %3531 = vpow2.f32 %v1078_v62  ;;  %v6183_v62 = vsub.f32 %v4390_v34, %v4393_v43  ;;  %v6184_v34 = vmov 6  }
 0x30c   : > { %3533 = vpow2.f32 %v1180_v52 }
 0x30d   : > { %1014 = vperm.xlu1 %3395, %v4544_v20   ;;  %v1085_v26 = vpop.permute.xlu0 %1084 }
 0x30e   : > { %825 = vperm.xlu0 %3396, %v4546_v27   ;;  %v1090_v57 = vsub.f32 %v4207_v37, %v1085_v26  ;;  %v6182_v37 = vmov 5  }
 0x310   : > { %v4581_v4 = vld [vmem:[#allocation4 + $0x8] sm:$0xff]  ;;  %v1092_v12 = vmul.f32 1.442695, %v1090_v57  ;;  %v1182_v57 = vmul.f32 1.442695, %v6183_v62  ;;  %v6187_v62 = vsub.f32 %v4433_v18, %v4439_v32 }
 0x311   : > { %3399 = vset.pattern.permute.xlu1 %v6177_v45  ;;  %v4553_v35 = vld [vmem:[#allocation4] sm:$0xff]  ;;  %v1579_v28 = vpop.permute.xlu0 %1578 }
 0x312   : > { %v4558_v30 = vmax.f32 %v4553_v35, %v1579_v28  ;;  %927 = vperm.xlu1 %3399, %v4550_v8   ;;  %3397 = vset.pattern.permute.xlu0 %v6177_v45  ;;  %v4598_v5 = vpop.eup %3525  ;;  %3535 = vpow2.f32 %v1092_v12 }
 0x313   : > { %v1087_v53 = vpop.permute.xlu1 %1086  ;;  %923 = vperm.xlu0 %3397, %v4555_v58   ;;  %v4601_v56 = vpop.eup %3527 }
 0x314   : > { %1650 = vst.msk [vmem:[#allocation4] sm:$0xff] %vm445_vm2, %v4558_v30  ;;  %v1091_v28 = vsub.f32 %v4224_v38, %v1087_v53  ;;  %v4605_v53 = vpop.eup %3529 }
 0x315   : > { %1794 = vst.msk [vmem:[#allocation4] sm:$0xff] %vm445_vm2, %v6180_v42  ;;  %v4608_v23 = vpop.eup %3531 }
 0x316   : > { %1594 = vrot.lane.b32.xlu1 %v4558_v30, %s6096_s9  ;;  %v1094_v38 = vmul.f32 1.442695, %v1091_v28 }
 0x317   : > { %v1581_v9 = vpop.permute.xlu1 %1580  ;;  %3398 = vset.pattern.permute.xlu0 %v6168_v11  ;;  %3401 = vset.pattern.permute.xlu1 %v6182_v37 }
 0x318   : > { %v4586_v26 = vmax.f32 %v4581_v4, %v1581_v9  ;;  %1019 = vperm.xlu0 %3398, %v4576_v63   ;;  %3537 = vpow2.f32 %v1094_v38  ;;  %v4618_v9 = vpop.eup %3533  ;;  %v6185_v38 = vsub.f32 %v4422_v2, %v4425_v50 }
 0x319   : > { %3539 = vpow2.f32 %v1182_v57  ;;  %v1282_v57 = vmul.f32 1.442695, %v6187_v62 }
 0x31a   : > { %1651 = vst.msk [vmem:[#allocation4 + $0x8] sm:$0xff] %vm445_vm2, %v4586_v26  ;;  %1596 = vrot.lane.b32.xlu1 %v4586_v26, %s6096_s9  ;;  %s3742_s9 = smov 112  }
 0x31b   : > { %1795 = vst.msk [vmem:[#allocation4 + $0x8] sm:$0xff] %vm445_vm2, %v6180_v42 }
 0x31c   : > { %3400 = vset.pattern.permute.xlu0 %v6182_v37  ;;  %v4621_v28 = vpop.eup %3535 }
 0x31d   : > { %1025 = vperm.xlu0 %3400, %v4598_v5   ;;  %v1189_v13 = vpop.permute.xlu1 %1188 }
 0x31e   : > { %1029 = vperm.xlu1 %3401, %v4601_v56   ;;  %v1193_v22 = vsub.f32 %v4238_v0, %v1189_v13  ;;  %v1284_v0 = vmul.f32 1.442695, %v6185_v38 }
 0x320   : > { %v1196_v43 = vmul.f32 1.442695, %v1193_v22 }
 0x321   : > { %3403 = vset.pattern.permute.xlu0 %v6168_v11 }
 0x322   : > { %1121 = vperm.xlu0 %3403, %v4605_v53   ;;  %3402 = vset.pattern.permute.xlu1 %v6168_v11  ;;  %v1187_v42 = vpop.permute.xlu0 %1186  ;;  %v4629_v13 = vpop.eup %3537 }
 0x323   : > { %v1192_v52 = vsub.f32 %v4254_v55, %v1187_v42  ;;  %1116 = vperm.xlu1 %3402, %v4608_v23   ;;  %v6186_v55 = vmov 7   ;;  %v6188_v42 = vsub.f32 %v4476_v54, %v4479_v39  ;;  %v4640_v16 = vpop.eup %3539 }
 0x325   : > { %v1194_v12 = vmul.f32 1.442695, %v1192_v52  ;;  %v1384_v22 = vmul.f32 1.442695, %v6188_v42 }
 0x326   : > { %1218 = vperm.xlu0 %3403, %v4618_v9  }
 0x327   : > { %3541 = vpow2.f32 %v1194_v12  ;;  %3404 = vset.pattern.permute.xlu1 %v6184_v34  ;;  %v1291_v52 = vpop.permute.xlu1 %1290  ;;  %v586_v12 = vld [vmem:[#allocation5] sm:$0xff] }
 0x328   : > { %1127 = vperm.xlu1 %3404, %v4621_v28   ;;  %3543 = vpow2.f32 %v1196_v43  ;;  %v588_v38 = vmul.f32 %v4209_v60, %v586_v12  ;;  %v1295_v54 = vsub.f32 %v4258_v14, %v1291_v52  ;;  %v602_v14 = vld [vmem:[#allocation3] sm:$0xff] }
 0x329   : > { %3545 = vpow2.f32 %v1284_v0  ;;  %v614_v62 = vmul.f32 %v4367_v40, %v602_v14 }
 0x32a   : > { %3406 = vset.pattern.permute.xlu0 %v6186_v55  ;;  %3547 = vpow2.f32 %v1282_v57  ;;  %v1298_v60 = vmul.f32 1.442695, %v1295_v54 }
 0x32b   : > { %3549 = vpow2.f32 %v1384_v22 }
 0x32c   : > { %1131 = vperm.xlu1 %3404, %v4629_v13   ;;  %v1289_v2 = vpop.permute.xlu0 %1288 }
 0x32d   : > { %v1294_v50 = vsub.f32 %v4269_v51, %v1289_v2 }
 0x32f   : > { %v1296_v39 = vmul.f32 1.442695, %v1294_v50  ;;  %v6189_v50 = vsub.f32 %v4449_v6, %v4453_v3  ;;  %v6190_v6 = vmov 8   ;;  %v6191_v3 = vmov 9  }
 0x330   : > { %3405 = vset.pattern.permute.xlu1 %v6168_v11  ;;  %v593_v32 = vpop.permute.xlu0 %592 }
 0x331   : > { %v4643_v18 = vpop.eup %3541  ;;  %v598_v43 = vadd.f32 %v593_v32, %v588_v38  ;;  %1223 = vperm.xlu1 %3405, %v4640_v16   ;;  %3551 = vpow2.f32 %v1296_v39  ;;  %v1386_v52 = vmul.f32 1.442695, %v6189_v50  ;;  %v587_v38 = vld [vmem:[#allocation5 + $0x8] sm:$0xff] }
 0x332   : > { %1229 = vperm.xlu0 %3406, %v4643_v18   ;;  %v4649_v51 = vpop.eup %3543  ;;  %3553 = vpow2.f32 %v1298_v60  ;;  %v589_v40 = vmul.f32 %v4228_v17, %v587_v38  ;;  %v603_v39 = vld [vmem:[#allocation3 + $0x8] sm:$0xff] }
 0x333   : > { %600 = vst.msk [vmem:[#allocation5] sm:$0xff] %vm445_vm2, %v598_v43  ;;  %v4652_v0 = vpop.eup %3545  ;;  %3555 = vpow2.f32 %v1386_v52  ;;  %v615_v17 = vmul.f32 %v4380_v36, %v603_v39 }
 0x334   : > { %v4658_v42 = vpop.eup %3547 }
 0x335   : > { %3407 = vset.pattern.permute.xlu1 %v6186_v55  ;;  %v4663_v2 = vpop.eup %3549 }
 0x336   : > { %1233 = vperm.xlu1 %3407, %v4649_v51   ;;  %3409 = vset.pattern.permute.xlu0 %v6168_v11 }
 0x337   : > { %1325 = vperm.xlu0 %3409, %v4652_v0  }
 0x338   : > { %v618_v57 = vpop.permute.xlu1 %617 }
 0x339   : > { %v624_v22 = vsel %vm540_vm3, %v618_v57, 0.0 }
 0x33a   : > { %v626_v12 = vadd.f32 %v624_v22, %v614_v62  ;;  %3408 = vset.pattern.permute.xlu1 %v6168_v11  ;;  %v688_v50 = vld [vmem:[#allocation5] sm:$0xff] }
 0x33b   : > { %1320 = vperm.xlu1 %3408, %v4658_v42   ;;  %1422 = vperm.xlu0 %3409, %v4663_v2   ;;  %v4673_v54 = vpop.eup %3551  ;;  %v690_v36 = vmul.f32 %v4218_v48, %v688_v50 }
 0x33c   : > { %628 = vst.msk [vmem:[#allocation3] sm:$0xff] %vm393_vm0, %v626_v12  ;;  %v595_v24 = vpop.permute.xlu1 %594  ;;  %v4685_v62 = vpop.eup %3553 }
 0x33d   : > { %v599_v32 = vadd.f32 %v595_v24, %v589_v40  ;;  %v4691_v40 = vpop.eup %3555 }
 0x33f   : > { %601 = vst.msk [vmem:[#allocation5 + $0x8] sm:$0xff] %vm445_vm2, %v599_v32  ;;  %3410 = vset.pattern.permute.xlu1 %v6190_v6  ;;  %3412 = vset.pattern.permute.xlu0 %v6191_v3  ;;  %v1488_v32 = vmul.f32 1.442695, %v1485_v59 }
 0x340   : > { %v4678_v43 = vpop.permute.xlu1 %815  ;;  %1331 = vperm.xlu1 %3410, %v4673_v54  }
 0x341   : > { %v622_v60 = vpop.permute.xlu0 %621 }
 0x342   : > { %v625_v14 = vsel %vm541_vm12, %v622_v60, 0.0 }
 0x343   : > { %v627_v57 = vadd.f32 %v625_v14, %v615_v17  ;;  %v1486_v14 = vmul.f32 1.442695, %v1484_v10  ;;  %v704_v44 = vld [vmem:[#allocation3] sm:$0xff] }
 0x344   : > { %v1391_v22 = vpop.permute.xlu1 %1390  ;;  %1335 = vperm.xlu1 %3410, %v4685_v62  }
 0x345   : > { %629 = vst.msk [vmem:[#allocation3 + $0x8] sm:$0xff] %vm393_vm0, %v627_v57  ;;  %v1396_v52 = vsub.f32 %v4303_v49, %v1391_v22  ;;  %v1586_v49 = vsub.f32 %v4553_v35, %v4558_v30 }
 0x346   : > { %v811_v12 = vpop.permute.xlu0 %810  ;;  %v689_v30 = vld [vmem:[#allocation5 + $0x8] sm:$0xff] }
 0x347   : > { %v1398_v38 = vmul.f32 1.442695, %v1396_v52  ;;  %v1588_v60 = vmul.f32 1.442695, %v1586_v49  ;;  %v691_v10 = vmul.f32 %v4247_v47, %v689_v30 }
 0x348   : > { %v695_v24 = vpop.permute.xlu1 %694  ;;  %3411 = vset.pattern.permute.xlu1 %v6168_v11 }
 0x349   : > { %3557 = vpow2.f32 %v1398_v38  ;;  %v700_v19 = vadd.f32 %v695_v24, %v690_v36  ;;  %1427 = vperm.xlu1 %3411, %v4691_v40   ;;  %v6192_v36 = vld [vmem:[#allocation30_spill] sm:$0xff] }
 0x34a   : > { %v1393_v39 = vpop.permute.xlu0 %1392  ;;  %3559 = vpow2.f32 %v1488_v32  ;;  %v6194_v32 = vmov 11  }
 0x34b   : > { %702 = vst.msk [vmem:[#allocation5] sm:$0xff] %vm445_vm2, %v700_v19  ;;  %v1397_v48 = vsub.f32 %v4286_v15, %v1393_v39  ;;  %v716_v15 = vmul.f32 %v4385_v25, %v704_v44  ;;  %v6195_v39 = vmov 10  }
 0x34c   : > { %v705_v52 = vld [vmem:[#allocation3 + $0x8] sm:$0xff] }
 0x34d   : > { %v1400_v17 = vmul.f32 1.442695, %v1397_v48  ;;  %3413 = vset.pattern.permute.xlu1 %v6191_v3  ;;  %v717_v47 = vmul.f32 %v6192_v36, %v705_v52 }
 0x34f   : > { %3561 = vpow2.f32 %v1400_v17 }
 0x350   : > { %3563 = vpow2.f32 %v1588_v60 }
 0x351   : > { %3565 = vpow2.f32 %v1486_v14 }
 0x353   : > { %v4706_v46 = vpop.eup %3557 }
 0x354   : > { %1433 = vperm.xlu0 %3412, %v4706_v46   ;;  %v4709_v59 = vpop.eup %3559 }
 0x358   : > { %v720_v35 = vpop.permute.xlu1 %719  ;;  %3415 = vset.pattern.permute.xlu0 %v6168_v11 }
 0x359   : > { %v4713_v57 = vpop.eup %3561  ;;  %v726_v41 = vsel %vm642_vm4, %v720_v35, 0.0  ;;  %1529 = vperm.xlu0 %3415, %v4709_v59  }
 0x35a   : > { %v728_v61 = vadd.f32 %v726_v41, %v716_v15  ;;  %1437 = vperm.xlu1 %3413, %v4713_v57   ;;  %v4721_v22 = vpop.eup %3563 }
 0x35b   : > { %v4725_v38 = vpop.eup %3565 }
 0x35c   : > { %730 = vst.msk [vmem:[#allocation3] sm:$0xff] %vm393_vm0, %v728_v61  ;;  %v697_v25 = vpop.permute.xlu1 %696 }
 0x35d   : > { %v701_v50 = vadd.f32 %v697_v25, %v691_v10  ;;  %1626 = vperm.xlu0 %3415, %v4721_v22   ;;  %v6197_v10 = vld [vmem:[#allocation26_spill] sm:$0xff] }
 0x35e   : > { %3414 = vset.pattern.permute.xlu1 %v6168_v11 }
 0x35f   : > { %703 = vst.msk [vmem:[#allocation5 + $0x8] sm:$0xff] %vm445_vm2, %v701_v50  ;;  %1524 = vperm.xlu1 %3414, %v4725_v38   ;;  %v6198_v50 = vld [vmem:[#allocation27_spill] sm:$0xff] }
 0x360   : > { %v724_v21 = vpop.permute.xlu1 %723 }
 0x361   : > { %v727_v19 = vsel %vm643_vm13, %v724_v21, 0.0  ;;  %3418 = vset.pattern.permute.xlu0 %v6194_v32 }
 0x362   : > { %v729_v49 = vadd.f32 %v727_v19, %v717_v47 }
 0x363   : > { %3416 = vset.pattern.permute.xlu1 %v6195_v39  ;;  %v806_v60 = vld [vmem:[#allocation3] sm:$0xff] }
 0x364   : > { %731 = vst.msk [vmem:[#allocation3 + $0x8] sm:$0xff] %vm393_vm0, %v729_v49  ;;  %v818_v44 = vmul.f32 %v811_v12, %v806_v60  ;;  %v6199_v12 = vsub.f32 %v4581_v4, %v4586_v26 }
 0x365   : > { %v913_v48 = vpop.permute.xlu1 %912 }
 0x366   : > { %v1590_v47 = vmul.f32 1.442695, %v6199_v12 }
 0x369   : > { %v918_v17 = vpop.permute.xlu1 %917 }
 0x36b   : > { %v807_v24 = vld [vmem:[#allocation3 + $0x8] sm:$0xff] }
 0x36c   : > { %v819_v60 = vmul.f32 %v4678_v43, %v807_v24 }
 0x36e   : > { %v822_v14 = vpop.permute.xlu1 %821 }
 0x36f   : > { %v828_v35 = vsel %vm744_vm5, %v822_v14, 0.0 }
 0x370   : > { %v830_v30 = vadd.f32 %v828_v35, %v818_v44 }
 0x372   : > { %832 = vst.msk [vmem:[#allocation3] sm:$0xff] %vm393_vm0, %v830_v30 }
 0x37b   : > { %v1495_v41 = vpop.permute.xlu1 %1494 }
 0x37c   : > { %v1493_v61 = vpop.permute.xlu0 %1492  ;;  %v1499_v25 = vsub.f32 %v6197_v10, %v1495_v41  ;;  %v908_v41 = vld [vmem:[#allocation3] sm:$0xff] }
 0x37d   : > { %v1498_v52 = vsub.f32 %v6198_v50, %v1493_v61  ;;  %v920_v26 = vmul.f32 %v913_v48, %v908_v41 }
 0x37e   : > { %v1502_v36 = vmul.f32 1.442695, %v1499_v25 }
 0x37f   : > { %v1500_v21 = vmul.f32 1.442695, %v1498_v52 }
 0x381   : > { %3567 = vpow2.f32 %v1500_v21  ;;  %v6202_v21 = vld [vmem:[#allocation28_spill] sm:$0xff] }
 0x382   : > { %3569 = vpow2.f32 %v1502_v36 }
 0x383   : > { %3571 = vpow2.f32 %v1590_v47 }
 0x38b   : > { %v4746_v19 = vpop.eup %3567 }
 0x38c   : > { %v1015_v49 = vpop.permute.xlu1 %1014  ;;  %1535 = vperm.xlu1 %3416, %v4746_v19   ;;  %v4753_v35 = vpop.eup %3569 }
 0x38d   : > { %v826_v14 = vpop.permute.xlu0 %825  ;;  %v4760_v25 = vpop.eup %3571 }
 0x38e   : > { %v829_v15 = vsel %vm745_vm7, %v826_v14, 0.0 }
 0x38f   : > { %v831_v30 = vadd.f32 %v829_v15, %v819_v60  ;;  %v6204_v15 = vld [vmem:[#allocation29_spill] sm:$0xff] }
 0x390   : > { %1539 = vperm.xlu1 %3416, %v4753_v35  }
 0x391   : > { %833 = vst.msk [vmem:[#allocation3 + $0x8] sm:$0xff] %vm393_vm0, %v831_v30  ;;  %v928_v4 = vpop.permute.xlu1 %927 }
 0x392   : > { %v924_v61 = vpop.permute.xlu0 %923  ;;  %v931_v44 = vsel %vm847_vm9, %v928_v4, 0.0 }
 0x393   : > { %v930_v43 = vsel %vm846_vm8, %v924_v61, 0.0 }
 0x394   : > { %v932_v50 = vadd.f32 %v930_v43, %v920_v26  ;;  %3417 = vset.pattern.permute.xlu1 %v6168_v11 }
 0x395   : > { %v1595_v52 = vpop.permute.xlu1 %1594  ;;  %1631 = vperm.xlu1 %3417, %v4760_v25  }
 0x396   : > { %934 = vst.msk [vmem:[#allocation3] sm:$0xff] %vm393_vm0, %v932_v50  ;;  %v1600_v36 = vsub.f32 %v6202_v21, %v1595_v52  ;;  %v6205_v50 = vld [vmem:[#allocation12_spill] sm:$0xff] }
 0x397   : > { %v1020_v12 = vpop.permute.xlu0 %1019  ;;  %vm6206_vm3 = vcmp.eq.s32.totalorder %v6205_v50, %v3903_v31 }
 0x398   : > { %v909_v47 = vld [vmem:[#allocation3 + $0x8] sm:$0xff]  ;;  %v1602_v48 = vmul.f32 1.442695, %v1600_v36 }
 0x399   : > { %v921_v24 = vmul.f32 %v918_v17, %v909_v47  ;;  %v1597_v60 = vpop.permute.xlu1 %1596  ;;  %3419 = vset.pattern.permute.xlu1 %v6194_v32 }
 0x39a   : > { %3573 = vpow2.f32 %v1602_v48  ;;  %v1601_v30 = vsub.f32 %v6204_v15, %v1597_v60  ;;  %v6207_v60 = vld [vmem:[#allocation13_spill] sm:$0xff] }
 0x39b   : > { %v933_v41 = vadd.f32 %v931_v44, %v921_v24  ;;  %v3477_v24 = vld [vmem:[%s3830_s7] sm:$0xff]   ;;  %vm6208_vm4 = vcmp.eq.s32.totalorder %v6207_v60, %v3903_v31  ;;  %s6280_s7 = smov 11  }
 0x39c   : > { %v1604_v26 = vmul.f32 1.442695, %v1601_v30  ;;  %v1026_v61 = vpop.permute.xlu0 %1025 }
 0x39d   : > { %935 = vst.msk [vmem:[#allocation3 + $0x8] sm:$0xff] %vm393_vm0, %v933_v41  ;;  %v1010_v10 = vld [vmem:[#allocation3] sm:$0xff]  ;;  %v1030_v43 = vpop.permute.xlu1 %1029  ;;  %v1032_v52 = vsel %vm6206_vm3, %v1026_v61, 0.0  ;;  %v6209_v61 = vmov 1  }
 0x39e   : > { %3575 = vpow2.f32 %v1604_v26  ;;  %v1022_v17 = vmul.f32 %v1015_v49, %v1010_v10  ;;  %v1033_v49 = vsel %vm6208_vm4, %v1030_v43, 0.0  ;;  %v6210_v10 = vld [vmem:[#allocation15_spill] sm:$0xff] }
 0x39f   : > { %vm6211_vm5 = vcmp.eq.s32.totalorder %v6210_v10, %v3903_v31 }
 0x3a0   : > { %v1034_v21 = vadd.f32 %v1032_v52, %v1022_v17 }
 0x3a1   : > { %v1122_v41 = vpop.permute.xlu0 %1121 }
 0x3a2   : > { %1036 = vst.msk [vmem:[#allocation3] sm:$0xff] %vm393_vm0, %v1034_v21  ;;  %v1117_v4 = vpop.permute.xlu1 %1116 }
 0x3a4   : > { %v4776_v36 = vpop.eup %3573  ;;  %v1011_v47 = vld [vmem:[#allocation3 + $0x8] sm:$0xff] }
 0x3a5   : > { %v1023_v48 = vmul.f32 %v1020_v12, %v1011_v47  ;;  %1637 = vperm.xlu0 %3418, %v4776_v36   ;;  %v3478_v12 = vld [vmem:[%s3818_s29] sm:$0xff]   ;;  %v1219_v21 = vpop.permute.xlu0 %1218  ;;  %s6278_s29 = smov 10  }
 0x3a7   : > { %v1035_v14 = vadd.f32 %v1033_v49, %v1023_v48  ;;  %v1128_v44 = vpop.permute.xlu1 %1127  ;;  %v6212_v48 = vld [vmem:[#allocation14_spill] sm:$0xff] }
 0x3a8   : > { %v4783_v15 = vpop.eup %3575  ;;  %v1134_v43 = vsel %vm6211_vm5, %v1128_v44, 0.0  ;;  %vm6213_vm6 = vcmp.eq.s32.totalorder %v6212_v48, %v3903_v31 }
 0x3a9   : > { %1037 = vst.msk [vmem:[#allocation3 + $0x8] sm:$0xff] %vm393_vm0, %v1035_v14  ;;  %v1112_v30 = vld [vmem:[#allocation3] sm:$0xff]  ;;  %1734 = vrot.lane.b32.xlu0 %v3477_v24, %s3742_s9  ;;  %1641 = vperm.xlu1 %3419, %v4783_v15   ;;  %v6214_v14 = vmov 0.0  }
 0x3aa   : > { %v1124_v26 = vmul.f32 %v1117_v4, %v1112_v30  ;;  %3422 = vset.pattern.permute.xlu0 %v6209_v61 }
 0x3ab   : > { %v1132_v17 = vpop.permute.xlu1 %1131 }
 0x3ac   : > { %v1136_v50 = vadd.f32 %v1134_v43, %v1124_v26  ;;  %v1135_v24 = vsel %vm6213_vm6, %v1132_v17, 0.0 }
 0x3ad   : > { %798 = vrot.lane.b32.xlu0 %v4546_v27, %s3721_s12  ;;  %1741 = vrot.lane.b32.xlu1 %v3478_v12, %s3742_s9  ;;  %v3479_v27 = vld [vmem:[%s4802_s28] sm:$0xff]  }
 0x3ae   : > { %1138 = vst.msk [vmem:[#allocation3] sm:$0xff] %vm393_vm0, %v1136_v50  ;;  %3420 = vset.pattern.permute.xlu1 %v6168_v11  ;;  %3286 = vmatpush3.bf16.msra.mxu1 %v3479_v27 }
 0x3af   : > { %3291 = vmatprep.subr.bf16.mxu1 %v6214_v14 }
 0x3b0   : > { %v1113_v52 = vld [vmem:[#allocation3 + $0x8] sm:$0xff]  ;;  %v1224_v4 = vpop.permute.xlu1 %1223 }
 0x3b1   : > { %v1125_v47 = vmul.f32 %v1122_v41, %v1113_v52  ;;  %900 = vrot.lane.b32.xlu0 %v4550_v8, %s3723_s14  ;;  %796 = vrot.lane.b32.xlu1 %v4504_v7, %s3721_s12  ;;  %v1230_v49 = vpop.permute.xlu0 %1229  ;;  %v6215_v8 = vld [vmem:[#allocation17_spill] sm:$0xff] }
 0x3b2   : > { %vm6216_vm7 = vcmp.eq.s32.totalorder %v6215_v8, %v3903_v31 }
 0x3b3   : > { %v1137_v60 = vadd.f32 %v1135_v24, %v1125_v47  ;;  %v1236_v12 = vsel %vm6216_vm7, %v1230_v49, 0.0  ;;  %v6221_v24 = vld [vmem:[#allocation21_spill] sm:$0xff] }
 0x3b5   : > { %1139 = vst.msk [vmem:[#allocation3 + $0x8] sm:$0xff] %vm393_vm0, %v1137_v60  ;;  %v1214_v44 = vld [vmem:[#allocation3] sm:$0xff]  ;;  %v1234_v30 = vpop.permute.xlu1 %1233  ;;  %1002 = vrot.lane.b32.xlu0 %v4601_v56, %s3725_s16  ;;  %898 = vrot.lane.b32.xlu1 %v4555_v58, %s3723_s14  ;;  %v6217_v58 = vld [vmem:[#allocation16_spill] sm:$0xff] }
 0x3b6   : > { %v1226_v7 = vmul.f32 %v1219_v21, %v1214_v44  ;;  %vm6218_vm8 = vcmp.eq.s32.totalorder %v6217_v58, %v3903_v31 }
 0x3b7   : > { %v1237_v43 = vsel %vm6218_vm8, %v1234_v30, 0.0 }
 0x3b8   : > { %v1238_v41 = vadd.f32 %v1236_v12, %v1226_v7  ;;  %v6223_v7 = vld [vmem:[#allocation20_spill] sm:$0xff] }
 0x3b9   : > { %1104 = vrot.lane.b32.xlu0 %v4629_v13, %s3727_s18  ;;  %1000 = vrot.lane.b32.xlu1 %v4598_v5, %s3725_s16  ;;  %vm6224_vm9 = vcmp.eq.s32.totalorder %v6223_v7, %v3903_v31 }
 0x3ba   : > { %1240 = vst.msk [vmem:[#allocation3] sm:$0xff] %vm393_vm0, %v1238_v41  ;;  %v1321_v26 = vpop.permute.xlu1 %1320  ;;  %v6225_v41 = vmov 2  }
 0x3bc   : > { %v1215_v10 = vld [vmem:[#allocation3 + $0x8] sm:$0xff] }
 0x3bd   : > { %v1227_v56 = vmul.f32 %v1224_v4, %v1215_v10  ;;  %1206 = vrot.lane.b32.xlu0 %v4649_v51, %s3728_s24  ;;  %1102 = vrot.lane.b32.xlu1 %v4621_v28, %s3727_s18 }
 0x3bf   : > { %v1239_v17 = vadd.f32 %v1237_v43, %v1227_v56  ;;  %v1332_v13 = vpop.permute.xlu1 %1331 }
 0x3c0   : > { %v1338_v28 = vsel %vm1254_vm1, %v1332_v13, 0.0  ;;  %vm6222_vm1 = vcmp.eq.s32.totalorder %v6221_v24, %v3903_v31 }
 0x3c1   : > { %1241 = vst.msk [vmem:[#allocation3 + $0x8] sm:$0xff] %vm393_vm0, %v1239_v17  ;;  %v1316_v5 = vld [vmem:[#allocation3] sm:$0xff]  ;;  %1308 = vrot.lane.b32.xlu0 %v4685_v62, %s3730_s27  ;;  %1204 = vrot.lane.b32.xlu1 %v4643_v18, %s3728_s24  ;;  %v1326_v62 = vpop.permute.xlu0 %1325  ;;  %v6226_v17 = vld [vmem:[#allocation22_spill] sm:$0xff] }
 0x3c2   : > { %v1328_v50 = vmul.f32 %v1321_v26, %v1316_v5  ;;  %v1798_v26 = vld [vmem:[%s3812_s26] sm:$0xff]  ;;  %vm6227_vm10 = vcmp.eq.s32.totalorder %v6226_v17, %v3903_v31 }
 0x3c3   : > { %v1336_v21 = vpop.permute.xlu1 %1335 }
 0x3c4   : > { %v1340_v52 = vadd.f32 %v1338_v28, %v1328_v50  ;;  %v1339_v27 = vsel %vm1255_vm15, %v1336_v21, 0.0  ;;  %v6228_v21 = vld [vmem:[#allocation23_spill] sm:$0xff] }
 0x3c5   : > { %1410 = vrot.lane.b32.xlu0 %v4713_v57, %s3732_s30  ;;  %1306 = vrot.lane.b32.xlu1 %v4673_v54, %s3730_s27  ;;  %v1423_v54 = vpop.permute.xlu0 %1422  ;;  %vm6229_vm12 = vcmp.eq.s32.totalorder %v6228_v21, %v3903_v31 }
 0x3c6   : > { %1342 = vst.msk [vmem:[#allocation3] sm:$0xff] %vm393_vm0, %v1340_v52 }
 0x3c8   : > { %v1317_v4 = vld [vmem:[#allocation3 + $0x8] sm:$0xff]  ;;  %v1428_v49 = vpop.permute.xlu1 %1427 }
 0x3c9   : > { %v1329_v47 = vmul.f32 %v1326_v62, %v1317_v4  ;;  %1512 = vrot.lane.b32.xlu0 %v4753_v35, %s3734_s8  ;;  %1408 = vrot.lane.b32.xlu1 %v4706_v46, %s3732_s30 }
 0x3cb   : > { %v1341_v57 = vadd.f32 %v1339_v27, %v1329_v47 }
 0x3cd   : > { %1343 = vst.msk [vmem:[#allocation3 + $0x8] sm:$0xff] %vm393_vm0, %v1341_v57  ;;  %1614 = vrot.lane.b32.xlu0 %v4783_v15, %s3736_s6  ;;  %1510 = vrot.lane.b32.xlu1 %v4746_v19, %s3734_s8  ;;  %v1418_v48 = vld [vmem:[#allocation3] sm:$0xff] }
 0x3ce   : > { %v1430_v46 = vmul.f32 %v1423_v54, %v1418_v48 }
 0x3d1   : > { %1612 = vrot.lane.b32.xlu1 %v4776_v36, %s3736_s6  ;;  %v1879_v36 = vld [vmem:[%s3812_s26 + $0x8] sm:$0xff]  ;;  %s6260_s26 = smov 5  }
 0x3d2   : > { %1886 = vperm.xlu0 %3422, %v1879_v36  }
 0x3d3   : > { %v1434_v35 = vpop.permute.xlu0 %1433 }
 0x3d4   : > { %v1440_v60 = vsel %vm6222_vm1, %v1434_v35, 0.0  ;;  %v1419_v30 = vld [vmem:[#allocation3 + $0x8] sm:$0xff] }
 0x3d5   : > { %v1442_v44 = vadd.f32 %v1440_v60, %v1430_v46  ;;  %v1431_v15 = vmul.f32 %v1428_v49, %v1419_v30  ;;  %1803 = vperm.xlu1 %3420, %v1798_v26   ;;  %v791_v30 = vld [vmem:[#allocation5 + $0x8] sm:$0xff] }
 0x3d6   : > { %3424 = vset.pattern.permute.xlu0 %v6225_v41 }
 0x3d7   : > { %1444 = vst.msk [vmem:[#allocation3] sm:$0xff] %vm393_vm0, %v1442_v44  ;;  %1988 = vperm.xlu0 %3424, %v1879_v36  }
 0x3d8   : > { %v1530_v51 = vpop.permute.xlu0 %1529 }
 0x3d9   : > { %v1438_v19 = vpop.permute.xlu1 %1437  ;;  %1806 = vperm.xlu1 %3420, %v1879_v36  }
 0x3da   : > { %v1441_v8 = vsel %vm6224_vm9, %v1438_v19, 0.0 }
 0x3db   : > { %v1443_v12 = vadd.f32 %v1441_v8, %v1431_v15  ;;  %3425 = vset.pattern.permute.xlu0 %v6172_v29  ;;  %v6232_v8 = vld [vmem:[#allocation31_spill] sm:$0xff] }
 0x3dc   : > { %2087 = vperm.xlu0 %3425, %v1798_v26   ;;  %v1627_v47 = vpop.permute.xlu0 %1626 }
 0x3dd   : > { %1445 = vst.msk [vmem:[#allocation3 + $0x8] sm:$0xff] %vm393_vm0, %v1443_v12  ;;  %3421 = vset.pattern.permute.xlu1 %v6209_v61  ;;  %v793_v12 = vmul.f32 %v6232_v8, %v791_v30 }
 0x3de   : > { %1883 = vperm.xlu1 %3421, %v1798_v26   ;;  %v1525_v10 = vpop.permute.xlu1 %1524  ;;  %v1520_v56 = vld [vmem:[#allocation3] sm:$0xff] }
 0x3df   : > { %v1532_v58 = vmul.f32 %v1525_v10, %v1520_v56  ;;  %v790_v10 = vld [vmem:[#allocation5] sm:$0xff] }
 0x3e0   : > { %2090 = vperm.xlu0 %3425, %v1879_v36  }
 0x3e2   : > { %3423 = vset.pattern.permute.xlu1 %v6225_v41 }
 0x3e3   : > { %1985 = vperm.xlu1 %3423, %v1798_v26  }
 0x3e4   : > { %3426 = vset.pattern.permute.xlu0 %v6177_v45  ;;  %v1521_v5 = vld [vmem:[#allocation3 + $0x8] sm:$0xff] }
 0x3e5   : > { %2189 = vperm.xlu0 %3426, %v1798_v26   ;;  %v1533_v52 = vmul.f32 %v1530_v51, %v1521_v5 }
 0x3e7   : > { %3428 = vset.pattern.permute.xlu1 %v6182_v37 }
 0x3e8   : > { %2294 = vperm.xlu1 %3428, %v1879_v36  }
 0x3e9   : > { %2192 = vperm.xlu0 %3426, %v1879_v36  }
 0x3ec   : > { %3430 = vset.pattern.permute.xlu1 %v6186_v55 }
 0x3ed   : > { %3427 = vset.pattern.permute.xlu0 %v6182_v37  ;;  %2495 = vperm.xlu1 %3430, %v1798_v26  }
 0x3ee   : > { %2291 = vperm.xlu0 %3427, %v1798_v26  }
 0x3f1   : > { %2498 = vperm.xlu1 %3430, %v1879_v36  }
 0x3f2   : > { %3429 = vset.pattern.permute.xlu0 %v6184_v34 }
 0x3f3   : > { %2393 = vperm.xlu0 %3429, %v1798_v26  }
 0x3f5   : > { %3432 = vset.pattern.permute.xlu1 %v6190_v6 }
 0x3f6   : > { %2600 = vperm.xlu1 %3432, %v1879_v36  }
 0x3f7   : > { %2396 = vperm.xlu0 %3429, %v1879_v36  }
 0x3fa   : > { %3433 = vset.pattern.permute.xlu1 %v6191_v3 }
 0x3fb   : > { %3431 = vset.pattern.permute.xlu0 %v6190_v6  ;;  %2699 = vperm.xlu1 %3433, %v1798_v26  }
 0x3fc   : > { %2597 = vperm.xlu0 %3431, %v1798_v26  }
 0x3ff   : > { %3436 = vset.pattern.permute.xlu1 %v6195_v39 }
 0x400   : > { %3434 = vset.pattern.permute.xlu0 %v6191_v3  ;;  %2804 = vperm.xlu1 %3436, %v1879_v36  }
 0x401   : > { %2702 = vperm.xlu0 %3434, %v1879_v36  }
 0x404   : > { %3438 = vset.pattern.permute.xlu1 %v6194_v32 }
 0x405   : > { %3435 = vset.pattern.permute.xlu0 %v6195_v39  ;;  %2906 = vperm.xlu1 %3438, %v1879_v36  }
 0x406   : > { %2801 = vperm.xlu0 %3435, %v1798_v26  }
 0x409   : > { %3439 = vset.pattern.permute.xlu1 %v6168_v11 }
 0x40a   : > { %3437 = vset.pattern.permute.xlu0 %v6194_v32 }
 0x40b   : > { %v1536_v43 = vpop.permute.xlu1 %1535  ;;  %2903 = vperm.xlu0 %3437, %v1798_v26  }
 0x40c   : > { %v1542_v13 = vsel %vm6227_vm10, %v1536_v43, 0.0 }
 0x40d   : > { %v1544_v50 = vadd.f32 %v1542_v13, %v1532_v58  ;;  %v6233_v58 = vld [vmem:[#allocation32_spill] sm:$0xff] }
 0x40e   : > { %v792_v43 = vmul.f32 %v6233_v58, %v790_v10 }
 0x40f   : > { %1546 = vst.msk [vmem:[#allocation3] sm:$0xff] %vm393_vm0, %v1544_v50  ;;  %v1540_v28 = vpop.permute.xlu1 %1539  ;;  %3440 = vset.pattern.permute.xlu0 %v6168_v11 }
 0x410   : > { %v1543_v4 = vsel %vm6229_vm12, %v1540_v28, 0.0 }
 0x411   : > { %v1545_v62 = vadd.f32 %v1543_v4, %v1533_v52 }
 0x413   : > { %1547 = vst.msk [vmem:[#allocation3 + $0x8] sm:$0xff] %vm393_vm0, %v1545_v62 }
 0x414   : > { %v1632_v27 = vpop.permute.xlu1 %1631 }
 0x416   : > { %v1622_v18 = vld [vmem:[#allocation3] sm:$0xff] }
 0x417   : > { %v1634_v57 = vmul.f32 %v1627_v47, %v1622_v18 }
 0x41a   : > { %v1623_v48 = vld [vmem:[#allocation3 + $0x8] sm:$0xff] }
 0x41b   : > { %v1635_v60 = vmul.f32 %v1632_v27, %v1623_v48 }
 0x424   : > { %v1638_v54 = vpop.permute.xlu0 %1637 }
 0x425   : > { %v1644_v35 = vsel %vm1560_vm14, %v1638_v54, 0.0 }
 0x426   : > { %v1646_v24 = vadd.f32 %v1644_v35, %v1634_v57 }
 0x428   : > { %1648 = vst.msk [vmem:[#allocation3] sm:$0xff] %vm393_vm0, %v1646_v24  ;;  %v1642_v49 = vpop.permute.xlu1 %1641  ;;  %v1735_v44 = vpop.permute.xlu0 %1734 }
 0x429   : > { %v1645_v19 = vsel %vm1561_vm11, %v1642_v49, 0.0  ;;  %vm6234_vm11 = vmmov 0  }
 0x42a   : > { %v1647_v7 = vadd.f32 %v1645_v19, %v1635_v60 }
 0x42c   : > { %1649 = vst.msk [vmem:[#allocation3 + $0x8] sm:$0xff] %vm393_vm0, %v1647_v7  ;;  %v1742_v36 = vpop.permute.xlu1 %1741  ;;  %v799_v26 = vpop.permute.xlu0 %798 }
 0x42d   : > { %v803_v56 = vadd.f32 %v799_v26, %v793_v12  ;;  %v1747_v51 = vsel %vm393_vm0, %v1742_v36, 0 }
 0x42f   : > { %805 = vst.msk [vmem:[#allocation5 + $0x8] sm:$0xff] %vm445_vm2, %v803_v56  ;;  %v1654_v17 = vld [vmem:[#allocation3] sm:$0xff] }
 0x430   : > { %v797_v13 = vpop.permute.xlu1 %796  ;;  %1792 = vst.msk [vmem:[#allocation3] sm:$0xff] %vm393_vm0, %v6214_v14  ;;  %v901_v4 = vpop.permute.xlu0 %900 }
 0x431   : > { %v802_v5 = vadd.f32 %v797_v13, %v792_v43 }
 0x433   : > { %804 = vst.msk [vmem:[#allocation5] sm:$0xff] %vm445_vm2, %v802_v5  ;;  %v1655_v50 = vld [vmem:[#allocation3 + $0x8] sm:$0xff] }
 0x434   : > { %v1656_v28 = vpack.c.bf16 %v1655_v50, %v1654_v17  ;;  %1793 = vst.msk [vmem:[#allocation3 + $0x8] sm:$0xff] %vm393_vm0, %v6214_v14  ;;  %v899_v27 = vpop.permute.xlu1 %898  ;;  %v1003_v48 = vpop.permute.xlu0 %1002 }
 0x436   : > { %v893_v52 = vld [vmem:[#allocation5 + $0x8] sm:$0xff]  ;;  %3288 = vmatmul.mubr.msk.bf16.vlgmr.msra.gmra.mrb[0].mxu1 %vm393_vm0, %v1656_v28 }
 0x437   : > { %v895_v21 = vmul.f32 %v4501_v1, %v893_v52  ;;  %3292 = vmatpush3.bf16.xpose.msra.mxu1 %v1747_v51  ;;  %3293 = vmatprep.mubr.msk.bf16.mxu1 %vm6234_vm11, %v6214_v14 }
 0x438   : > { %v1001_v60 = vpop.permute.xlu1 %1000 }
 0x439   : > { %v905_v62 = vadd.f32 %v901_v4, %v895_v21 }
 0x43a   : > { %v892_v47 = vld [vmem:[#allocation5] sm:$0xff] }
 0x43b   : > { %907 = vst.msk [vmem:[#allocation5 + $0x8] sm:$0xff] %vm445_vm2, %v905_v62  ;;  %v894_v18 = vmul.f32 %v4497_v33, %v892_v47 }
 0x43c   : > { %v1103_v7 = vpop.permute.xlu1 %1102 }
 0x43d   : > { %v904_v57 = vadd.f32 %v899_v27, %v894_v18 }
 0x43e   : > { %3294 = vmatmul.mubr.msk.bf16.vlgmr.msra.gmra.mrb[4].mxu1 %vm393_vm0, %v1735_v44  ;;  %v1105_v44 = vpop.permute.xlu0 %1104 }
 0x43f   : > { %906 = vst.msk [vmem:[#allocation5] sm:$0xff] %vm445_vm2, %v904_v57 }
 0x440   : > { %v1205_v56 = vpop.permute.xlu1 %1204 }
 0x442   : > { %v995_v54 = vld [vmem:[#allocation5 + $0x8] sm:$0xff]  ;;  %v1207_v36 = vpop.permute.xlu0 %1206 }
 0x443   : > { %v997_v1 = vmul.f32 %v4576_v63, %v995_v54 }
 0x444   : > { %v1307_v50 = vpop.permute.xlu1 %1306 }
 0x445   : > { %v1007_v46 = vadd.f32 %v1003_v48, %v997_v1 }
 0x446   : > { %v994_v35 = vld [vmem:[#allocation5] sm:$0xff]  ;;  %v1309_v17 = vpop.permute.xlu0 %1308 }
 0x447   : > { %1009 = vst.msk [vmem:[#allocation5 + $0x8] sm:$0xff] %vm445_vm2, %v1007_v46  ;;  %v996_v24 = vmul.f32 %v4544_v20, %v994_v35 }
 0x448   : > { %v1409_v62 = vpop.permute.xlu1 %1408 }
 0x449   : > { %v1006_v49 = vadd.f32 %v1001_v60, %v996_v24 }
 0x44a   : > { %v1411_v52 = vpop.permute.xlu0 %1410 }
 0x44b   : > { %1008 = vst.msk [vmem:[#allocation5] sm:$0xff] %vm445_vm2, %v1006_v49 }
 0x44c   : > { %v1511_v1 = vpop.permute.xlu1 %1510 }
 0x44e   : > { %v1097_v33 = vld [vmem:[#allocation5 + $0x8] sm:$0xff]  ;;  %v1513_v27 = vpop.permute.xlu0 %1512 }
 0x44f   : > { %v1099_v30 = vmul.f32 %v4605_v53, %v1097_v33 }
 0x450   : > { %v1613_v49 = vpop.permute.xlu1 %1612 }
 0x451   : > { %v1109_v15 = vadd.f32 %v1105_v44, %v1099_v30 }
 0x452   : > { %v1096_v19 = vld [vmem:[#allocation5] sm:$0xff]  ;;  %v1615_v35 = vpop.permute.xlu0 %1614 }
 0x453   : > { %1111 = vst.msk [vmem:[#allocation5 + $0x8] sm:$0xff] %vm445_vm2, %v1109_v15  ;;  %v1098_v63 = vmul.f32 %v4608_v23, %v1096_v19 }
 0x455   : > { %v1108_v8 = vadd.f32 %v1103_v7, %v1098_v63 }
 0x456   : > { %v4966_v63 = vpop.permute.xlu0 %1886 }
 0x457   : > { %1110 = vst.msk [vmem:[#allocation5] sm:$0xff] %vm445_vm2, %v1108_v8  ;;  %vm1889_vm4 = vcmp.eq.s32.totalorder %v4966_v63, %v3903_v31 }
 0x45a   : > { %v1199_v12 = vld [vmem:[#allocation5 + $0x8] sm:$0xff]  ;;  %v4970_v8 = vpop.permute.xlu0 %1988 }
 0x45b   : > { %v1201_v20 = vmul.f32 %v4640_v16, %v1199_v12  ;;  %6237 = vst [vmem:[#allocation8_spill] sm:$0xff] %v4970_v8  ;;  %vm1991_vm7 = vcmp.eq.s32.totalorder %v4970_v8, %v3903_v31 }
 0x45d   : > { %v1211_v26 = vadd.f32 %v1207_v36, %v1201_v20 }
 0x45e   : > { %v1198_v10 = vld [vmem:[#allocation5] sm:$0xff]  ;;  %v4974_v20 = vpop.permute.xlu0 %2087 }
 0x45f   : > { %1213 = vst.msk [vmem:[#allocation5 + $0x8] sm:$0xff] %vm445_vm2, %v1211_v26  ;;  %v1200_v53 = vmul.f32 %v4618_v9, %v1198_v10  ;;  %6239 = vst [vmem:[#allocation27_spill] sm:$0xff] %v4974_v20  ;;  %vm2092_vm5 = vcmp.eq.s32.totalorder %v4974_v20, %v3903_v31 }
 0x461   : > { %v1210_v58 = vadd.f32 %v1205_v56, %v1200_v53 }
 0x462   : > { %v4978_v36 = vpop.permute.xlu0 %2090 }
 0x463   : > { %1212 = vst.msk [vmem:[#allocation5] sm:$0xff] %vm445_vm2, %v1210_v58  ;;  %6241 = vst [vmem:[#allocation11_spill] sm:$0xff] %v4978_v36  ;;  %vm2093_vm1 = vcmp.eq.s32.totalorder %v4978_v36, %v3903_v31  ;;  %v1846_v36 = vld [vmem:[#allocation3] sm:$0xff] }
 0x466   : > { %v1301_v43 = vld [vmem:[#allocation5 + $0x8] sm:$0xff]  ;;  %v4984_v58 = vpop.permute.xlu0 %2189 }
 0x467   : > { %v1303_v23 = vmul.f32 %v4652_v0, %v1301_v43  ;;  %6243 = vst [vmem:[#allocation10_spill] sm:$0xff] %v4984_v58  ;;  %vm2194_vm6 = vcmp.eq.s32.totalorder %v4984_v58, %v3903_v31 }
 0x469   : > { %v1313_v13 = vadd.f32 %v1309_v17, %v1303_v23 }
 0x46a   : > { %v1300_v5 = vld [vmem:[#allocation5] sm:$0xff] }
 0x46b   : > { %1315 = vst.msk [vmem:[#allocation5 + $0x8] sm:$0xff] %vm445_vm2, %v1313_v13  ;;  %v1302_v16 = vmul.f32 %v4658_v42, %v1300_v5  ;;  %v4988_v13 = vpop.permute.xlu0 %2192 }
 0x46c   : > { %6245 = vst [vmem:[#allocation12_spill] sm:$0xff] %v4988_v13 }
 0x46d   : > { %v1312_v51 = vadd.f32 %v1307_v50, %v1302_v16 }
 0x46f   : > { %1314 = vst.msk [vmem:[#allocation5] sm:$0xff] %vm445_vm2, %v1312_v51 }
 0x472   : > { %v1403_v28 = vld [vmem:[#allocation5 + $0x8] sm:$0xff] }
 0x473   : > { %v1405_v9 = vmul.f32 %v4691_v40, %v1403_v28  ;;  %v4996_v28 = vpop.permute.xlu0 %2291 }
 0x474   : > { %6247 = vst [vmem:[#allocation15_spill] sm:$0xff] %v4996_v28  ;;  %vm2296_vm3 = vcmp.eq.s32.totalorder %v4996_v28, %v3903_v31 }
 0x475   : > { %v1415_v21 = vadd.f32 %v1411_v52, %v1405_v9 }
 0x476   : > { %v1402_v4 = vld [vmem:[#allocation5] sm:$0xff] }
 0x477   : > { %1417 = vst.msk [vmem:[#allocation5 + $0x8] sm:$0xff] %vm445_vm2, %v1415_v21  ;;  %v1404_v0 = vmul.f32 %v4663_v2, %v1402_v4 }
 0x479   : > { %v1414_v47 = vadd.f32 %v1409_v62, %v1404_v0 }
 0x47b   : > { %1416 = vst.msk [vmem:[#allocation5] sm:$0xff] %vm445_vm2, %v1414_v47 }
 0x47e   : > { %v1505_v18 = vld [vmem:[#allocation5 + $0x8] sm:$0xff] }
 0x47f   : > { %v1507_v42 = vmul.f32 %v4709_v59, %v1505_v18 }
 0x481   : > { %v1517_v57 = vadd.f32 %v1513_v27, %v1507_v42  ;;  %v5026_v27 = vpop.permute.xlu0 %2393 }
 0x482   : > { %v1504_v54 = vld [vmem:[#allocation5] sm:$0xff]  ;;  %6248 = vst [vmem:[#allocation14_spill] sm:$0xff] %v5026_v27  ;;  %vm6103_vm8 = vcmp.eq.s32.totalorder %v5026_v27, %v3903_v31 }
 0x483   : > { %1519 = vst.msk [vmem:[#allocation5 + $0x8] sm:$0xff] %vm445_vm2, %v1517_v57  ;;  %v1506_v40 = vmul.f32 %v4725_v38, %v1504_v54 }
 0x485   : > { %v1516_v48 = vadd.f32 %v1511_v1, %v1506_v40 }
 0x487   : > { %1518 = vst.msk [vmem:[#allocation5] sm:$0xff] %vm445_vm2, %v1516_v48 }
 0x48a   : > { %v1607_v46 = vld [vmem:[#allocation5 + $0x8] sm:$0xff] }
 0x48b   : > { %v1609_v2 = vmul.f32 %v4760_v25, %v1607_v46  ;;  %v4956_v25 = vpop.permute.xlu1 %1803 }
 0x48c   : > { %vm1808_vm14 = vcmp.eq.s32.totalorder %v4956_v25, %v3903_v31 }
 0x48d   : > { %v1619_v24 = vadd.f32 %v1615_v35, %v1609_v2  ;;  %v5048_v2 = vpop.permute.xlu0 %2396 }
 0x48e   : > { %v1606_v60 = vld [vmem:[#allocation5] sm:$0xff]  ;;  %6249 = vst [vmem:[#allocation17_spill] sm:$0xff] %v5048_v2  ;;  %vm6101_vm10 = vcmp.eq.s32.totalorder %v5048_v2, %v3903_v31 }
 0x48f   : > { %1621 = vst.msk [vmem:[#allocation5 + $0x8] sm:$0xff] %vm445_vm2, %v1619_v24  ;;  %v1608_v59 = vmul.f32 %v4721_v22, %v1606_v60  ;;  %v4958_v44 = vpop.permute.xlu1 %1806 }
 0x490   : > { %vm1809_vm11 = vcmp.eq.s32.totalorder %v4958_v44, %v3903_v31 }
 0x491   : > { %v1618_v33 = vadd.f32 %v1613_v49, %v1608_v59 }
 0x493   : > { %1620 = vst.msk [vmem:[#allocation5] sm:$0xff] %vm445_vm2, %v1618_v33  ;;  %v4960_v15 = vpop.permute.xlu1 %1883 }
 0x494   : > { %vm1888_vm13 = vcmp.eq.s32.totalorder %v4960_v15, %v3903_v31 }
 0x496   : > { %v4950_v30 = vld [vmem:[#allocation5 + $0x8] sm:$0xff] }
 0x497   : > { %1797 = vst.msk [vmem:[#allocation5 + $0x8] sm:$0xff] %vm445_vm2, %v6214_v14  ;;  %v4962_v22 = vpop.permute.xlu1 %1985 }
 0x498   : > { %vm1990_vm15 = vcmp.eq.s32.totalorder %v4962_v22, %v3903_v31 }
 0x49a   : > { %v1707_v38 = vld [vmem:[#allocation5] sm:$0xff] }
 0x49b   : > { %1711 = vperm.xlu1 %3439, %v1707_v38   ;;  %1796 = vst.msk [vmem:[#allocation5] sm:$0xff] %vm445_vm2, %v6214_v14  ;;  %v4964_v19 = vpop.permute.xlu1 %2294 }
 0x49c   : > { %6235 = vst [vmem:[#allocation30_spill] sm:$0xff] %v4964_v19 }
 0x49f   : > { %v4968_v7 = vpop.permute.xlu1 %2495 }
 0x4a0   : > { %6236 = vst [vmem:[#allocation7_spill] sm:$0xff] %v4968_v7  ;;  %vm6100_vm9 = vcmp.eq.s32.totalorder %v4968_v7, %v3903_v31 }
 0x4a3   : > { %v4972_v12 = vpop.permute.xlu1 %2498 }
 0x4a4   : > { %6238 = vst [vmem:[#allocation26_spill] sm:$0xff] %v4972_v12 }
 0x4a7   : > { %v4976_v14 = vpop.permute.xlu1 %2600 }
 0x4a8   : > { %6240 = vst [vmem:[#allocation9_spill] sm:$0xff] %v4976_v14  ;;  %vm6102_vm12 = vcmp.eq.s32.totalorder %v4976_v14, %v3903_v31 }
 0x4ab   : > { %v4980_v26 = vpop.permute.xlu1 %2699 }
 0x4ac   : > { %6242 = vst [vmem:[#allocation28_spill] sm:$0xff] %v4980_v26 }
 0x4af   : > { %v4986_v23 = vpop.permute.xlu1 %2804 }
 0x4b0   : > { %6244 = vst [vmem:[#allocation29_spill] sm:$0xff] %v4986_v23 }
 0x4b3   : > { %v4992_v51 = vpop.permute.xlu1 %2906 }
 0x4b4   : > { %6246 = vst [vmem:[#allocation13_spill] sm:$0xff] %v4992_v51 }
 0x509   : > { %v1700_v10 = vpop.f32.mrb[0].mxu1 }
 0x50a   : > { %v3289_v53 = vpop.f32.mrb[1].mxu1 }
 0x50b   : > { %v4982_v56 = vpop.f32.mrb[2].mxu1 }
 0x50c   : > { %v3290_v43 = vpop.f32.mrb[3].mxu1 }
 0x511   : > { %v1783_v17 = vpop.f32.mrb[4].mxu1 }
 0x512   : > { %1790 = vst.msk [vmem:[#allocation2] sm:$0xff] %vm393_vm0, %v1783_v17  ;;  %v3295_v5 = vpop.f32.mrb[5].mxu1 }
 0x513   : > { %v1786_v16 = vpop.f32.mrb[6].mxu1 }
 0x514   : > { %1791 = vst.msk [vmem:[#allocation2 + $0x8] sm:$0xff] %vm393_vm0, %v1786_v16  ;;  %v3296_v50 = vpop.f32.mrb[7].mxu1 }
 0x519   : > { %v5004_v9 = vld [vmem:[#allocation2] sm:$0xff] }
 0x51a   : > { %v1712_v52 = vpop.permute.xlu1 %1711  ;;  %v1892_v21 = vsel %vm1888_vm13, %v5004_v9, 0.0  ;;  %v1812_v4 = vsel %vm1808_vm14, %v5004_v9, 0.0  ;;  %v1994_v47 = vsel %vm1990_vm15, %v5004_v9, 0.0  ;;  %v2300_v18 = vsel %vm2296_vm3, %v5004_v9, 0.0 }
 0x51b   : > { %3577 = vrcp.f32 %v1712_v52  ;;  %v1894_v0 = vsel %vm393_vm0, %v1892_v21, 0.0  ;;  %v1814_v62 = vsel %vm393_vm0, %v1812_v4, 0.0  ;;  %v5024_v42 = vld [vmem:[#allocation2 + $0x8] sm:$0xff]  ;;  %v1996_v57 = vsel %vm393_vm0, %v1994_v47, 0.0 }
 0x51c   : > { %1895 = vadd.xlane.f32.xlu1 %v1894_v0  ;;  %1815 = vadd.xlane.f32.xlu0 %v1814_v62  ;;  %v2302_v54 = vsel %vm393_vm0, %v2300_v18, 0.0  ;;  %v2096_v40 = vsel %vm2092_vm5, %v5004_v9, 0.0  ;;  %v1893_v1 = vsel %vm1889_vm4, %v5024_v42, 0.0  ;;  %v2198_v35 = vsel %vm2194_vm6, %v5004_v9, 0.0 }
 0x51d   : > { %v2098_v48 = vsel %vm393_vm0, %v2096_v40, 0.0  ;;  %v1897_v46 = vsel %vm393_vm0, %v1893_v1, 0.0  ;;  %v1995_v24 = vsel %vm1991_vm7, %v5024_v42, 0.0  ;;  %v2200_v49 = vsel %vm393_vm0, %v2198_v35, 0.0 }
 0x51e   : > { %v1999_v33 = vsel %vm393_vm0, %v1995_v24, 0.0  ;;  %v2097_v38 = vsel %vm2093_vm1, %v5024_v42, 0.0  ;;  %v2402_v53 = vsel %vm6103_vm8, %v5004_v9, 0.0  ;;  %v2504_v5 = vsel %vm6100_vm9, %v5004_v9, 0.0 }
 0x51f   : > { %v2101_v43 = vsel %vm393_vm0, %v2097_v38, 0.0  ;;  %v2404_v17 = vsel %vm393_vm0, %v2402_v53, 0.0  ;;  %v2403_v16 = vsel %vm6101_vm10, %v5024_v42, 0.0  ;;  %v2506_v50 = vsel %vm393_vm0, %v2504_v5, 0.0 }
 0x520   : > { %1997 = vadd.xlane.f32.xlu1 %v1996_v57  ;;  %2303 = vadd.xlane.f32.xlu0 %v2302_v54  ;;  %v2407_v52 = vsel %vm393_vm0, %v2403_v16, 0.0  ;;  %v1813_v4 = vsel %vm1809_vm11, %v5024_v42, 0.0  ;;  %v2607_v0 = vsel %vm6102_vm12, %v5024_v42, 0.0  ;;  %vm2195_vm9 = vcmp.eq.s32.totalorder %v4988_v13, %v3903_v31  ;;  %v5168_v16 = vld [vmem:[%s4085_s10] sm:$0xff] }
 0x521   : > { %v1817_v62 = vsel %vm393_vm0, %v1813_v4, 0.0  ;;  %v2611_v47 = vsel %vm393_vm0, %v2607_v0, 0.0  ;;  %v2199_v18 = vsel %vm2195_vm9, %v5024_v42, 0.0  ;;  %vm6105_vm12 = vcmp.eq.s32.totalorder %v4964_v19, %v3903_v31 }
 0x522   : > { %vm6106_vm8 = vcmp.eq.s32.totalorder %v4986_v23, %v3903_v31  ;;  %v2203_v54 = vsel %vm393_vm0, %v2199_v18, 0.0  ;;  %v2301_v1 = vsel %vm6105_vm12, %v5024_v42, 0.0 }
 0x524   : > { %2099 = vadd.xlane.f32.xlu1 %v2098_v48  ;;  %1898 = vadd.xlane.f32.xlu0 %v1897_v46  ;;  %v2811_v48 = vsel %vm6106_vm8, %v5024_v42, 0.0  ;;  %v2305_v46 = vsel %vm393_vm0, %v2301_v1, 0.0  ;;  %vm6113_vm8 = vcmp.eq.s32.totalorder %v4980_v26, %v3903_v31 }
 0x525   : > { %v3578_v60 = vpop.eup %3577  ;;  %v2815_v35 = vsel %vm393_vm0, %v2811_v48, 0.0  ;;  %v2708_v38 = vsel %vm6113_vm8, %v5004_v9, 0.0  ;;  %v5183_v48 = vld [vmem:[%s4085_s10 + $0x8] sm:$0xff]  ;;  %s6264_s10 = smov 6  }
 0x526   : > { %v1720_v59 = vmul.f32 %v3578_v60, %v1700_v10  ;;  %v5077_v10 = vpop.permute.xlu0 %2597  ;;  %v2710_v53 = vsel %vm393_vm0, %v2708_v38, 0.0 }
 0x527   : > { %6250 = vst [vmem:[#allocation16_spill] sm:$0xff] %v5077_v10  ;;  %vm2602_vm12 = vcmp.eq.s32.totalorder %v5077_v10, %v3903_v31 }
 0x528   : > { %2201 = vadd.xlane.f32.xlu1 %v2200_v49  ;;  %2000 = vadd.xlane.f32.xlu0 %v1999_v33  ;;  %1723 = vst.msk [vmem:[#allocation6] sm:$0xff] %vm393_vm0, %v1720_v59  ;;  %v2606_v59 = vsel %vm2602_vm12, %v5004_v9, 0.0 }
 0x529   : > { %v2608_v49 = vsel %vm393_vm0, %v2606_v59, 0.0 }
 0x52a   : > { %v5095_v21 = vpop.permute.xlu0 %2702 }
 0x52b   : > { %6251 = vst [vmem:[#allocation19_spill] sm:$0xff] %v5095_v21  ;;  %vm6104_vm10 = vcmp.eq.s32.totalorder %v5095_v21, %v3903_v31 }
 0x52c   : > { %2102 = vadd.xlane.f32.xlu0 %v2101_v43  ;;  %2405 = vadd.xlane.f32.xlu1 %v2404_v17  ;;  %v2709_v57 = vsel %vm6104_vm10, %v5024_v42, 0.0  ;;  %vm6107_vm10 = vcmp.eq.s32.totalorder %v4972_v12, %v3903_v31 }
 0x52d   : > { %v2713_v40 = vsel %vm393_vm0, %v2709_v57, 0.0  ;;  %v2505_v24 = vsel %vm6107_vm10, %v5024_v42, 0.0 }
 0x52e   : > { %v2509_v60 = vsel %vm393_vm0, %v2505_v24, 0.0  ;;  %v5151_v33 = vpop.permute.xlu0 %2801 }
 0x52f   : > { %6252 = vst [vmem:[#allocation18_spill] sm:$0xff] %v5151_v33  ;;  %vm6112_vm10 = vcmp.eq.s32.totalorder %v5151_v33, %v3903_v31 }
 0x530   : > { %2507 = vadd.xlane.f32.xlu1 %v2506_v50  ;;  %2408 = vadd.xlane.f32.xlu0 %v2407_v52  ;;  %v2810_v43 = vsel %vm6112_vm10, %v5004_v9, 0.0  ;;  %v1822_v52 = vld [vmem:[#allocation4] sm:$0xff]  ;;  %vm2909_vm10 = vcmp.eq.s32.totalorder %v4992_v51, %v3903_v31 }
 0x531   : > { %v2812_v17 = vsel %vm393_vm0, %v2810_v43, 0.0 }
 0x532   : > { %v5165_v5 = vpop.permute.xlu0 %2903 }
 0x533   : > { %6253 = vst [vmem:[#allocation21_spill] sm:$0xff] %v5165_v5  ;;  %vm2908_vm8 = vcmp.eq.s32.totalorder %v5165_v5, %v3903_v31 }
 0x534   : > { %1818 = vadd.xlane.f32.xlu1 %v1817_v62  ;;  %2612 = vadd.xlane.f32.xlu0 %v2611_v47 }
 0x538   : > { %2204 = vadd.xlane.f32.xlu1 %v2203_v54  ;;  %2714 = vadd.xlane.f32.xlu0 %v2713_v40 }
 0x53c   : > { %2306 = vadd.xlane.f32.xlu1 %v2305_v46  ;;  %2816 = vadd.xlane.f32.xlu0 %v2815_v35 }
 0x540   : > { %2510 = vadd.xlane.f32.xlu1 %v2509_v60 }
 0x544   : > { %2609 = vadd.xlane.f32.xlu1 %v2608_v49 }
 0x548   : > { %2711 = vadd.xlane.f32.xlu1 %v2710_v53 }
 0x54c   : > { %2813 = vadd.xlane.f32.xlu1 %v2812_v17 }
 0x5a9   : > { %v1896_v50 = vpop.xlane.xlu1 %1895  ;;  %v1816_v4 = vpop.xlane.xlu0 %1815 }
 0x5aa   : > { %v5171_v0 = vmul.f32 %v1896_v50, %v5168_v16  ;;  %v1820_v62 = vmul.f32 %v5168_v16, %v1816_v4 }
 0x5ac   : > { %v1824_v47 = vmax.f32 %v1822_v52, %v1820_v62  ;;  %1906 = vrot.lane.b32.xlu0 %v5171_v0, %s3720_s11 }
 0x5ad   : > { %v1998_v18 = vpop.xlane.xlu1 %1997  ;;  %v5176_v57 = vpop.xlane.xlu0 %2303 }
 0x5ae   : > { %v1826_v54 = vsub.f32 %v1822_v52, %v1824_v47  ;;  %v1832_v40 = vsub.f32 %v1820_v62, %v1824_v47  ;;  %1876 = vst.msk [vmem:[#allocation4] sm:$0xff] %vm445_vm2, %v1824_v47  ;;  %v5180_v1 = vmul.f32 %v1998_v18, %v5168_v16  ;;  %v1838_v62 = vld [vmem:[#allocation5] sm:$0xff] }
 0x5b0   : > { %v1828_v46 = vmul.f32 1.442695, %v1826_v54  ;;  %v1834_v35 = vmul.f32 1.442695, %v1832_v40  ;;  %2008 = vrot.lane.b32.xlu0 %v5180_v1, %s3722_s13 }
 0x5b1   : > { %v2100_v24 = vpop.xlane.xlu1 %2099  ;;  %v1899_v60 = vpop.xlane.xlu0 %1898 }
 0x5b2   : > { %3579 = vpow2.f32 %v1828_v46  ;;  %v5188_v59 = vmul.f32 %v2100_v24, %v5168_v16  ;;  %v5191_v49 = vmul.f32 %v1899_v60, %v5183_v48 }
 0x5b3   : > { %3581 = vpow2.f32 %v1834_v35  ;;  %v1823_v35 = vld [vmem:[#allocation4 + $0x8] sm:$0xff] }
 0x5b4   : > { %2110 = vrot.lane.b32.xlu0 %v5188_v59, %s3721_s12  ;;  %1908 = vrot.lane.b32.xlu1 %v5191_v49, %s3720_s11 }
 0x5b5   : > { %v2202_v38 = vpop.xlane.xlu1 %2201  ;;  %v2001_v53 = vpop.xlane.xlu0 %2000 }
 0x5b6   : > { %v5198_v43 = vmul.f32 %v2202_v38, %v5168_v16  ;;  %v5201_v17 = vmul.f32 %v2001_v53, %v5183_v48 }
 0x5b8   : > { %2212 = vrot.lane.b32.xlu0 %v5198_v43, %s3723_s14  ;;  %2010 = vrot.lane.b32.xlu1 %v5201_v17, %s3722_s13 }
 0x5b9   : > { %v5207_v50 = vpop.xlane.xlu1 %2405  ;;  %v2103_v52 = vpop.xlane.xlu0 %2102 }
 0x5ba   : > { %v5210_v4 = vmul.f32 %v2103_v52, %v5183_v48 }
 0x5bc   : > { %v3580_v47 = vpop.eup %3579  ;;  %2112 = vrot.lane.b32.xlu1 %v5210_v4, %s3721_s12 }
 0x5bd   : > { %v2508_v18 = vpop.xlane.xlu1 %2507  ;;  %v1840_v54 = vmul.f32 %v3580_v47, %v1838_v62  ;;  %v3582_v40 = vpop.eup %3581  ;;  %v1839_v62 = vld [vmem:[#allocation5 + $0x8] sm:$0xff] }
 0x5bf   : > { %v1842_v46 = vadd.f32 %v3582_v40, %v1840_v54  ;;  %v2913_v54 = vsel %vm2909_vm10, %v5024_v42, 0.0  ;;  %v5240_v42 = vmul.f32 %v5176_v57, %v5168_v16 }
 0x5c1   : > { %v1819_v24 = vpop.xlane.xlu1 %1818  ;;  %1844 = vst.msk [vmem:[#allocation5] sm:$0xff] %vm445_vm2, %v1842_v46 }
 0x5c2   : > { %v1821_v60 = vmul.f32 %v5183_v48, %v1819_v24 }
 0x5c4   : > { %v1825_v38 = vmax.f32 %v1823_v35, %v1821_v60 }
 0x5c5   : > { %v2205_v53 = vpop.xlane.xlu1 %2204 }
 0x5c6   : > { %v1827_v23 = vsub.f32 %v1823_v35, %v1825_v38  ;;  %v1833_v52 = vsub.f32 %v1821_v60, %v1825_v38  ;;  %1877 = vst.msk [vmem:[#allocation4 + $0x8] sm:$0xff] %vm445_vm2, %v1825_v38  ;;  %v5218_v33 = vmul.f32 %v2205_v53, %v5183_v48 }
 0x5c8   : > { %v1830_v21 = vmul.f32 1.442695, %v1827_v23  ;;  %v1836_v26 = vmul.f32 1.442695, %v1833_v52  ;;  %2214 = vrot.lane.b32.xlu1 %v5218_v33, %s3723_s14  ;;  %v2917_v23 = vsel %vm393_vm0, %v2913_v54, 0.0  ;;  %v5253_v54 = vld [vmem:[#allocation4] sm:$0xff] }
 0x5c9   : > { %v2307_v38 = vpop.xlane.xlu1 %2306 }
 0x5ca   : > { %3583 = vpow2.f32 %v1830_v21  ;;  %v5245_v53 = vmul.f32 %v2307_v38, %v5183_v48  ;;  %v5273_v38 = vmul.f32 %v2508_v18, %v5168_v16 }
 0x5cb   : > { %3585 = vpow2.f32 %v1836_v26  ;;  %v2912_v26 = vsel %vm2908_vm8, %v5004_v9, 0.0  ;;  %v2409_v9 = vpop.xlane.xlu0 %2408 }
 0x5cc   : > { %v2914_v21 = vsel %vm393_vm0, %v2912_v26, 0.0  ;;  %v5292_v18 = vmul.f32 %v2409_v9, %v5183_v48 }
 0x5cd   : > { %v5270_v26 = vld [vmem:[#allocation4 + $0x8] sm:$0xff] }
 0x5d4   : > { %v3584_v46 = vpop.eup %3583 }
 0x5d5   : > { %v1841_v35 = vmul.f32 %v3584_v46, %v1839_v62  ;;  %v3586_v24 = vpop.eup %3585 }
 0x5d7   : > { %2918 = vadd.xlane.f32.xlu0 %v2917_v23  ;;  %v1843_v60 = vadd.f32 %v3586_v24, %v1841_v35 }
 0x5d9   : > { %1845 = vst.msk [vmem:[#allocation5 + $0x8] sm:$0xff] %vm445_vm2, %v1843_v60  ;;  %v5266_v60 = vmul.f32 %v5207_v50, %v5168_v16 }
 0x5ec   : > { %2915 = vadd.xlane.f32.xlu1 %v2914_v21 }
 0x5ed   : > { %1716 = vperm.xlu0 %3440, %v4950_v30   ;;  %v2613_v30 = vpop.xlane.xlu0 %2612 }
 0x5ee   : > { %v5356_v28 = vmul.f32 %v2613_v30, %v5183_v48 }
 0x5f1   : > { %1850 = vperm.xlu0 %3440, %v3580_v47   ;;  %v2511_v47 = vpop.xlane.xlu1 %2510 }
 0x5f5   : > { %1862 = vperm.xlu0 %3440, %v3582_v40   ;;  %v5249_v40 = vpop.xlane.xlu0 %2714  ;;  %v2610_v52 = vpop.xlane.xlu1 %2609 }
 0x5f9   : > { %2314 = vrot.lane.b32.xlu0 %v5240_v42, %s3725_s16  ;;  %v5251_v57 = vpop.xlane.xlu0 %2816  ;;  %v2712_v62 = vpop.xlane.xlu1 %2711 }
 0x5fd   : > { %1855 = vperm.xlu1 %3439, %v3584_v46   ;;  %v2814_v23 = vpop.xlane.xlu1 %2813 }
 0x601   : > { %1867 = vperm.xlu1 %3439, %v3586_v24  }
 0x605   : > { %2316 = vrot.lane.b32.xlu1 %v5245_v53, %s3725_s16 }
 0x61e   : > { %v1907_v46 = vpop.permute.xlu0 %1906 }
 0x61f   : > { %v5256_v35 = vmax.f32 %v5253_v54, %v1907_v46 }
 0x621   : > { %1978 = vst.msk [vmem:[#allocation4] sm:$0xff] %vm445_vm2, %v5256_v35  ;;  %1922 = vrot.lane.b32.xlu1 %v5256_v35, %s3724_s15 }
 0x622   : > { %v2009_v51 = vpop.permute.xlu0 %2008 }
 0x625   : > { %2416 = vrot.lane.b32.xlu1 %v5266_v60, %s3727_s18 }
 0x626   : > { %v1909_v21 = vpop.permute.xlu1 %1908  ;;  %v2111_v10 = vpop.permute.xlu0 %2110 }
 0x627   : > { %v5276_v46 = vmax.f32 %v5270_v26, %v1909_v21 }
 0x628   : > { %v5278_v24 = vld [vmem:[#allocation4] sm:$0xff] }
 0x629   : > { %v5281_v5 = vmax.f32 %v5278_v24, %v2009_v51  ;;  %1979 = vst.msk [vmem:[#allocation4 + $0x8] sm:$0xff] %vm445_vm2, %v5276_v46  ;;  %1924 = vrot.lane.b32.xlu0 %v5276_v46, %s3724_s15  ;;  %2518 = vrot.lane.b32.xlu1 %v5273_v38, %s3728_s24  ;;  %v5303_v51 = vmul.f32 %v2610_v52, %v5168_v16  ;;  %s6267_s15 = smov 7  }
 0x62a   : > { %v2011_v14 = vpop.permute.xlu1 %2010  ;;  %v2213_v27 = vpop.permute.xlu0 %2212 }
 0x62b   : > { %2080 = vst.msk [vmem:[#allocation4] sm:$0xff] %vm445_vm2, %v5281_v5 }
 0x62d   : > { %2418 = vrot.lane.b32.xlu0 %v5292_v18, %s3727_s18  ;;  %2024 = vrot.lane.b32.xlu1 %v5281_v5, %s3726_s17 }
 0x62e   : > { %v2113_v7 = vpop.permute.xlu1 %2112 }
 0x630   : > { %v5305_v50 = vld [vmem:[#allocation4 + $0x8] sm:$0xff] }
 0x631   : > { %v5308_v9 = vmax.f32 %v5305_v50, %v2011_v14  ;;  %2620 = vrot.lane.b32.xlu1 %v5303_v51, %s3730_s27  ;;  %v5324_v14 = vmul.f32 %v2511_v47, %v5183_v48 }
 0x632   : > { %v5312_v21 = vld [vmem:[#allocation4] sm:$0xff] }
 0x633   : > { %v5315_v12 = vmax.f32 %v5312_v21, %v2111_v10  ;;  %2081 = vst.msk [vmem:[#allocation4 + $0x8] sm:$0xff] %vm445_vm2, %v5308_v9  ;;  %2026 = vrot.lane.b32.xlu0 %v5308_v9, %s3726_s17  ;;  %v5333_v10 = vmul.f32 %v2712_v62, %v5168_v16  ;;  %s6271_s17 = smov 8  }
 0x635   : > { %2182 = vst.msk [vmem:[#allocation4] sm:$0xff] %vm445_vm2, %v5315_v12  ;;  %2126 = vrot.lane.b32.xlu1 %v5315_v12, %s3729_s25 }
 0x637   : > { %2520 = vrot.lane.b32.xlu0 %v5324_v14, %s3728_s24 }
 0x639   : > { %2722 = vrot.lane.b32.xlu1 %v5333_v10, %s3732_s30 }
 0x63a   : > { %v5339_v47 = vld [vmem:[#allocation4 + $0x8] sm:$0xff]  ;;  %v2215_v62 = vpop.permute.xlu1 %2214 }
 0x63b   : > { %v5342_v52 = vmax.f32 %v5339_v47, %v2113_v7 }
 0x63c   : > { %v5344_v2 = vld [vmem:[#allocation4] sm:$0xff] }
 0x63d   : > { %v5347_v19 = vmax.f32 %v5344_v2, %v2213_v27  ;;  %2183 = vst.msk [vmem:[#allocation4 + $0x8] sm:$0xff] %vm445_vm2, %v5342_v52  ;;  %2128 = vrot.lane.b32.xlu0 %v5342_v52, %s3729_s25  ;;  %v5365_v27 = vmul.f32 %v2814_v23, %v5168_v16  ;;  %v5384_v23 = vmul.f32 %v5249_v40, %v5183_v48  ;;  %s6274_s25 = smov 9  }
 0x63e   : > { %v6258_v40 = vsub.f32 %v5253_v54, %v5256_v35 }
 0x63f   : > { %2284 = vst.msk [vmem:[#allocation4] sm:$0xff] %vm445_vm2, %v5347_v19  ;;  %2228 = vrot.lane.b32.xlu1 %v5347_v19, %s6254_s23  ;;  %6255 = vst [vmem:[#allocation20_spill] sm:$0xff] %v5365_v27 }
 0x640   : > { %6256 = vst [vmem:[#allocation22_spill] sm:$0xff] %v5384_v23  ;;  %v1916_v20 = vmul.f32 1.442695, %v6258_v40 }
 0x641   : > { %2622 = vrot.lane.b32.xlu0 %v5356_v28, %s3730_s27 }
 0x643   : > { %2824 = vrot.lane.b32.xlu1 %v5365_v27, %s3734_s8 }
 0x644   : > { %v5371_v30 = vld [vmem:[#allocation4 + $0x8] sm:$0xff] }
 0x645   : > { %v5374_v7 = vmax.f32 %v5371_v30, %v2215_v62  ;;  %v5390_v62 = vmul.f32 %v5251_v57, %v5183_v48 }
 0x647   : > { %2285 = vst.msk [vmem:[#allocation4 + $0x8] sm:$0xff] %vm445_vm2, %v5374_v7  ;;  %2230 = vrot.lane.b32.xlu0 %v5374_v7, %s6254_s23  ;;  %6257 = vst [vmem:[#allocation23_spill] sm:$0xff] %v5390_v62 }
 0x64b   : > { %2724 = vrot.lane.b32.xlu0 %v5384_v23, %s3732_s30 }
 0x64e   : > { %v5432_v40 = vld [vmem:[#allocation4 + $0x8] sm:$0xff] }
 0x64f   : > { %2826 = vrot.lane.b32.xlu0 %v5390_v62, %s3734_s8  ;;  %v5401_v62 = vld [vmem:[#allocation4] sm:$0xff] }
 0x664   : > { %v2919_v13 = vpop.xlane.xlu0 %2918 }
 0x665   : > { %v5445_v44 = vmul.f32 %v2919_v13, %v5183_v48 }
 0x66c   : > { %v1717_v32 = vpop.permute.xlu0 %1716 }
 0x66d   : > { %3587 = vrcp.f32 %v1717_v32 }
 0x66e   : > { %3589 = vpow2.f32 %v1916_v20 }
 0x670   : > { %v1851_v39 = vpop.permute.xlu0 %1850 }
 0x671   : > { %v1858_v58 = vmul.f32 %v1851_v39, %v1846_v36  ;;  %v6259_v39 = vsub.f32 %v5278_v24, %v5281_v5 }
 0x673   : > { %v2018_v36 = vmul.f32 1.442695, %v6259_v39  ;;  %v6262_v39 = vsub.f32 %v5312_v21, %v5315_v12  ;;  %v6265_v12 = vsub.f32 %v5339_v47, %v5342_v52 }
 0x674   : > { %v1863_v27 = vpop.permute.xlu0 %1862 }
 0x675   : > { %v1870_v8 = vsel %vm1808_vm14, %v1863_v27, 0.0  ;;  %3591 = vpow2.f32 %v2018_v36  ;;  %v2120_v36 = vmul.f32 1.442695, %v6262_v39 }
 0x676   : > { %v1872_v57 = vadd.f32 %v1870_v8, %v1858_v58 }
 0x677   : > { %v3588_v23 = vpop.eup %3587 }
 0x678   : > { %1874 = vst.msk [vmem:[#allocation3] sm:$0xff] %vm393_vm0, %v1872_v57  ;;  %v2315_v3 = vpop.permute.xlu0 %2314  ;;  %v1722_v32 = vmul.f32 %v3588_v23, %v4982_v56  ;;  %v1847_v56 = vld [vmem:[#allocation3 + $0x8] sm:$0xff]  ;;  %v5428_v27 = vpop.eup %3589 }
 0x679   : > { %v5408_v54 = vmax.f32 %v5401_v62, %v2315_v3  ;;  %v2916_v35 = vpop.xlane.xlu1 %2915  ;;  %v6261_v3 = vsub.f32 %v5270_v26, %v5276_v46 }
 0x67a   : > { %v5411_v25 = vmul.f32 %v2916_v35, %v5168_v16  ;;  %1724 = vst.msk [vmem:[#allocation6 + $0x8] sm:$0xff] %vm393_vm0, %v1722_v32 }
 0x67b   : > { %2386 = vst.msk [vmem:[#allocation4] sm:$0xff] %vm445_vm2, %v5408_v54  ;;  %v1918_v58 = vmul.f32 1.442695, %v6261_v3 }
 0x67c   : > { %2926 = vrot.lane.b32.xlu1 %v5411_v25, %s3736_s6 }
 0x67d   : > { %v1856_v20 = vpop.permute.xlu1 %1855  ;;  %3593 = vpow2.f32 %v1918_v58 }
 0x67e   : > { %v1859_v5 = vmul.f32 %v1856_v20, %v1847_v56  ;;  %3595 = vpow2.f32 %v2120_v36  ;;  %v6263_v20 = vsub.f32 %v5305_v50, %v5308_v9  ;;  %v2122_v50 = vmul.f32 1.442695, %v6265_v12 }
 0x67f   : > { %v5437_v46 = vpop.eup %3591 }
 0x680   : > { %2330 = vrot.lane.b32.xlu1 %v5408_v54, %s6260_s26  ;;  %v2020_v56 = vmul.f32 1.442695, %v6263_v20 }
 0x681   : > { %v1868_v16 = vpop.permute.xlu1 %1867 }
 0x682   : > { %v1871_v24 = vsel %vm1809_vm11, %v1868_v16, 0.0  ;;  %v5458_v13 = vld [vmem:[#allocation4] sm:$0xff]  ;;  %3597 = vpow2.f32 %v2020_v56 }
 0x683   : > { %v1873_v23 = vadd.f32 %v1871_v24, %v1859_v5  ;;  %3599 = vpow2.f32 %v2122_v50 }
 0x684   : > { %1954 = vperm.xlu1 %3439, %v5428_v27  }
 0x685   : > { %1875 = vst.msk [vmem:[#allocation3 + $0x8] sm:$0xff] %vm393_vm0, %v1873_v23  ;;  %v2317_v57 = vpop.permute.xlu1 %2316 }
 0x686   : > { %v5435_v26 = vmax.f32 %v5432_v40, %v2317_v57 }
 0x687   : > { %v5449_v32 = vpop.eup %3593 }
 0x688   : > { %2387 = vst.msk [vmem:[#allocation4 + $0x8] sm:$0xff] %vm445_vm2, %v5435_v26  ;;  %2332 = vrot.lane.b32.xlu0 %v5435_v26, %s6260_s26  ;;  %2056 = vperm.xlu1 %3439, %v5437_v46   ;;  %v5473_v16 = vpop.eup %3595 }
 0x689   : > { %6266 = vst [vmem:[#allocation24_spill] sm:$0xff] %v5473_v16 }
 0x68c   : > { %2928 = vrot.lane.b32.xlu0 %v5445_v44, %s3736_s6 }
 0x68f   : > { %v5476_v23 = vld [vmem:[#allocation4 + $0x8] sm:$0xff] }
 0x690   : > { %1959 = vperm.xlu0 %3440, %v5449_v32  }
 0x693   : > { %v1923_v35 = vpop.permute.xlu1 %1922 }
 0x694   : > { %v1928_v5 = vsub.f32 %v5171_v0, %v1923_v35 }
 0x696   : > { %v1930_v39 = vmul.f32 1.442695, %v1928_v5 }
 0x697   : > { %v2417_v3 = vpop.permute.xlu1 %2416 }
 0x698   : > { %v5461_v48 = vmax.f32 %v5458_v13, %v2417_v3  ;;  %3601 = vpow2.f32 %v1930_v39  ;;  %v6270_v39 = vsub.f32 %v5371_v30, %v5374_v7 }
 0x69a   : > { %2488 = vst.msk [vmem:[#allocation4] sm:$0xff] %vm445_vm2, %v5461_v48  ;;  %2432 = vrot.lane.b32.xlu1 %v5461_v48, %s6264_s10  ;;  %v2224_v58 = vmul.f32 1.442695, %v6270_v39 }
 0x69b   : > { %v2519_v21 = vpop.permute.xlu1 %2518  ;;  %v1925_v9 = vpop.permute.xlu0 %1924 }
 0x69c   : > { %v1929_v50 = vsub.f32 %v5191_v49, %v1925_v9 }
 0x69e   : > { %2158 = vperm.xlu1 %3439, %v5473_v16  }
 0x69f   : > { %v2025_v24 = vpop.permute.xlu1 %2024  ;;  %v2419_v57 = vpop.permute.xlu0 %2418 }
 0x6a0   : > { %v5479_v36 = vmax.f32 %v5476_v23, %v2419_v57  ;;  %v2030_v52 = vsub.f32 %v5180_v1, %v2025_v24  ;;  %v5500_v1 = vpop.eup %3597 }
 0x6a1   : > { %v5481_v20 = vld [vmem:[#allocation4] sm:$0xff]  ;;  %6268 = vst [vmem:[#allocation25_spill] sm:$0xff] %v5500_v1  ;;  %v5504_v5 = vpop.eup %3599 }
 0x6a2   : > { %v5485_v47 = vmax.f32 %v5481_v20, %v2519_v21  ;;  %2489 = vst.msk [vmem:[#allocation4 + $0x8] sm:$0xff] %vm445_vm2, %v5479_v36  ;;  %2434 = vrot.lane.b32.xlu0 %v5479_v36, %s6264_s10  ;;  %3442 = vset.pattern.permute.xlu1 %v6209_v61  ;;  %v2032_v3 = vmul.f32 1.442695, %v2030_v52  ;;  %6269 = vst [vmem:[#allocation31_spill] sm:$0xff] %v5504_v5  ;;  %v1932_v52 = vmul.f32 1.442695, %v1929_v50  ;;  %v5527_v30 = vpop.eup %3601 }
 0x6a3   : > { %v2621_v35 = vpop.permute.xlu1 %2620 }
 0x6a4   : > { %2590 = vst.msk [vmem:[#allocation4] sm:$0xff] %vm445_vm2, %v5485_v47  ;;  %2534 = vrot.lane.b32.xlu1 %v5485_v47, %s6267_s15  ;;  %3603 = vpow2.f32 %v2032_v3  ;;  %v2323_v3 = vsub.f32 %v5432_v40, %v5435_v26 }
 0x6a5   : > { %v2027_v12 = vpop.permute.xlu0 %2026  ;;  %3605 = vpow2.f32 %v2224_v58 }
 0x6a6   : > { %2061 = vperm.xlu0 %3440, %v5500_v1   ;;  %3607 = vpow2.f32 %v1932_v52  ;;  %v2031_v39 = vsub.f32 %v5201_v17, %v2027_v12 }
 0x6a7   : > { %v2127_v21 = vpop.permute.xlu1 %2126 }
 0x6a8   : > { %v2132_v49 = vsub.f32 %v5188_v59, %v2127_v21  ;;  %v2034_v12 = vmul.f32 1.442695, %v2031_v39  ;;  %v6273_v39 = vsub.f32 %v5344_v2, %v5347_v19 }
 0x6a9   : > { %v5506_v24 = vld [vmem:[#allocation4 + $0x8] sm:$0xff]  ;;  %v2521_v57 = vpop.permute.xlu0 %2520 }
 0x6aa   : > { %v5512_v56 = vmax.f32 %v5506_v24, %v2521_v57  ;;  %2163 = vperm.xlu0 %3440, %v5504_v5   ;;  %v2134_v59 = vmul.f32 1.442695, %v2132_v49 }
 0x6ab   : > { %v5515_v0 = vld [vmem:[#allocation4] sm:$0xff]  ;;  %v2723_v7 = vpop.permute.xlu1 %2722 }
 0x6ac   : > { %v5519_v9 = vmax.f32 %v5515_v0, %v2621_v35  ;;  %2591 = vst.msk [vmem:[#allocation4 + $0x8] sm:$0xff] %vm445_vm2, %v5512_v56  ;;  %2536 = vrot.lane.b32.xlu1 %v5512_v56, %s6267_s15  ;;  %3609 = vpow2.f32 %v2134_v59 }
 0x6ae   : > { %2692 = vst.msk [vmem:[#allocation4] sm:$0xff] %vm445_vm2, %v5519_v9  ;;  %3441 = vset.pattern.permute.xlu0 %v6209_v61  ;;  %v5538_v58 = vpop.eup %3603 }
 0x6af   : > { %1965 = vperm.xlu0 %3441, %v5527_v30   ;;  %v2129_v35 = vpop.permute.xlu0 %2128  ;;  %v5561_v59 = vpop.eup %3605 }
 0x6b0   : > { %2636 = vrot.lane.b32.xlu1 %v5519_v9, %s6271_s17  ;;  %6272 = vst [vmem:[#allocation32_spill] sm:$0xff] %v5561_v59  ;;  %v5568_v26 = vpop.eup %3607  ;;  %v2133_v19 = vsub.f32 %v5210_v4, %v2129_v35 }
 0x6b1   : > { %v2229_v21 = vpop.permute.xlu1 %2228 }
 0x6b2   : > { %v2234_v57 = vsub.f32 %v5198_v43, %v2229_v21 }
 0x6b3   : > { %3443 = vset.pattern.permute.xlu0 %v6225_v41  ;;  %v5542_v50 = vld [vmem:[#allocation4 + $0x8] sm:$0xff]  ;;  %v2623_v61 = vpop.permute.xlu0 %2622 }
 0x6b4   : > { %v2236_v52 = vmul.f32 1.442695, %v2234_v57  ;;  %v5545_v49 = vmax.f32 %v5542_v50, %v2623_v61  ;;  %2067 = vperm.xlu0 %3443, %v5538_v58   ;;  %v2222_v61 = vmul.f32 1.442695, %v6273_v39 }
 0x6b5   : > { %v5550_v43 = vld [vmem:[#allocation4] sm:$0xff] }
 0x6b6   : > { %v5553_v21 = vmax.f32 %v5550_v43, %v2723_v7  ;;  %2693 = vst.msk [vmem:[#allocation4 + $0x8] sm:$0xff] %vm445_vm2, %v5545_v49  ;;  %2638 = vrot.lane.b32.xlu1 %v5545_v49, %s6271_s17  ;;  %3611 = vpow2.f32 %v2236_v52  ;;  %v2326_v7 = vmul.f32 1.442695, %v2323_v3  ;;  %v5575_v40 = vpop.eup %3609 }
 0x6b7   : > { %3613 = vpow2.f32 %v2034_v12  ;;  %v2825_v12 = vpop.permute.xlu1 %2824 }
 0x6b8   : > { %2794 = vst.msk [vmem:[#allocation4] sm:$0xff] %vm445_vm2, %v5553_v21  ;;  %3446 = vset.pattern.permute.xlu0 %v6168_v11  ;;  %3615 = vpow2.f32 %v2326_v7 }
 0x6b9   : > { %2265 = vperm.xlu0 %3446, %v5561_v59   ;;  %v2231_v57 = vpop.permute.xlu0 %2230  ;;  %3617 = vpow2.f32 %v2222_v61 }
 0x6ba   : > { %1969 = vperm.xlu1 %3442, %v5568_v26  }
 0x6bd   : > { %3447 = vset.pattern.permute.xlu0 %v6172_v29  ;;  %v5578_v52 = vld [vmem:[#allocation4 + $0x8] sm:$0xff]  ;;  %v2725_v17 = vpop.permute.xlu0 %2724 }
 0x6be   : > { %v5581_v3 = vmax.f32 %v5578_v52, %v2725_v17  ;;  %2169 = vperm.xlu0 %3447, %v5575_v40   ;;  %2738 = vrot.lane.b32.xlu1 %v5553_v21, %s6274_s25 }
 0x6bf   : > { %v5586_v8 = vld [vmem:[#allocation4] sm:$0xff]  ;;  %3444 = vset.pattern.permute.xlu1 %v6225_v41  ;;  %v2136_v41 = vmul.f32 1.442695, %v2133_v19 }
 0x6c0   : > { %v5591_v2 = vmax.f32 %v5586_v8, %v2825_v12  ;;  %2795 = vst.msk [vmem:[#allocation4 + $0x8] sm:$0xff] %vm445_vm2, %v5581_v3  ;;  %v5597_v7 = vpop.eup %3611 }
 0x6c1   : > { %v5607_v4 = vpop.eup %3613  ;;  %v2827_v12 = vpop.permute.xlu0 %2826  ;;  %3619 = vpow2.f32 %v2136_v41  ;;  %v6277_v41 = vsub.f32 %v5401_v62, %v5408_v54 }
 0x6c2   : > { %2896 = vst.msk [vmem:[#allocation4] sm:$0xff] %vm445_vm2, %v5591_v2  ;;  %3450 = vset.pattern.permute.xlu0 %v6177_v45  ;;  %2740 = vrot.lane.b32.xlu1 %v5581_v3, %s6274_s25  ;;  %v5610_v35 = vpop.eup %3615 }
 0x6c3   : > { %2271 = vperm.xlu0 %3450, %v5597_v7   ;;  %6275 = vst [vmem:[#allocation33_spill] sm:$0xff] %v5610_v35  ;;  %v5619_v17 = vpop.eup %3617  ;;  %v2324_v59 = vmul.f32 1.442695, %v6277_v41 }
 0x6c4   : > { %6276 = vst [vmem:[#allocation34_spill] sm:$0xff] %v5619_v17 }
 0x6c5   : > { %3621 = vpow2.f32 %v2324_v59 }
 0x6c6   : > { %2071 = vperm.xlu1 %3444, %v5607_v4  }
 0x6c7   : > { %v5612_v61 = vld [vmem:[#allocation4 + $0x8] sm:$0xff]  ;;  %3451 = vset.pattern.permute.xlu0 %v6168_v11 }
 0x6c8   : > { %v5616_v39 = vmax.f32 %v5612_v61, %v2827_v12  ;;  %2367 = vperm.xlu0 %3451, %v5610_v35   ;;  %v2235_v12 = vsub.f32 %v5218_v33, %v2231_v57  ;;  %v6282_v57 = vsub.f32 %v5481_v20, %v5485_v47 }
 0x6c9   : > { %v5649_v54 = vld [vmem:[#allocation4] sm:$0xff] }
 0x6ca   : > { %2897 = vst.msk [vmem:[#allocation4 + $0x8] sm:$0xff] %vm445_vm2, %v5616_v39  ;;  %3445 = vset.pattern.permute.xlu1 %v6168_v11  ;;  %v2238_v19 = vmul.f32 1.442695, %v2235_v12  ;;  %v2528_v5 = vmul.f32 1.442695, %v6282_v57 }
 0x6cb   : > { %2260 = vperm.xlu1 %3445, %v5619_v17   ;;  %v5635_v35 = vpop.eup %3619 }
 0x6cc   : > { %3453 = vset.pattern.permute.xlu0 %v6182_v37  ;;  %3623 = vpow2.f32 %v2238_v19 }
 0x6cf   : > { %2840 = vrot.lane.b32.xlu1 %v5591_v2, %s6278_s29  ;;  %v5641_v62 = vpop.eup %3621 }
 0x6d0   : > { %3448 = vset.pattern.permute.xlu1 %v6172_v29  ;;  %6279 = vst [vmem:[#allocation35_spill] sm:$0xff] %v5641_v62 }
 0x6d1   : > { %v5668_v1 = vld [vmem:[#allocation4 + $0x8] sm:$0xff] }
 0x6d3   : > { %2173 = vperm.xlu1 %3448, %v5635_v35  }
 0x6d6   : > { %v5644_v33 = vpop.eup %3623 }
 0x6d7   : > { %2842 = vrot.lane.b32.xlu1 %v5616_v39, %s6278_s29 }
 0x6d8   : > { %3449 = vset.pattern.permute.xlu1 %v6168_v11 }
 0x6db   : > { %2362 = vperm.xlu1 %3449, %v5641_v62  }
 0x6df   : > { %3452 = vset.pattern.permute.xlu1 %v6177_v45 }
 0x6e0   : > { %2275 = vperm.xlu1 %3452, %v5644_v33  }
 0x6e4   : > { %3454 = vset.pattern.permute.xlu1 %v6182_v37  ;;  %v6281_v37 = vsub.f32 %v5476_v23, %v5479_v36  ;;  %v6283_v23 = vsub.f32 %v5458_v13, %v5461_v48 }
 0x6e6   : > { %v2428_v12 = vmul.f32 1.442695, %v6281_v37  ;;  %v2426_v36 = vmul.f32 1.442695, %v6283_v23 }
 0x6ee   : > { %v2927_v29 = vpop.permute.xlu1 %2926 }
 0x6ef   : > { %v5652_v59 = vmax.f32 %v5649_v54, %v2927_v29 }
 0x6f1   : > { %2998 = vst.msk [vmem:[#allocation4] sm:$0xff] %vm445_vm2, %v5652_v59  ;;  %2942 = vrot.lane.b32.xlu1 %v5652_v59, %s6280_s7 }
 0x6f2   : > { %v2331_v45 = vpop.permute.xlu1 %2330 }
 0x6f3   : > { %v2336_v19 = vsub.f32 %v5240_v42, %v2331_v45 }
 0x6f5   : > { %v2338_v41 = vmul.f32 1.442695, %v2336_v19 }
 0x6f7   : > { %3625 = vpow2.f32 %v2338_v41 }
 0x6f8   : > { %3627 = vpow2.f32 %v2428_v12 }
 0x6fa   : > { %v2333_v29 = vpop.permute.xlu0 %2332 }
 0x6fb   : > { %v2337_v62 = vsub.f32 %v5245_v53, %v2333_v29 }
 0x6fd   : > { %v2340_v17 = vmul.f32 1.442695, %v2337_v62 }
 0x6fe   : > { %v2929_v16 = vpop.permute.xlu0 %2928 }
 0x6ff   : > { %3629 = vpow2.f32 %v2340_v17  ;;  %v5671_v42 = vmax.f32 %v5668_v1, %v2929_v16 }
 0x700   : > { %3631 = vpow2.f32 %v2528_v5 }
 0x701   : > { %v5676_v45 = vpop.eup %3625  ;;  %v2935_v53 = vsub.f32 %v5668_v1, %v5671_v42  ;;  %2999 = vst.msk [vmem:[#allocation4 + $0x8] sm:$0xff] %vm445_vm2, %v5671_v42  ;;  %2944 = vrot.lane.b32.xlu1 %v5671_v42, %s6280_s7  ;;  %3633 = vpow2.f32 %v2426_v36 }
 0x702   : > { %2373 = vperm.xlu0 %3453, %v5676_v45   ;;  %v5685_v20 = vpop.eup %3627 }
 0x703   : > { %v1955_v16 = vpop.permute.xlu1 %1954 }
 0x706   : > { %3456 = vset.pattern.permute.xlu0 %v6168_v11 }
 0x707   : > { %v5688_v13 = vpop.permute.xlu1 %2056  ;;  %2469 = vperm.xlu0 %3456, %v5685_v20  }
 0x709   : > { %v5691_v48 = vpop.eup %3629 }
 0x70a   : > { %v5693_v47 = vpop.eup %3631  ;;  %2377 = vperm.xlu1 %3454, %v5691_v48  }
 0x70b   : > { %2566 = vperm.xlu0 %3456, %v5693_v47   ;;  %v5698_v62 = vpop.eup %3633 }
 0x70c   : > { %v2433_v5 = vpop.permute.xlu1 %2432 }
 0x70d   : > { %v2438_v17 = vsub.f32 %v5266_v60, %v2433_v5  ;;  %v6284_v60 = vsub.f32 %v5506_v24, %v5512_v56  ;;  %v6285_v24 = vsub.f32 %v5542_v50, %v5545_v49 }
 0x70e   : > { %3455 = vset.pattern.permute.xlu1 %v6168_v11 }
 0x70f   : > { %v2440_v57 = vmul.f32 1.442695, %v2438_v17  ;;  %2464 = vperm.xlu1 %3455, %v5698_v62   ;;  %v1960_v19 = vpop.permute.xlu0 %1959  ;;  %3459 = vset.pattern.permute.xlu0 %v6186_v55  ;;  %v2530_v29 = vmul.f32 1.442695, %v6284_v60 }
 0x711   : > { %3635 = vpow2.f32 %v2440_v57 }
 0x713   : > { %3457 = vset.pattern.permute.xlu1 %v6184_v34 }
 0x714   : > { %v2435_v41 = vpop.permute.xlu0 %2434 }
 0x715   : > { %v2439_v37 = vsub.f32 %v5292_v18, %v2435_v41 }
 0x717   : > { %v2442_v12 = vmul.f32 1.442695, %v2439_v37  ;;  %v2632_v37 = vmul.f32 1.442695, %v6285_v24 }
 0x719   : > { %3637 = vpow2.f32 %v2442_v12 }
 0x71a   : > { %3639 = vpow2.f32 %v2530_v29 }
 0x71b   : > { %v5708_v23 = vpop.eup %3635 }
 0x71c   : > { %2475 = vperm.xlu1 %3457, %v5708_v23  }
 0x71d   : > { %v5711_v36 = vpop.permute.xlu1 %2158 }
 0x721   : > { %v2535_v5 = vpop.permute.xlu1 %2534 }
 0x722   : > { %v2540_v17 = vsub.f32 %v5273_v38, %v2535_v5  ;;  %v6286_v5 = vsub.f32 %v5515_v0, %v5519_v9 }
 0x723   : > { %v5714_v34 = vpop.eup %3637 }
 0x724   : > { %v2542_v57 = vmul.f32 1.442695, %v2540_v17  ;;  %2479 = vperm.xlu1 %3457, %v5714_v34   ;;  %v5723_v12 = vpop.eup %3639  ;;  %v2630_v17 = vmul.f32 1.442695, %v6286_v5  ;;  %v6288_v5 = vsub.f32 %v5578_v52, %v5581_v3 }
 0x725   : > { %v2537_v18 = vpop.permute.xlu1 %2536  ;;  %v5717_v41 = vpop.permute.xlu0 %2061 }
 0x726   : > { %3641 = vpow2.f32 %v2542_v57  ;;  %v2541_v56 = vsub.f32 %v5324_v14, %v2537_v18  ;;  %v6287_v14 = vsub.f32 %v5550_v43, %v5553_v21  ;;  %v1950_v57 = vld [vmem:[#allocation3] sm:$0xff] }
 0x728   : > { %v2544_v60 = vmul.f32 1.442695, %v2541_v56  ;;  %3458 = vset.pattern.permute.xlu1 %v6168_v11  ;;  %v2732_v50 = vmul.f32 1.442695, %v6287_v14  ;;  %v1962_v56 = vmul.f32 %v1955_v16, %v1950_v57 }
 0x729   : > { %v2637_v38 = vpop.permute.xlu1 %2636  ;;  %2571 = vperm.xlu1 %3458, %v5723_v12   ;;  %v5727_v29 = vpop.permute.xlu0 %2163 }
 0x72a   : > { %3643 = vpow2.f32 %v2544_v60  ;;  %v2642_v49 = vsub.f32 %v5303_v51, %v2637_v38 }
 0x72b   : > { %3645 = vpow2.f32 %v2632_v37 }
 0x72c   : > { %3647 = vpow2.f32 %v2630_v17  ;;  %v2644_v60 = vmul.f32 1.442695, %v2642_v49  ;;  %v2734_v17 = vmul.f32 1.442695, %v6288_v5 }
 0x72d   : > { %v2639_v18 = vpop.permute.xlu1 %2638  ;;  %3460 = vset.pattern.permute.xlu1 %v6186_v55  ;;  %3649 = vpow2.f32 %v2732_v50 }
 0x72e   : > { %v1966_v24 = vpop.permute.xlu0 %1965  ;;  %v2643_v43 = vsub.f32 %v5356_v28, %v2639_v18  ;;  %3651 = vpow2.f32 %v2644_v60  ;;  %v1951_v28 = vld [vmem:[#allocation3 + $0x8] sm:$0xff] }
 0x72f   : > { %v1972_v0 = vsel %vm1888_vm13, %v1966_v24, 0.0  ;;  %v1963_v14 = vmul.f32 %v1960_v19, %v1951_v28  ;;  %v6291_v28 = vsub.f32 %v5612_v61, %v5616_v39 }
 0x730   : > { %v5740_v9 = vpop.eup %3641  ;;  %v1974_v21 = vadd.f32 %v1972_v0, %v1962_v56  ;;  %v2646_v55 = vmul.f32 1.442695, %v2643_v43  ;;  %v6289_v0 = vmov 9  }
 0x731   : > { %2577 = vperm.xlu0 %3459, %v5740_v9  }
 0x732   : > { %1976 = vst.msk [vmem:[#allocation3] sm:$0xff] %vm393_vm0, %v1974_v21  ;;  %3653 = vpow2.f32 %v2646_v55  ;;  %v6290_v21 = vld [vmem:[#allocation22_spill] sm:$0xff] }
 0x733   : > { %v2068_v37 = vpop.permute.xlu0 %2067  ;;  %3655 = vpow2.f32 %v2734_v17 }
 0x734   : > { %v5745_v51 = vpop.eup %3643  ;;  %v2074_v52 = vsel %vm1990_vm15, %v2068_v37, 0.0  ;;  %v2836_v37 = vmul.f32 1.442695, %v6291_v28 }
 0x735   : > { %v5747_v16 = vpop.eup %3645  ;;  %3462 = vset.pattern.permute.xlu0 %v6168_v11  ;;  %2581 = vperm.xlu1 %3460, %v5745_v51  }
 0x736   : > { %2673 = vperm.xlu0 %3462, %v5747_v16   ;;  %v5752_v15 = vpop.eup %3647 }
 0x737   : > { %v5754_v38 = vpop.eup %3649 }
 0x738   : > { %v5770_v24 = vpop.eup %3651  ;;  %v5773_v63 = vpop.permute.xlu0 %2265 }
 0x739   : > { %v2052_v50 = vld [vmem:[#allocation3] sm:$0xff]  ;;  %v1970_v49 = vpop.permute.xlu1 %1969  ;;  %3461 = vset.pattern.permute.xlu1 %v6168_v11 }
 0x73a   : > { %v2064_v57 = vmul.f32 %v5688_v13, %v2052_v50  ;;  %v1973_v18 = vsel %vm1889_vm4, %v1970_v49, 0.0  ;;  %2770 = vperm.xlu0 %3462, %v5754_v38   ;;  %2668 = vperm.xlu1 %3461, %v5752_v15   ;;  %v6292_v49 = vsub.f32 %v5586_v8, %v5591_v2 }
 0x73b   : > { %v1975_v3 = vadd.f32 %v1973_v18, %v1963_v14 }
 0x73c   : > { %v2076_v19 = vadd.f32 %v2074_v52, %v2064_v57  ;;  %v5779_v43 = vpop.eup %3653  ;;  %v2834_v57 = vmul.f32 1.442695, %v6292_v49 }
 0x73d   : > { %1977 = vst.msk [vmem:[#allocation3 + $0x8] sm:$0xff] %vm393_vm0, %v1975_v3  ;;  %v2739_v56 = vpop.permute.xlu1 %2738  ;;  %v5794_v61 = vpop.eup %3655  ;;  %v6294_v3 = vsub.f32 %v5649_v54, %v5652_v59  ;;  %v6296_v59 = vld [vmem:[#allocation20_spill] sm:$0xff] }
 0x73e   : > { %2078 = vst.msk [vmem:[#allocation3] sm:$0xff] %vm393_vm0, %v2076_v19  ;;  %v2744_v13 = vsub.f32 %v5333_v10, %v2739_v56  ;;  %3463 = vset.pattern.permute.xlu1 %v6190_v6  ;;  %3465 = vset.pattern.permute.xlu0 %v6289_v0  ;;  %v2170_v10 = vpop.permute.xlu0 %2169 }
 0x73f   : > { %2679 = vperm.xlu1 %3463, %v5770_v24   ;;  %v2936_v19 = vmul.f32 1.442695, %v6294_v3  ;;  %v6299_v3 = vld [vmem:[#allocation23_spill] sm:$0xff] }
 0x740   : > { %v2746_v22 = vmul.f32 1.442695, %v2744_v13 }
 0x741   : > { %v2741_v60 = vpop.permute.xlu1 %2740 }
 0x742   : > { %3657 = vpow2.f32 %v2746_v22  ;;  %v2745_v55 = vsub.f32 %v6290_v21, %v2741_v60  ;;  %v2272_v21 = vpop.permute.xlu0 %2271 }
 0x743   : > { %2683 = vperm.xlu1 %3463, %v5779_v43  }
 0x744   : > { %v2748_v5 = vmul.f32 1.442695, %v2745_v55  ;;  %v2053_v6 = vld [vmem:[#allocation3 + $0x8] sm:$0xff] }
 0x745   : > { %v2154_v17 = vld [vmem:[#allocation3] sm:$0xff]  ;;  %v2072_v14 = vpop.permute.xlu1 %2071  ;;  %v2065_v50 = vmul.f32 %v5717_v41, %v2053_v6  ;;  %v2176_v41 = vsel %vm2092_vm5, %v2170_v10, 0.0 }
 0x746   : > { %v2166_v18 = vmul.f32 %v5711_v36, %v2154_v17  ;;  %3659 = vpow2.f32 %v2748_v5  ;;  %v2075_v39 = vsel %vm1991_vm7, %v2072_v14, 0.0  ;;  %v2278_v14 = vsel %vm2194_vm6, %v2272_v21, 0.0 }
 0x747   : > { %3661 = vpow2.f32 %v2836_v37  ;;  %v2077_v8 = vadd.f32 %v2075_v39, %v2065_v50  ;;  %3464 = vset.pattern.permute.xlu1 %v6168_v11 }
 0x748   : > { %v2178_v2 = vadd.f32 %v2176_v41, %v2166_v18  ;;  %2775 = vperm.xlu1 %3464, %v5794_v61   ;;  %3663 = vpow2.f32 %v2834_v57 }
 0x749   : > { %2079 = vst.msk [vmem:[#allocation3 + $0x8] sm:$0xff] %vm393_vm0, %v2077_v8  ;;  %3665 = vpow2.f32 %v2936_v19  ;;  %v6300_v8 = vmov 10  }
 0x74a   : > { %2180 = vst.msk [vmem:[#allocation3] sm:$0xff] %vm393_vm0, %v2178_v2  ;;  %v2261_v36 = vpop.permute.xlu1 %2260  ;;  %v6301_v2 = vmov 11  }
 0x74c   : > { %v5806_v13 = vpop.eup %3657  ;;  %3466 = vset.pattern.permute.xlu1 %v6289_v0 }
 0x74d   : > { %2781 = vperm.xlu0 %3465, %v5806_v13  }
 0x74e   : > { %v2841_v54 = vpop.permute.xlu1 %2840 }
 0x74f   : > { %v2846_v22 = vsub.f32 %v6296_v59, %v2841_v54 }
 0x750   : > { %v5811_v60 = vpop.eup %3659  ;;  %v2155_v55 = vld [vmem:[#allocation3 + $0x8] sm:$0xff] }
 0x751   : > { %v5813_v28 = vpop.eup %3661  ;;  %v2256_v37 = vld [vmem:[#allocation3] sm:$0xff]  ;;  %v2848_v10 = vmul.f32 1.442695, %v2846_v22  ;;  %3468 = vset.pattern.permute.xlu0 %v6168_v11  ;;  %2785 = vperm.xlu1 %3466, %v5811_v60   ;;  %v2167_v5 = vmul.f32 %v5727_v29, %v2155_v55 }
 0x752   : > { %v2268_v0 = vmul.f32 %v2261_v36, %v2256_v37  ;;  %v2174_v6 = vpop.permute.xlu1 %2173  ;;  %2877 = vperm.xlu0 %3468, %v5813_v28   ;;  %v5825_v57 = vpop.eup %3663  ;;  %v2938_v36 = vmul.f32 1.442695, %v2935_v53  ;;  %v6310_v55 = vld [vmem:[#allocation7_spill] sm:$0xff] }
 0x753   : > { %3667 = vpow2.f32 %v2848_v10  ;;  %v2177_v49 = vsel %vm2093_vm1, %v2174_v6, 0.0  ;;  %v5827_v39 = vpop.eup %3665 }
 0x754   : > { %v2280_v18 = vadd.f32 %v2278_v14, %v2268_v0  ;;  %v2179_v52 = vadd.f32 %v2177_v49, %v2167_v5  ;;  %v2368_v14 = vpop.permute.xlu0 %2367 }
 0x755   : > { %3467 = vset.pattern.permute.xlu1 %v6168_v11 }
 0x756   : > { %2282 = vst.msk [vmem:[#allocation3] sm:$0xff] %vm393_vm0, %v2280_v18  ;;  %2181 = vst.msk [vmem:[#allocation3 + $0x8] sm:$0xff] %vm393_vm0, %v2179_v52  ;;  %v2843_v29 = vpop.permute.xlu1 %2842  ;;  %2974 = vperm.xlu0 %3468, %v5827_v39   ;;  %2872 = vperm.xlu1 %3467, %v5825_v57  }
 0x757   : > { %v2847_v19 = vsub.f32 %v6299_v3, %v2843_v29 }
 0x759   : > { %v2850_v56 = vmul.f32 1.442695, %v2847_v19 }
 0x75a   : > { %v2363_v41 = vpop.permute.xlu1 %2362  ;;  %3469 = vset.pattern.permute.xlu1 %v6300_v8  ;;  %3471 = vset.pattern.permute.xlu0 %v6301_v2 }
 0x75b   : > { %3669 = vpow2.f32 %v2850_v56  ;;  %v6304_v56 = vld [vmem:[#allocation30_spill] sm:$0xff] }
 0x75c   : > { %3671 = vpow2.f32 %v2938_v36  ;;  %vm6305_vm13 = vcmp.eq.s32.totalorder %v6304_v56, %v3903_v31 }
 0x75d   : > { %v3668_v54 = vpop.eup %3667  ;;  %v2257_v59 = vld [vmem:[#allocation3 + $0x8] sm:$0xff]  ;;  %v2358_v50 = vld [vmem:[#allocation3] sm:$0xff] }
 0x75e   : > { %2883 = vperm.xlu1 %3469, %v3668_v54   ;;  %v2269_v22 = vmul.f32 %v5773_v63, %v2257_v59  ;;  %v2370_v49 = vmul.f32 %v2363_v41, %v2358_v50 }
 0x75f   : > { %v2276_v21 = vpop.permute.xlu1 %2275 }
 0x760   : > { %v2279_v37 = vsel %vm2195_vm9, %v2276_v21, 0.0 }
 0x761   : > { %v2281_v10 = vadd.f32 %v2279_v37, %v2269_v22 }
 0x763   : > { %2283 = vst.msk [vmem:[#allocation3 + $0x8] sm:$0xff] %vm393_vm0, %v2281_v10  ;;  %v2943_v5 = vpop.permute.xlu1 %2942 }
 0x764   : > { %v2948_v0 = vsub.f32 %v5411_v25, %v2943_v5  ;;  %v6312_v5 = vld [vmem:[#allocation26_spill] sm:$0xff] }
 0x765   : > { %v5846_v6 = vpop.eup %3669  ;;  %vm6313_vm4 = vcmp.eq.s32.totalorder %v6312_v5, %v3903_v31 }
 0x766   : > { %v2950_v1 = vmul.f32 1.442695, %v2948_v0  ;;  %2887 = vperm.xlu1 %3469, %v5846_v6   ;;  %v5849_v42 = vpop.eup %3671 }
 0x768   : > { %3673 = vpow2.f32 %v2950_v1 }
 0x76a   : > { %3470 = vset.pattern.permute.xlu1 %v6168_v11 }
 0x76b   : > { %2979 = vperm.xlu1 %3470, %v5849_v42  }
 0x76f   : > { %3472 = vset.pattern.permute.xlu1 %v6301_v2 }
 0x772   : > { %v3674_v53 = vpop.eup %3673 }
 0x773   : > { %2985 = vperm.xlu0 %3471, %v3674_v53   ;;  %v2945_v63 = vpop.permute.xlu1 %2944 }
 0x774   : > { %v2949_v17 = vsub.f32 %v5445_v44, %v2945_v63 }
 0x776   : > { %v2952_v25 = vmul.f32 1.442695, %v2949_v17 }
 0x777   : > { %1940 = vrot.lane.b32.xlu0 %v5527_v30, %s3720_s11  ;;  %v3480_v30 = vld [vmem:[%s4802_s28] sm:$0xff]  }
 0x778   : > { %3675 = vpow2.f32 %v2952_v25  ;;  %3473 = vset.pattern.permute.xlu0 %v6168_v11 }
 0x77b   : > { %2042 = vrot.lane.b32.xlu0 %v5538_v58, %s3722_s13  ;;  %v2359_v58 = vld [vmem:[#allocation3 + $0x8] sm:$0xff] }
 0x77c   : > { %v2371_v19 = vmul.f32 %v2368_v14, %v2359_v58 }
 0x77f   : > { %2144 = vrot.lane.b32.xlu0 %v5575_v40, %s3721_s12 }
 0x781   : > { %v2374_v18 = vpop.permute.xlu0 %2373 }
 0x782   : > { %v3676_v52 = vpop.eup %3675  ;;  %v2380_v29 = vsel %vm2296_vm3, %v2374_v18, 0.0  ;;  %vm6311_vm3 = vcmp.eq.s32.totalorder %v6310_v55, %v3903_v31 }
 0x783   : > { %v2382_v3 = vadd.f32 %v2380_v29, %v2370_v49  ;;  %2246 = vrot.lane.b32.xlu0 %v5597_v7, %s3723_s14  ;;  %2989 = vperm.xlu1 %3472, %v3676_v52   ;;  %v6315_v29 = vld [vmem:[#allocation9_spill] sm:$0xff] }
 0x784   : > { %vm6316_vm5 = vcmp.eq.s32.totalorder %v6315_v29, %v3903_v31 }
 0x785   : > { %2384 = vst.msk [vmem:[#allocation3] sm:$0xff] %vm393_vm0, %v2382_v3 }
 0x787   : > { %2348 = vrot.lane.b32.xlu0 %v5676_v45, %s3725_s16  ;;  %3010 = vrot.lane.b32.xlu1 %v3480_v30, %s3742_s9 }
 0x788   : > { %3474 = vset.pattern.permute.xlu1 %v6168_v11 }
 0x789   : > { %v2378_v40 = vpop.permute.xlu1 %2377 }
 0x78a   : > { %v2381_v41 = vsel %vm6305_vm13, %v2378_v40, 0.0 }
 0x78b   : > { %v2383_v8 = vadd.f32 %v2381_v41, %v2371_v19  ;;  %2450 = vrot.lane.b32.xlu0 %v5708_v23, %s3727_s18  ;;  %1942 = vrot.lane.b32.xlu1 %v5568_v26, %s3720_s11  ;;  %s3743_s11 = smov 16  }
 0x78c   : > { %v2460_v26 = vld [vmem:[#allocation3] sm:$0xff] }
 0x78d   : > { %2385 = vst.msk [vmem:[#allocation3 + $0x8] sm:$0xff] %vm393_vm0, %v2383_v8 }
 0x78e   : > { %v2465_v11 = vpop.permute.xlu1 %2464 }
 0x78f   : > { %2552 = vrot.lane.b32.xlu0 %v5740_v9, %s3728_s24  ;;  %2044 = vrot.lane.b32.xlu1 %v5607_v4, %s3722_s13  ;;  %v2472_v7 = vmul.f32 %v2465_v11, %v2460_v26  ;;  %v6306_v4 = vld [vmem:[#allocation14_spill] sm:$0xff]  ;;  %v2470_v9 = vpop.permute.xlu0 %2469  ;;  %v6317_v11 = vld [vmem:[#allocation28_spill] sm:$0xff] }
 0x790   : > { %vm6307_vm14 = vcmp.eq.s32.totalorder %v6306_v4, %v3903_v31  ;;  %vm6318_vm6 = vcmp.eq.s32.totalorder %v6317_v11, %v3903_v31  ;;  %v6327_v11 = vld [vmem:[#allocation24_spill] sm:$0xff] }
 0x793   : > { %2654 = vrot.lane.b32.xlu0 %v5770_v24, %s3730_s27  ;;  %2146 = vrot.lane.b32.xlu1 %v5635_v35, %s3721_s12 }
 0x797   : > { %2756 = vrot.lane.b32.xlu0 %v5806_v13, %s3732_s30  ;;  %2248 = vrot.lane.b32.xlu1 %v5644_v33, %s3723_s14  ;;  %v2461_v33 = vld [vmem:[#allocation3 + $0x8] sm:$0xff]  ;;  %s374_s14 = scalar_lea.vmem %s6019_s5, %s3804_s22 }
 0x798   : > { %v2473_v13 = vmul.f32 %v2470_v9, %v2461_v33 }
 0x79b   : > { %2858 = vrot.lane.b32.xlu0 %v3668_v54, %s3734_s8  ;;  %v2476_v45 = vpop.permute.xlu1 %2475  ;;  %2350 = vrot.lane.b32.xlu1 %v5691_v48, %s3725_s16  ;;  %v6308_v48 = vld [vmem:[#allocation17_spill] sm:$0xff] }
 0x79c   : > { %v2482_v23 = vsel %vm6307_vm14, %v2476_v45, 0.0  ;;  %vm6309_vm15 = vcmp.eq.s32.totalorder %v6308_v48, %v3903_v31 }
 0x79d   : > { %v2484_v35 = vadd.f32 %v2482_v23, %v2472_v7  ;;  %v6319_v23 = vld [vmem:[#allocation19_spill] sm:$0xff] }
 0x79e   : > { %vm6320_vm7 = vcmp.eq.s32.totalorder %v6319_v23, %v3903_v31 }
 0x79f   : > { %2486 = vst.msk [vmem:[#allocation3] sm:$0xff] %vm393_vm0, %v2484_v35  ;;  %2960 = vrot.lane.b32.xlu0 %v3674_v53, %s3736_s6  ;;  %2452 = vrot.lane.b32.xlu1 %v5714_v34, %s3727_s18  ;;  %v2567_v34 = vpop.permute.xlu0 %2566 }
 0x7a3   : > { %2554 = vrot.lane.b32.xlu1 %v5745_v51, %s3728_s24  ;;  %v2480_v24 = vpop.permute.xlu1 %2479 }
 0x7a4   : > { %v2483_v2 = vsel %vm6309_vm15, %v2480_v24, 0.0 }
 0x7a5   : > { %v2485_v36 = vadd.f32 %v2483_v2, %v2473_v13  ;;  %v6321_v2 = vld [vmem:[#allocation18_spill] sm:$0xff] }
 0x7a6   : > { %v2562_v54 = vld [vmem:[#allocation3] sm:$0xff]  ;;  %vm6322_vm1 = vcmp.eq.s32.totalorder %v6321_v2, %v3903_v31 }
 0x7a7   : > { %2487 = vst.msk [vmem:[#allocation3 + $0x8] sm:$0xff] %vm393_vm0, %v2485_v36  ;;  %2656 = vrot.lane.b32.xlu1 %v5779_v43, %s3730_s27  ;;  %v2574_v59 = vmul.f32 %v2567_v34, %v2562_v54 }
 0x7a8   : > { %v2572_v51 = vpop.permute.xlu1 %2571 }
 0x7ab   : > { %2758 = vrot.lane.b32.xlu1 %v5811_v60, %s3732_s30 }
 0x7ae   : > { %v2563_v21 = vld [vmem:[#allocation3 + $0x8] sm:$0xff] }
 0x7af   : > { %2860 = vrot.lane.b32.xlu1 %v5846_v6, %s3734_s8  ;;  %v2575_v43 = vmul.f32 %v2572_v51, %v2563_v21  ;;  %v6323_v21 = vld [vmem:[#allocation29_spill] sm:$0xff] }
 0x7b0   : > { %v2578_v22 = vpop.permute.xlu0 %2577  ;;  %vm6324_vm9 = vcmp.eq.s32.totalorder %v6323_v21, %v3903_v31 }
 0x7b1   : > { %v2584_v37 = vsel %vm6311_vm3, %v2578_v22, 0.0 }
 0x7b2   : > { %v2586_v10 = vadd.f32 %v2584_v37, %v2574_v59 }
 0x7b3   : > { %2962 = vrot.lane.b32.xlu1 %v3676_v52, %s3736_s6 }
 0x7b4   : > { %2588 = vst.msk [vmem:[#allocation3] sm:$0xff] %vm393_vm0, %v2586_v10  ;;  %v2582_v60 = vpop.permute.xlu1 %2581 }
 0x7b5   : > { %v2585_v0 = vsel %vm6313_vm4, %v2582_v60, 0.0  ;;  %v2674_v18 = vpop.permute.xlu0 %2673 }
 0x7b6   : > { %v2587_v6 = vadd.f32 %v2585_v0, %v2575_v43  ;;  %v6332_v0 = vld [vmem:[#allocation32_spill] sm:$0xff] }
 0x7b8   : > { %2589 = vst.msk [vmem:[#allocation3 + $0x8] sm:$0xff] %vm393_vm0, %v2587_v6 }
 0x7b9   : > { %v2669_v1 = vpop.permute.xlu1 %2668  ;;  %v2771_v58 = vpop.permute.xlu0 %2770 }
 0x7bb   : > { %v2664_v53 = vld [vmem:[#allocation3] sm:$0xff] }
 0x7bc   : > { %v2676_v63 = vmul.f32 %v2669_v1, %v2664_v53  ;;  %v1934_v53 = vld [vmem:[#allocation5] sm:$0xff] }
 0x7be   : > { %v2680_v17 = vpop.permute.xlu1 %2679 }
 0x7bf   : > { %v2665_v25 = vld [vmem:[#allocation3 + $0x8] sm:$0xff]  ;;  %v2686_v50 = vsel %vm2602_vm12, %v2680_v17, 0.0 }
 0x7c0   : > { %v2688_v49 = vadd.f32 %v2686_v50, %v2676_v63  ;;  %v2677_v52 = vmul.f32 %v2674_v18, %v2665_v25  ;;  %v1936_v63 = vmul.f32 %v5428_v27, %v1934_v53 }
 0x7c2   : > { %2690 = vst.msk [vmem:[#allocation3] sm:$0xff] %vm393_vm0, %v2688_v49  ;;  %v2684_v44 = vpop.permute.xlu1 %2683 }
 0x7c3   : > { %v2687_v3 = vsel %vm6316_vm5, %v2684_v44, 0.0 }
 0x7c4   : > { %v2689_v30 = vadd.f32 %v2687_v3, %v2677_v52 }
 0x7c6   : > { %2691 = vst.msk [vmem:[#allocation3 + $0x8] sm:$0xff] %vm393_vm0, %v2689_v30 }
 0x7c7   : > { %v2776_v19 = vpop.permute.xlu1 %2775 }
 0x7c9   : > { %v2766_v40 = vld [vmem:[#allocation3] sm:$0xff] }
 0x7ca   : > { %v2778_v56 = vmul.f32 %v2771_v58, %v2766_v40 }
 0x7cc   : > { %v2782_v41 = vpop.permute.xlu0 %2781 }
 0x7cd   : > { %v2767_v8 = vld [vmem:[#allocation3 + $0x8] sm:$0xff]  ;;  %v2788_v26 = vsel %vm6318_vm6, %v2782_v41, 0.0 }
 0x7ce   : > { %v2790_v7 = vadd.f32 %v2788_v26, %v2778_v56  ;;  %v2779_v45 = vmul.f32 %v2776_v19, %v2767_v8  ;;  %v1935_v19 = vld [vmem:[#allocation5 + $0x8] sm:$0xff] }
 0x7cf   : > { %v1937_v56 = vmul.f32 %v5449_v32, %v1935_v19 }
 0x7d0   : > { %2792 = vst.msk [vmem:[#allocation3] sm:$0xff] %vm393_vm0, %v2790_v7  ;;  %v2786_v4 = vpop.permute.xlu1 %2785 }
 0x7d1   : > { %v2789_v35 = vsel %vm6320_vm7, %v2786_v4, 0.0  ;;  %v2878_v51 = vpop.permute.xlu0 %2877 }
 0x7d2   : > { %v2791_v33 = vadd.f32 %v2789_v35, %v2779_v45 }
 0x7d4   : > { %2793 = vst.msk [vmem:[#allocation3 + $0x8] sm:$0xff] %vm393_vm0, %v2791_v33  ;;  %v6328_v33 = vld [vmem:[#allocation25_spill] sm:$0xff] }
 0x7d5   : > { %v2873_v9 = vpop.permute.xlu1 %2872  ;;  %v2975_v10 = vpop.permute.xlu0 %2974 }
 0x7d7   : > { %v2868_v24 = vld [vmem:[#allocation3] sm:$0xff] }
 0x7d8   : > { %v2880_v13 = vmul.f32 %v2873_v9, %v2868_v24 }
 0x7db   : > { %v2869_v54 = vld [vmem:[#allocation3 + $0x8] sm:$0xff] }
 0x7dc   : > { %v2881_v59 = vmul.f32 %v2878_v51, %v2869_v54  ;;  %v6330_v51 = vld [vmem:[#allocation31_spill] sm:$0xff] }
 0x7dd   : > { %v2884_v48 = vpop.permute.xlu1 %2883 }
 0x7de   : > { %v2890_v36 = vsel %vm6322_vm1, %v2884_v48, 0.0  ;;  %v6329_v48 = vld [vmem:[#allocation34_spill] sm:$0xff] }
 0x7df   : > { %v2892_v34 = vadd.f32 %v2890_v36, %v2880_v13 }
 0x7e1   : > { %2894 = vst.msk [vmem:[#allocation3] sm:$0xff] %vm393_vm0, %v2892_v34 }
 0x7e5   : > { %v2888_v22 = vpop.permute.xlu1 %2887 }
 0x7e6   : > { %v2891_v55 = vsel %vm6324_vm9, %v2888_v22, 0.0 }
 0x7e7   : > { %v2893_v37 = vadd.f32 %v2891_v55, %v2881_v59 }
 0x7e8   : > { %v2970_v43 = vld [vmem:[#allocation3] sm:$0xff] }
 0x7e9   : > { %2895 = vst.msk [vmem:[#allocation3 + $0x8] sm:$0xff] %vm393_vm0, %v2893_v37  ;;  %v2982_v60 = vmul.f32 %v2975_v10, %v2970_v43  ;;  %v6331_v37 = vld [vmem:[#allocation35_spill] sm:$0xff] }
 0x7ea   : > { %v2980_v14 = vpop.permute.xlu1 %2979 }
 0x7f0   : > { %v2971_v50 = vld [vmem:[#allocation3 + $0x8] sm:$0xff] }
 0x7f1   : > { %v2983_v52 = vmul.f32 %v2980_v14, %v2971_v50 }
 0x7f2   : > { %v2986_v5 = vpop.permute.xlu0 %2985 }
 0x7f3   : > { %v2992_v6 = vsel %vm2908_vm8, %v2986_v5, 0.0 }
 0x7f4   : > { %v2994_v1 = vadd.f32 %v2992_v6, %v2982_v60 }
 0x7f6   : > { %2996 = vst.msk [vmem:[#allocation3] sm:$0xff] %vm393_vm0, %v2994_v1  ;;  %v1941_v17 = vpop.permute.xlu0 %1940 }
 0x7f7   : > { %v1946_v25 = vadd.f32 %v1941_v17, %v1936_v63 }
 0x7f9   : > { %1948 = vst.msk [vmem:[#allocation5] sm:$0xff] %vm445_vm2, %v1946_v25 }
 0x7fa   : > { %v2043_v44 = vpop.permute.xlu0 %2042 }
 0x7fd   : > { %v3002_v7 = vld [vmem:[#allocation3] sm:$0xff] }
 0x7fe   : > { %v2145_v45 = vpop.permute.xlu0 %2144 }
 0x800   : > { %v2036_v49 = vld [vmem:[#allocation5] sm:$0xff] }
 0x801   : > { %v2038_v18 = vmul.f32 %v5437_v46, %v2036_v49  ;;  %v6333_v49 = vld [vmem:[#allocation33_spill] sm:$0xff] }
 0x802   : > { %v2990_v29 = vpop.permute.xlu1 %2989  ;;  %v2247_v36 = vpop.permute.xlu0 %2246 }
 0x803   : > { %v2048_v3 = vadd.f32 %v2043_v44, %v2038_v18  ;;  %v2993_v58 = vsel %vm2909_vm10, %v2990_v29, 0.0 }
 0x804   : > { %v2995_v27 = vadd.f32 %v2993_v58, %v2983_v52 }
 0x805   : > { %2050 = vst.msk [vmem:[#allocation5] sm:$0xff] %vm445_vm2, %v2048_v3 }
 0x806   : > { %2997 = vst.msk [vmem:[#allocation3 + $0x8] sm:$0xff] %vm393_vm0, %v2995_v27  ;;  %v3011_v40 = vpop.permute.xlu1 %3010  ;;  %v2349_v43 = vpop.permute.xlu0 %2348 }
 0x807   : > { %3298 = vmatpush3.bf16.msra.mxu0 %v3011_v40 }
 0x80a   : > { %v1943_v41 = vpop.permute.xlu1 %1942  ;;  %v2451_v25 = vpop.permute.xlu0 %2450 }
 0x80b   : > { %v1947_v46 = vadd.f32 %v1943_v41, %v1937_v56 }
 0x80c   : > { %v2138_v8 = vld [vmem:[#allocation5] sm:$0xff] }
 0x80d   : > { %v2140_v26 = vmul.f32 %v6327_v11, %v2138_v8  ;;  %1949 = vst.msk [vmem:[#allocation5 + $0x8] sm:$0xff] %vm445_vm2, %v1947_v46  ;;  %v3003_v31 = vld [vmem:[#allocation3 + $0x8] sm:$0xff] }
 0x80e   : > { %v3004_v4 = vpack.c.bf16 %v3003_v31, %v3002_v7  ;;  %v2045_v32 = vpop.permute.xlu1 %2044  ;;  %v2553_v30 = vpop.permute.xlu0 %2552 }
 0x80f   : > { %v2150_v23 = vadd.f32 %v2145_v45, %v2140_v26 }
 0x810   : > { %3300 = vmatmul.mubr.msk.bf16.vlgmr.msra.gmra.mrb[4].mxu0 %vm393_vm0, %v3004_v4  ;;  %vm3081_vm0 = vcmask 261248  }
 0x811   : > { %2152 = vst.msk [vmem:[#allocation5] sm:$0xff] %vm445_vm2, %v2150_v23 }
 0x812   : > { %v2147_v22 = vpop.permute.xlu1 %2146  ;;  %v2655_v46 = vpop.permute.xlu0 %2654 }
 0x814   : > { %v2037_v35 = vld [vmem:[#allocation5 + $0x8] sm:$0xff] }
 0x815   : > { %v2039_v9 = vmul.f32 %v6328_v33, %v2037_v35 }
 0x816   : > { %v2249_v1 = vpop.permute.xlu1 %2248 }
 0x817   : > { %v2049_v24 = vadd.f32 %v2045_v32, %v2039_v9 }
 0x818   : > { %v2240_v13 = vld [vmem:[#allocation5] sm:$0xff] }
 0x819   : > { %v2242_v2 = vmul.f32 %v6329_v48, %v2240_v13  ;;  %2051 = vst.msk [vmem:[#allocation5 + $0x8] sm:$0xff] %vm445_vm2, %v2049_v24 }
 0x81a   : > { %v2351_v52 = vpop.permute.xlu1 %2350 }
 0x81b   : > { %v2252_v34 = vadd.f32 %v2247_v36, %v2242_v2 }
 0x81d   : > { %2254 = vst.msk [vmem:[#allocation5] sm:$0xff] %vm445_vm2, %v2252_v34 }
 0x81e   : > { %v2453_v40 = vpop.permute.xlu1 %2452 }
 0x820   : > { %v2139_v54 = vld [vmem:[#allocation5 + $0x8] sm:$0xff] }
 0x821   : > { %v2141_v59 = vmul.f32 %v6330_v51, %v2139_v54 }
 0x822   : > { %v2555_v26 = vpop.permute.xlu1 %2554 }
 0x823   : > { %v2151_v21 = vadd.f32 %v2147_v22, %v2141_v59 }
 0x824   : > { %v2342_v55 = vld [vmem:[#allocation5] sm:$0xff] }
 0x825   : > { %v2344_v10 = vmul.f32 %v6331_v37, %v2342_v55  ;;  %2153 = vst.msk [vmem:[#allocation5 + $0x8] sm:$0xff] %vm445_vm2, %v2151_v21 }
 0x826   : > { %v2657_v35 = vpop.permute.xlu1 %2656 }
 0x827   : > { %v2354_v60 = vadd.f32 %v2349_v43, %v2344_v10 }
 0x829   : > { %2356 = vst.msk [vmem:[#allocation5] sm:$0xff] %vm445_vm2, %v2354_v60 }
 0x82a   : > { %v2759_v48 = vpop.permute.xlu1 %2758 }
 0x82c   : > { %v2241_v5 = vld [vmem:[#allocation5 + $0x8] sm:$0xff] }
 0x82d   : > { %v2243_v6 = vmul.f32 %v6332_v0, %v2241_v5 }
 0x82e   : > { %v2861_v59 = vpop.permute.xlu1 %2860 }
 0x82f   : > { %v2253_v53 = vadd.f32 %v2249_v1, %v2243_v6 }
 0x830   : > { %v2444_v63 = vld [vmem:[#allocation5] sm:$0xff] }
 0x831   : > { %v2446_v17 = vmul.f32 %v5698_v62, %v2444_v63  ;;  %2255 = vst.msk [vmem:[#allocation5 + $0x8] sm:$0xff] %vm445_vm2, %v2253_v53 }
 0x832   : > { %v2963_v37 = vpop.permute.xlu1 %2962 }
 0x833   : > { %v2456_v14 = vadd.f32 %v2451_v25, %v2446_v17 }
 0x835   : > { %2458 = vst.msk [vmem:[#allocation5] sm:$0xff] %vm445_vm2, %v2456_v14 }
 0x838   : > { %v2343_v50 = vld [vmem:[#allocation5 + $0x8] sm:$0xff] }
 0x839   : > { %v2345_v18 = vmul.f32 %v6333_v49, %v2343_v50 }
 0x83b   : > { %v2355_v44 = vadd.f32 %v2351_v52, %v2345_v18 }
 0x83c   : > { %v2546_v29 = vld [vmem:[#allocation5] sm:$0xff] }
 0x83d   : > { %v2548_v3 = vmul.f32 %v5693_v47, %v2546_v29  ;;  %2357 = vst.msk [vmem:[#allocation5 + $0x8] sm:$0xff] %vm445_vm2, %v2355_v44 }
 0x83f   : > { %v2558_v58 = vadd.f32 %v2553_v30, %v2548_v3 }
 0x841   : > { %2560 = vst.msk [vmem:[#allocation5] sm:$0xff] %vm445_vm2, %v2558_v58 }
 0x844   : > { %v2445_v62 = vld [vmem:[#allocation5 + $0x8] sm:$0xff] }
 0x845   : > { %v2447_v27 = vmul.f32 %v5685_v20, %v2445_v62  ;;  %v2757_v20 = vpop.permute.xlu0 %2756 }
 0x847   : > { %v2457_v19 = vadd.f32 %v2453_v40, %v2447_v27 }
 0x848   : > { %v2648_v56 = vld [vmem:[#allocation5] sm:$0xff] }
 0x849   : > { %v2650_v41 = vmul.f32 %v5752_v15, %v2648_v56  ;;  %2459 = vst.msk [vmem:[#allocation5 + $0x8] sm:$0xff] %vm445_vm2, %v2457_v19 }
 0x84b   : > { %v2660_v8 = vadd.f32 %v2655_v46, %v2650_v41 }
 0x84d   : > { %2662 = vst.msk [vmem:[#allocation5] sm:$0xff] %vm445_vm2, %v2660_v8 }
 0x850   : > { %v2547_v47 = vld [vmem:[#allocation5 + $0x8] sm:$0xff] }
 0x851   : > { %v2549_v11 = vmul.f32 %v5723_v12, %v2547_v47  ;;  %v2859_v12 = vpop.permute.xlu0 %2858 }
 0x853   : > { %v2559_v7 = vadd.f32 %v2555_v26, %v2549_v11 }
 0x854   : > { %v2750_v31 = vld [vmem:[#allocation5] sm:$0xff] }
 0x855   : > { %v2752_v45 = vmul.f32 %v5754_v38, %v2750_v31  ;;  %2561 = vst.msk [vmem:[#allocation5 + $0x8] sm:$0xff] %vm445_vm2, %v2559_v7 }
 0x857   : > { %v2762_v4 = vadd.f32 %v2757_v20, %v2752_v45 }
 0x859   : > { %2764 = vst.msk [vmem:[#allocation5] sm:$0xff] %vm445_vm2, %v2762_v4 }
 0x85c   : > { %v2649_v15 = vld [vmem:[#allocation5 + $0x8] sm:$0xff] }
 0x85d   : > { %v2651_v23 = vmul.f32 %v5747_v16, %v2649_v15  ;;  %v2961_v16 = vpop.permute.xlu0 %2960 }
 0x85f   : > { %v2661_v33 = vadd.f32 %v2657_v35, %v2651_v23 }
 0x860   : > { %v2852_v9 = vld [vmem:[#allocation5] sm:$0xff] }
 0x861   : > { %v2854_v32 = vmul.f32 %v5825_v57, %v2852_v9  ;;  %2663 = vst.msk [vmem:[#allocation5 + $0x8] sm:$0xff] %vm445_vm2, %v2661_v33 }
 0x863   : > { %v2864_v24 = vadd.f32 %v2859_v12, %v2854_v32 }
 0x865   : > { %2866 = vst.msk [vmem:[#allocation5] sm:$0xff] %vm445_vm2, %v2864_v24 }
 0x868   : > { %v2751_v38 = vld [vmem:[#allocation5 + $0x8] sm:$0xff] }
 0x869   : > { %v2753_v13 = vmul.f32 %v5794_v61, %v2751_v38 }
 0x86b   : > { %v2763_v2 = vadd.f32 %v2759_v48, %v2753_v13 }
 0x86c   : > { %v2954_v36 = vld [vmem:[#allocation5] sm:$0xff] }
 0x86d   : > { %v2956_v34 = vmul.f32 %v5827_v39, %v2954_v36  ;;  %2765 = vst.msk [vmem:[#allocation5 + $0x8] sm:$0xff] %vm445_vm2, %v2763_v2 }
 0x86f   : > { %v2966_v54 = vadd.f32 %v2961_v16, %v2956_v34 }
 0x871   : > { %2968 = vst.msk [vmem:[#allocation5] sm:$0xff] %vm445_vm2, %v2966_v54 }
 0x874   : > { %v2853_v57 = vld [vmem:[#allocation5 + $0x8] sm:$0xff] }
 0x875   : > { %v2855_v51 = vmul.f32 %v5813_v28, %v2853_v57 }
 0x877   : > { %v2865_v22 = vadd.f32 %v2861_v59, %v2855_v51 }
 0x878   : > { %v3057_v21 = vld [vmem:[#allocation5] sm:$0xff] }
 0x879   : > { %2867 = vst.msk [vmem:[#allocation5 + $0x8] sm:$0xff] %vm445_vm2, %v2865_v22  ;;  %3061 = vperm.xlu0 %3473, %v3057_v21  }
 0x880   : > { %v2955_v61 = vld [vmem:[#allocation5 + $0x8] sm:$0xff] }
 0x881   : > { %v2957_v55 = vmul.f32 %v5849_v42, %v2955_v61 }
 0x883   : > { %v2967_v39 = vadd.f32 %v2963_v37, %v2957_v55 }
 0x885   : > { %2969 = vst.msk [vmem:[#allocation5 + $0x8] sm:$0xff] %vm445_vm2, %v2967_v39  ;;  %vm3086_vm2 = vcmask 261120  }
 0x88c   : > { %v3058_v10 = vld [vmem:[#allocation5 + $0x8] sm:$0xff] }
 0x88d   : > { %3066 = vperm.xlu1 %3474, %v3058_v10  }
 0x8e3   : > { %v3050_v43 = vpop.f32.mrb[4].mxu0 }
 0x8e4   : > { %v3301_v60 = vpop.f32.mrb[5].mxu0 }
 0x8e5   : > { %v3053_v5 = vpop.f32.mrb[6].mxu0 }
 0x8e6   : > { %v3302_v28 = vpop.f32.mrb[7].mxu0 }
 0x8f8   : > { %v3062_v0 = vpop.permute.xlu0 %3061 }
 0x8f9   : > { %3677 = vrcp.f32 %v3062_v0 }
 0x903   : > { %v3678_v6 = vpop.eup %3677 }
 0x904   : > { %v3070_v1 = vmul.f32 %v3678_v6, %v3050_v43 }
 0x906   : > { %3075 = vrot.lane.b32.xlu1 %v3070_v1, %s3743_s11 }
 0x90c   : > { %v3067_v53 = vpop.permute.xlu1 %3066 }
 0x90d   : > { %3679 = vrcp.f32 %v3067_v53 }
 0x917   : > { %v3680_v42 = vpop.eup %3679 }
 0x918   : > { %v3072_v63 = vmul.f32 %v3680_v42, %v3053_v5 }
 0x91a   : > { %3077 = vrot.lane.b32.xlu0 %v3072_v63, %s3743_s11 }
 0x978   : > { %v3076_v17 = vpop.permute.xlu1 %3075 }
 0x979   : > { %3082 = vst.msk [vmem:[#allocation6] sm:$0xff] %vm3081_vm0, %v3076_v17 }
 0x980   : > { %v3084_v25 = vld [vmem:[#allocation6] sm:$0xff] }
 0x981   : > { %3087 = vst.msk [vmem:[%s374_s14] sm:$0xff] %vm3086_vm2, %v3084_v25 }
 0x98c   : > { %v3078_v14 = vpop.permute.xlu0 %3077 }
 0x98d   : > { %3083 = vst.msk [vmem:[#allocation6 + $0x8] sm:$0xff] %vm3081_vm0, %v3078_v14 }
 0x994   : > { %v3085_v50 = vld [vmem:[#allocation6 + $0x8] sm:$0xff] }
 0x995   : > { %3088 = vst.msk [vmem:[%s374_s14 + $0x8] sm:$0xff] %vm3086_vm2, %v3085_v50 }
 0x996 PF: > { %s15_s20 = sadd.s32 1, %s3703_s20   ;;  %s6334_s18 = smov %s3699_s19 }
 0x997   : > { %p12_p5 = scmp.ge.s32.totalorder %s15_s20, 4   ;;  %s6335_s19 = smov %s6337_s21 }
 0x999   :  { %14 = sbr.rel (!%p12_p5) target bundleno = 2 (0x2), region = 82 }

</bundles_post_ra>
